<compile_context>
chip_gen: v7x
topology: tpu7x:2x2x1
jax: 0.10.0
libtpu: 0.0.40
codegen_flags: <defaults>
</compile_context>

<pallas_src>
import functools

import jax
import jax.numpy as jnp
from jax.experimental import pallas as pl
from jax.experimental.pallas import tpu as pltpu

EPS = 1e-5

_VMEM_LIMIT_CACHE = None


def _vmem_limit_bytes():
    """Generation-dependent VMEM budget (~3/4 of physical, capped at 100 MiB)."""
    global _VMEM_LIMIT_CACHE
    if _VMEM_LIMIT_CACHE is None:
        try:
            cap = int(pltpu.get_tpu_info().vmem_capacity_bytes)
        except Exception:  # conservative fallback (v7x-sized)
            cap = 64 * 1024 * 1024
        _VMEM_LIMIT_CACHE = max(32 * 1024 * 1024,
                                min((cap * 3) // 4, 100 * 1024 * 1024))
    return _VMEM_LIMIT_CACHE


# ---------------------------------------------------------------------------
# Tile-size helpers
# ---------------------------------------------------------------------------
def _pick_tile_h(H, W, c_max, max_rows=128, max_acc_bytes=128 * 1024):
    """Largest divisor of H whose f32 MXU output tile stays register-sized."""
    best = 1
    for d in range(1, H + 1):
        if H % d == 0 and d * W <= max_rows and d * W * c_max * 4 <= max_acc_bytes:
            best = d
    return best


def _pick_rows(R, row_bytes, max_rows=2048, max_bytes=4 * 1024 * 1024):
    """Largest multiple-of-8 divisor of R within the row/byte caps (big
    lane-dense tiles for the memory-bound stage-3 kernel); falls back to R."""
    best = None
    for d in range(8, min(R, max_rows) + 1, 8):
        if R % d == 0 and d * row_bytes <= max_bytes:
            best = d
    if best is None:
        best = R  # small or awkward R: single resident block
    return best


# ---------------------------------------------------------------------------
# Conv kernel: halo'd row tile -> im2col slab -> single stacked-K MXU dot,
# plus per-image BN statistics accumulated in a VMEM scratch.
# Stage 2 additionally applies BN1 scale/shift + ReLU per tile (normalize).
# ---------------------------------------------------------------------------
def _make_conv_kernel(tile_h, W, c_in, c_out, compute_dtype, normalize):
    def kernel(*refs):
        if normalize:
            (body_ref, top_ref, bot_ref, sc_ref, sh_ref, w_ref,
             y_ref, stats_ref, acc_ref) = refs
        else:
            (body_ref, top_ref, bot_ref, w_ref,
             y_ref, stats_ref, acc_ref) = refs
            sc_ref = sh_ref = None

        g = pl.program_id(1)
        h = pl.program_id(2)
        ht_local = pl.num_programs(2)
        ht_total = pl.num_programs(1) * ht_local
        t = g * ht_local + h                      # global row-tile index

        def prep(rows):
            """f32 math (optional BN1 scale/shift + ReLU), cast to MXU dtype."""
            rows = rows.astype(jnp.float32)
            if normalize:
                rows = jnp.maximum(rows * sc_ref[...] + sh_ref[...], 0.0)
            return rows.astype(compute_dtype)

        body = prep(body_ref[0])                               # (tile_h, W, c_in)
        zrow = jnp.zeros((1, W, c_in), compute_dtype)
        top = jnp.where(t > 0, prep(top_ref[0]), zrow)         # (1, W, c_in)
        bot = jnp.where(t < ht_total - 1, prep(bot_ref[0]), zrow)

        xt = jnp.concatenate([top, body, bot], axis=0)         # (tile_h+2, W, c_in)
        zcol = jnp.zeros((tile_h + 2, 1, c_in), compute_dtype)
        xt = jnp.concatenate([zcol, xt, zcol], axis=1)         # (tile_h+2, W+2, c_in)

        # im2col slab: one big K=9*c_in dot instead of 9 small K=c_in dots.
        cols = [xt[kh:kh + tile_h, kw:kw + W, :].reshape(tile_h * W, c_in)
                for kh in range(3) for kw in range(3)]
        slab = jnp.concatenate(cols, axis=-1)                  # (tile_h*W, 9*c_in)
        acc = jnp.dot(slab, w_ref[...],
                      preferred_element_type=jnp.float32)      # (tile_h*W, c_out)

        y_ref[0] = acc.reshape(tile_h, W, c_out).astype(y_ref.dtype)

        # Per-image BN statistics [sum; sum_sq], accumulated in an f32 VMEM
        # scratch and written back exactly once per (image, h-group).
        ts = jnp.concatenate(
            [jnp.sum(acc, axis=0, keepdims=True),
             jnp.sum(acc * acc, axis=0, keepdims=True)], axis=0)   # (2, c_out)

        @pl.when(h == 0)
        def _():
            acc_ref[...] = ts

        @pl.when(h > 0)
        def _():
            acc_ref[...] = acc_ref[...] + ts

        @pl.when(h == ht_local - 1)
        def _():
            stats_ref[0, 0] = acc_ref[...]

    return kernel


def _conv3x3_bn_stats(x, w9, tile_h, G, scale=None, shift=None,
                      compute_dtype=jnp.float32, out_dtype=jnp.float32):
    """3x3 'same' conv (no bias) of NHWC `x` with weight `w9` = (9*c_in, c_out),
    streamed as halo'd row tiles.  Returns (y, stats) with
    y: (N, H, W, c_out) pre-BN output, stats: (N, G, 2, c_out) f32."""
    N, H, W, c_in = x.shape
    c_out = w9.shape[-1]
    assert H % tile_h == 0
    ht = H // tile_h
    assert ht % G == 0
    ht_local = ht // G
    normalize = scale is not None

    kernel = _make_conv_kernel(tile_h, W, c_in, c_out, compute_dtype, normalize)

    def tile_idx(g, h):
        return g * ht_local + h

    def body_map(n, g, h):
        return (n, tile_idx(g, h), 0, 0)

    def top_map(n, g, h):
        # element row of the halo row above the tile (clamped; zeroed in-kernel)
        return (n, jnp.maximum(tile_idx(g, h) * tile_h - 1, 0), 0, 0)

    def bot_map(n, g, h):
        # element row of the halo row below the tile (clamped; zeroed in-kernel)
        return (n, jnp.minimum((tile_idx(g, h) + 1) * tile_h, H - 1), 0, 0)

    body_spec = pl.BlockSpec((1, tile_h, W, c_in), body_map)
    top_spec = pl.BlockSpec((1, 1, W, c_in), top_map)
    bot_spec = pl.BlockSpec((1, 1, W, c_in), bot_map)
    w_spec = pl.BlockSpec((9 * c_in, c_out), lambda n, g, h: (0, 0))
    vec_spec = pl.BlockSpec((1, c_in), lambda n, g, h: (0, 0))

    in_specs = [body_spec, top_spec, bot_spec]
    inputs = [x, x, x]
    if normalize:
        in_specs += [vec_spec, vec_spec]
        inputs += [scale, shift]
    in_specs.append(w_spec)
    inputs.append(w9)

    return pl.pallas_call(
        kernel,
        out_shape=(jax.ShapeDtypeStruct((N, H, W, c_out), out_dtype),
                   jax.ShapeDtypeStruct((N, G, 2, c_out), jnp.float32)),
        grid_spec=pltpu.PrefetchScalarGridSpec(
            num_scalar_prefetch=0,
            grid=(N, G, ht_local),
            in_specs=in_specs,
            out_specs=[
                pl.BlockSpec((1, tile_h, W, c_out), body_map),
                pl.BlockSpec((1, 1, 2, c_out), lambda n, g, h: (n, g, 0, 0)),
            ],
            scratch_shapes=[pltpu.VMEM((2, c_out), jnp.float32)]),
        compiler_params=pltpu.CompilerParams(
            dimension_semantics=("parallel", "parallel", "arbitrary"),
            vmem_limit_bytes=_vmem_limit_bytes()),
    )(*inputs)


# ---------------------------------------------------------------------------
# Stage 3: BN2 apply + shortcut + final ReLU
# ---------------------------------------------------------------------------
def _bn_add_relu_kernel(y_ref, sc_ref, sh_ref, x_ref, o_ref):
    o_ref[...] = jnp.maximum(
        y_ref[...].astype(jnp.float32) * sc_ref[...] + sh_ref[...]
        + x_ref[...], 0.0).astype(o_ref.dtype)


def _bn_residual_identity(y2, x_nhwc, scale, shift):
    """out = relu(y2*scale + shift + x), lane-dense by folding (W, C) -> lanes."""
    N, H, W, C = y2.shape
    R, L = N * H, W * C
    y_f = y2.reshape(R, L)
    x_f = x_nhwc.reshape(R, L)
    sc = jnp.tile(scale, (1, W))
    sh = jnp.tile(shift, (1, W))
    tile_r = _pick_rows(R, 3 * L * 4)

    row_spec = pl.BlockSpec((tile_r, L), lambda i: (i, 0))
    vec_spec = pl.BlockSpec((1, L), lambda i: (0, 0))
    out = pl.pallas_call(
        _bn_add_relu_kernel,
        out_shape=jax.ShapeDtypeStruct((R, L), jnp.float32),
        grid_spec=pltpu.PrefetchScalarGridSpec(
            num_scalar_prefetch=0,
            grid=(R // tile_r,),
            in_specs=[row_spec, vec_spec, vec_spec, row_spec],
            out_specs=row_spec),
        compiler_params=pltpu.CompilerParams(
            dimension_semantics=("parallel",),
            vmem_limit_bytes=_vmem_limit_bytes()),
    )(y_f, sc, sh, x_f)
    return out.reshape(N, H, W, C)


def _make_bn_proj_relu_kernel(compute_dtype):
    def kernel(y_ref, sc_ref, sh_ref, x_ref, w_ref, o_ref):
        ident = jnp.dot(x_ref[...].astype(compute_dtype), w_ref[...],
                        preferred_element_type=jnp.float32)
        o_ref[...] = jnp.maximum(
            y_ref[...].astype(jnp.float32) * sc_ref[...] + sh_ref[...] + ident,
            0.0).astype(o_ref.dtype)
    return kernel


def _bn_residual_proj(y2, x_nhwc, scale, shift, wid, bid, compute_dtype):
    """out = relu(y2*scale + shift + bid + x @ wid) (1x1-conv shortcut)."""
    N, H, W, C_out = y2.shape
    C_in = x_nhwc.shape[-1]
    M = N * H * W
    y_f = y2.reshape(M, C_out)
    x_f = x_nhwc.reshape(M, C_in)
    sh = shift + bid.reshape(1, -1)      # fold the 1x1-conv bias into BN shift
    tile_m = _pick_rows(M, (2 * C_out + C_in) * 4)

    row_y = pl.BlockSpec((tile_m, C_out), lambda i: (i, 0))
    out = pl.pallas_call(
        _make_bn_proj_relu_kernel(compute_dtype),
        out_shape=jax.ShapeDtypeStruct((M, C_out), jnp.float32),
        grid_spec=pltpu.PrefetchScalarGridSpec(
            num_scalar_prefetch=0,
            grid=(M // tile_m,),
            in_specs=[row_y,
                      pl.BlockSpec((1, C_out), lambda i: (0, 0)),
                      pl.BlockSpec((1, C_out), lambda i: (0, 0)),
                      pl.BlockSpec((tile_m, C_in), lambda i: (i, 0)),
                      pl.BlockSpec((C_in, C_out), lambda i: (0, 0))],
            out_specs=row_y),
        compiler_params=pltpu.CompilerParams(
            dimension_semantics=("parallel",),
            vmem_limit_bytes=_vmem_limit_bytes()),
    )(y_f, scale, sh, x_f, wid.astype(compute_dtype))
    return out.reshape(N, H, W, C_out)


# ---------------------------------------------------------------------------
# BN statistics -> per-channel scale / shift (gamma, beta folded in)
# ---------------------------------------------------------------------------
def _bn_scale_shift(stats, gamma, beta, count):
    s = jnp.sum(stats, axis=(0, 1))                          # (2, C)
    mean = s[0] / count
    # Biased variance via E[x^2] - E[x]^2 in f32; conv outputs here are close
    # to zero-mean so cancellation is benign; the clamp guards tiny negatives.
    var = jnp.maximum(s[1] / count - mean * mean, 0.0)
    scale = gamma.reshape(-1) * jax.lax.rsqrt(var + EPS)
    shift = beta.reshape(-1) - mean * scale
    return (scale.reshape(1, -1).astype(jnp.float32),
            shift.reshape(1, -1).astype(jnp.float32))


# ---------------------------------------------------------------------------
# Forward pass
# ---------------------------------------------------------------------------
def basic_block_forward(x_nchw, params, is_extend,
                        compute_dtype=jnp.bfloat16):
    N, C_in, H, W = x_nchw.shape
    C_out = 2 * C_in if is_extend else C_in
    count = N * H * W

    # TODO(synk): NCHW<->NHWC layout changes remain plain XLA transposes; fusing
    # them into the first/last kernel's DMA would need element-indexed specs.
    x_nhwc = jnp.transpose(x_nchw, (0, 2, 3, 1)).astype(jnp.float32)

    tile_h = _pick_tile_h(H, W, max(C_in, C_out))
    ht = H // tile_h
    # Megacore (v7x): batch is the main parallel axis; if it cannot split
    # evenly across 2 TensorCores, split the row-tile axis instead.
    G = 2 if (N % 2 == 1 and ht % 2 == 0) else 1

    w1 = params["w1"].reshape(9 * C_in, C_in).astype(compute_dtype)
    w2 = params["w2"].reshape(9 * C_in, C_out).astype(compute_dtype)
    inter_dtype = compute_dtype   # bf16 intermediates halve inter-stage HBM traffic

    # Stage 1: conv3x3 (pre-BN) + per-image batch statistics.
    y1, stats1 = _conv3x3_bn_stats(x_nhwc, w1, tile_h, G,
                                   compute_dtype=compute_dtype,
                                   out_dtype=inter_dtype)
    scale1, shift1 = _bn_scale_shift(stats1, params["g1"], params["b1"], count)

    # Stage 2: per-tile BN1 apply + ReLU + conv3x3 (pre-BN) + statistics.
    y2, stats2 = _conv3x3_bn_stats(y1, w2, tile_h, G,
                                   scale=scale1, shift=shift1,
                                   compute_dtype=compute_dtype,
                                   out_dtype=inter_dtype)
    scale2, shift2 = _bn_scale_shift(stats2, params["g2"], params["b2"], count)

    # Stage 3: BN2 apply + shortcut + final ReLU.
    if is_extend:
        out_nhwc = _bn_residual_proj(y2, x_nhwc, scale2, shift2,
                                     params["wid"], params["bid"],
                                     compute_dtype)
    else:
        out_nhwc = _bn_residual_identity(y2, x_nhwc, scale2, shift2)

    return jnp.transpose(out_nhwc, (0, 3, 1, 2))


# ---------------------------------------------------------------------------
# Deterministic parameter initialization (shapes per BasicBlock.__init__)
# ---------------------------------------------------------------------------
def init_params(key, C_in, is_extend):
    C_out = 2 * C_in if is_extend else C_in
    k1, k2, k3, k4 = jax.random.split(key, 4)
    params = {
        "w1": 0.1 * jax.random.normal(k1, (3, 3, C_in, C_in), jnp.float32),
        "w2": 0.1 * jax.random.normal(k2, (3, 3, C_in, C_out), jnp.float32),
        "g1": jnp.ones((1, C_in), jnp.float32),
        "b1": jnp.zeros((1, C_in), jnp.float32),
        "g2": jnp.ones((1, C_out), jnp.float32),
        "b2": jnp.zeros((1, C_out), jnp.float32),
    }
    if is_extend:
        params["wid"] = 0.1 * jax.random.normal(k3, (C_in, C_out), jnp.float32)
        params["bid"] = 0.1 * jax.random.normal(k4, (1, C_out), jnp.float32)
    return params


# ---------------------------------------------------------------------------
# Pure-JAX reference (independent path via lax.conv) for verification
# ---------------------------------------------------------------------------
def reference_forward(x_nchw, params, is_extend):
    x = jnp.transpose(x_nchw, (0, 2, 3, 1)).astype(jnp.float32)

    def conv3(inp, w):
        return jax.lax.conv_general_dilated(
            inp, w, window_strides=(1, 1), padding=((1, 1), (1, 1)),
            dimension_numbers=("NHWC", "HWIO", "NHWC"))

    def bn(inp, g, b):
        mean = jnp.mean(inp, axis=(0, 1, 2), keepdims=True)
        var = jnp.mean((inp - mean) ** 2, axis=(0, 1, 2), keepdims=True)
        return ((inp - mean) * jax.lax.rsqrt(var + EPS)
                * g.reshape(1, 1, 1, -1) + b.reshape(1, 1, 1, -1))

    h = jnp.maximum(bn(conv3(x, params["w1"]), params["g1"], params["b1"]), 0.0)
    y = bn(conv3(h, params["w2"]), params["g2"], params["b2"])
    if is_extend:
        ident = (jnp.einsum("nhwc,co->nhwo", x, params["wid"])
                 + params["bid"].reshape(1, 1, 1, -1))
    else:
        ident = x
    out = jnp.maximum(y + ident, 0.0)
    return jnp.transpose(out, (0, 3, 1, 2))


# ---------------------------------------------------------------------------
if __name__ == "__main__":
    key = jax.random.PRNGKey(0)
    kx, kp0, kp1 = jax.random.split(key, 3)

    N, C_in, H, W = 2, 4, 16, 16
    x = jax.random.normal(kx, (N, C_in, H, W), jnp.float32)

    for is_extend, kp in ((False, kp0), (True, kp1)):
        params = init_params(kp, C_in, is_extend)
        C_out = 2 * C_in if is_extend else C_in

        # f32 path: strict check against the lax.conv reference.
        fwd = jax.jit(functools.partial(basic_block_forward,
                                        is_extend=is_extend,
                                        compute_dtype=jnp.float32))
        out = jax.block_until_ready(fwd(x, params))
        ref = reference_forward(x, params, is_extend)
        assert out.shape == (N, C_out, H, W), out.shape
        assert jnp.allclose(out, ref, rtol=1e-4, atol=1e-4), (
            f"mismatch (is_extend={is_extend}): "
            f"max abs err {jnp.max(jnp.abs(out - ref))}")

        # Default path (bf16 MXU operands + bf16 intermediates, f32 accumulation
        # and BN statistics): sanity-checked only.
        fwd_fast = jax.jit(functools.partial(basic_block_forward,
                                             is_extend=is_extend))
        out_fast = jax.block_until_ready(fwd_fast(x, params))
        assert out_fast.shape == (N, C_out, H, W)
        assert bool(jnp.all(jnp.isfinite(out_fast)))

    print("KERNEL_OK")
</pallas_src>

<mosaic_0001>
module attributes {stable_mosaic.version = 11 : i64} {
  func.func @kernel(%arg0: i32, %arg1: i32, %arg2: i32, %arg3: memref<1x8x16x4xf32, #tpu.memory_space<vmem>>, %arg4: memref<1x1x16x4xf32, #tpu.memory_space<vmem>>, %arg5: memref<1x1x16x4xf32, #tpu.memory_space<vmem>>, %arg6: memref<36x4xf32, #tpu.memory_space<vmem>>, %arg7: memref<1x8x16x4xf32, #tpu.memory_space<vmem>>, %arg8: memref<1x1x2x4xf32, #tpu.memory_space<vmem>>, %arg9: memref<2x4xf32, #tpu.memory_space<vmem>>) attributes {dimension_semantics = [#tpu.dimension_semantics<parallel>, #tpu.dimension_semantics<parallel>, #tpu.dimension_semantics<arbitrary>], iteration_bounds = array<i64: 2, 1, 2>, scalar_prefetch = 0 : i64, scratch_operands = 1 : i64, tpu.core_type = #tpu.core_type<tc>, window_params = [{transform_indices = @transform_0, window_bounds = array<i64: 1, 8, 16, 4>}, {transform_indices = @transform_1, window_bounds = array<i64: 1, 1, 16, 4>}, {transform_indices = @transform_2, window_bounds = array<i64: 1, 1, 16, 4>}, {pipeline_mode = #tpu.pipeline_mode<synchronous>, transform_indices = @transform_3, window_bounds = array<i64: 36, 4>}, {transform_indices = @transform_4, window_bounds = array<i64: 1, 8, 16, 4>}, {transform_indices = @transform_5, window_bounds = array<i64: 1, 1, 2, 4>}]} {
    %c2_i32 = arith.constant 2 : i32
    %0 = arith.muli %arg1, %c2_i32 : i32
    %1 = arith.addi %0, %arg2 : i32
    %c0 = arith.constant 0 : index
    %c0_0 = arith.constant 0 : index
    %c0_1 = arith.constant 0 : index
    %c0_2 = arith.constant 0 : index
    %2 = vector.load %arg3[%c0, %c0_0, %c0_1, %c0_2] : memref<1x8x16x4xf32, #tpu.memory_space<vmem>>, vector<1x8x16x4xf32>
    %3 = vector.shape_cast %2 : vector<1x8x16x4xf32> to vector<8x16x4xf32>
    %cst = arith.constant 0.000000e+00 : f32
    %4 = vector.broadcast %cst : f32 to vector<1x16x4xf32>
    %c0_i32 = arith.constant 0 : i32
    %5 = arith.cmpi sgt, %1, %c0_i32 : i32
    %c0_3 = arith.constant 0 : index
    %c0_4 = arith.constant 0 : index
    %c0_5 = arith.constant 0 : index
    %c0_6 = arith.constant 0 : index
    %6 = vector.load %arg4[%c0_3, %c0_4, %c0_5, %c0_6] : memref<1x1x16x4xf32, #tpu.memory_space<vmem>>, vector<1x1x16x4xf32>
    %7 = vector.shape_cast %6 : vector<1x1x16x4xf32> to vector<1x16x4xf32>
    %8 = arith.select %5, %7, %4 : vector<1x16x4xf32>
    %c1_i32 = arith.constant 1 : i32
    %9 = arith.cmpi slt, %1, %c1_i32 : i32
    %c0_7 = arith.constant 0 : index
    %c0_8 = arith.constant 0 : index
    %c0_9 = arith.constant 0 : index
    %c0_10 = arith.constant 0 : index
    %10 = vector.load %arg5[%c0_7, %c0_8, %c0_9, %c0_10] : memref<1x1x16x4xf32, #tpu.memory_space<vmem>>, vector<1x1x16x4xf32>
    %11 = vector.shape_cast %10 : vector<1x1x16x4xf32> to vector<1x16x4xf32>
    %12 = arith.select %9, %11, %4 : vector<1x16x4xf32>
    %13 = tpu.concatenate %8, %3, %12 in 0 : vector<1x16x4xf32>, vector<8x16x4xf32>, vector<1x16x4xf32> -> vector<10x16x4xf32>
    %cst_11 = arith.constant 0.000000e+00 : f32
    %14 = vector.broadcast %cst_11 : f32 to vector<10x1x4xf32>
    %15 = tpu.concatenate %14, %13, %14 in 1 : vector<10x1x4xf32>, vector<10x16x4xf32>, vector<10x1x4xf32> -> vector<10x18x4xf32>
    %16 = vector.extract_strided_slice %15 {offsets = [0, 0, 0], sizes = [8, 16, 4], strides = [1, 1, 1]} : vector<10x18x4xf32> to vector<8x16x4xf32>
    %17 = vector.shape_cast %16 : vector<8x16x4xf32> to vector<128x4xf32>
    %18 = vector.extract_strided_slice %15 {offsets = [0, 1, 0], sizes = [8, 16, 4], strides = [1, 1, 1]} : vector<10x18x4xf32> to vector<8x16x4xf32>
    %19 = vector.shape_cast %18 : vector<8x16x4xf32> to vector<128x4xf32>
    %20 = vector.extract_strided_slice %15 {offsets = [0, 2, 0], sizes = [8, 16, 4], strides = [1, 1, 1]} : vector<10x18x4xf32> to vector<8x16x4xf32>
    %21 = vector.shape_cast %20 : vector<8x16x4xf32> to vector<128x4xf32>
    %22 = vector.extract_strided_slice %15 {offsets = [1, 0, 0], sizes = [8, 16, 4], strides = [1, 1, 1]} : vector<10x18x4xf32> to vector<8x16x4xf32>
    %23 = vector.shape_cast %22 : vector<8x16x4xf32> to vector<128x4xf32>
    %24 = vector.extract_strided_slice %15 {offsets = [1, 1, 0], sizes = [8, 16, 4], strides = [1, 1, 1]} : vector<10x18x4xf32> to vector<8x16x4xf32>
    %25 = vector.shape_cast %24 : vector<8x16x4xf32> to vector<128x4xf32>
    %26 = vector.extract_strided_slice %15 {offsets = [1, 2, 0], sizes = [8, 16, 4], strides = [1, 1, 1]} : vector<10x18x4xf32> to vector<8x16x4xf32>
    %27 = vector.shape_cast %26 : vector<8x16x4xf32> to vector<128x4xf32>
    %28 = vector.extract_strided_slice %15 {offsets = [2, 0, 0], sizes = [8, 16, 4], strides = [1, 1, 1]} : vector<10x18x4xf32> to vector<8x16x4xf32>
    %29 = vector.shape_cast %28 : vector<8x16x4xf32> to vector<128x4xf32>
    %30 = vector.extract_strided_slice %15 {offsets = [2, 1, 0], sizes = [8, 16, 4], strides = [1, 1, 1]} : vector<10x18x4xf32> to vector<8x16x4xf32>
    %31 = vector.shape_cast %30 : vector<8x16x4xf32> to vector<128x4xf32>
    %32 = vector.extract_strided_slice %15 {offsets = [2, 2, 0], sizes = [8, 16, 4], strides = [1, 1, 1]} : vector<10x18x4xf32> to vector<8x16x4xf32>
    %33 = vector.shape_cast %32 : vector<8x16x4xf32> to vector<128x4xf32>
    %34 = tpu.concatenate %17, %19, %21, %23, %25, %27, %29, %31, %33 in 1 : vector<128x4xf32>, vector<128x4xf32>, vector<128x4xf32>, vector<128x4xf32>, vector<128x4xf32>, vector<128x4xf32>, vector<128x4xf32>, vector<128x4xf32>, vector<128x4xf32> -> vector<128x36xf32>
    %c0_12 = arith.constant 0 : index
    %c0_13 = arith.constant 0 : index
    %35 = vector.load %arg6[%c0_12, %c0_13] : memref<36x4xf32, #tpu.memory_space<vmem>>, vector<36x4xf32>
    %cst_14 = arith.constant dense<0.000000e+00> : vector<128x4xf32>
    %36 = tpu.matmul %34, %35, %cst_14 {dimension_numbers = #tpu.dot_dimension_numbers<[1], [0], [0], [1], [0, 0, 1, 1], [], []>} : vector<128x36xf32>, vector<36x4xf32>, vector<128x4xf32> -> vector<128x4xf32>
    %37 = vector.shape_cast %36 : vector<128x4xf32> to vector<8x16x4xf32>
    %c0_15 = arith.constant 0 : index
    %c0_16 = arith.constant 0 : index
    %c0_17 = arith.constant 0 : index
    %c0_18 = arith.constant 0 : index
    %38 = vector.load %arg7[%c0_15, %c0_16, %c0_17, %c0_18] : memref<1x8x16x4xf32, #tpu.memory_space<vmem>>, vector<1x8x16x4xf32>
    %39 = vector.shape_cast %38 : vector<1x8x16x4xf32> to vector<8x16x4xf32>
    %40 = vector.shape_cast %37 : vector<8x16x4xf32> to vector<1x8x16x4xf32>
    tpu.vector_store %arg7[%c0_15, %c0_16, %c0_17, %c0_18], %40 {strides = array<i32>} : memref<1x8x16x4xf32, #tpu.memory_space<vmem>>, vector<1x8x16x4xf32>,
    %cst_19 = arith.constant dense<0.000000e+00> : vector<4xf32>
    %41 = vector.multi_reduction <add>, %36, %cst_19 [0] : vector<128x4xf32> to vector<4xf32>
    %42 = vector.shape_cast %41 : vector<4xf32> to vector<1x4xf32>
    %43 = arith.mulf %36, %36 : vector<128x4xf32>
    %cst_20 = arith.constant dense<0.000000e+00> : vector<4xf32>
    %44 = vector.multi_reduction <add>, %43, %cst_20 [0] : vector<128x4xf32> to vector<4xf32>
    %45 = vector.shape_cast %44 : vector<4xf32> to vector<1x4xf32>
    %46 = tpu.concatenate %42, %45 in 0 : vector<1x4xf32>, vector<1x4xf32> -> vector<2x4xf32>
    %c0_i32_21 = arith.constant 0 : i32
    %47 = arith.cmpi eq, %arg2, %c0_i32_21 : i32
    %48 = arith.extui %47 : i1 to i32
    %c0_i32_22 = arith.constant 0 : i32
    %49 = arith.cmpi ne, %48, %c0_i32_22 : i32
    scf.if %49 {
      %c0_27 = arith.constant 0 : index
      %c0_28 = arith.constant 0 : index
      %56 = vector.load %arg9[%c0_27, %c0_28] : memref<2x4xf32, #tpu.memory_space<vmem>>, vector<2x4xf32>
      tpu.vector_store %arg9[%c0_27, %c0_28], %46 {strides = array<i32>} : memref<2x4xf32, #tpu.memory_space<vmem>>, vector<2x4xf32>,
    } else {
    }
    %c0_i32_23 = arith.constant 0 : i32
    %50 = arith.cmpi sgt, %arg2, %c0_i32_23 : i32
    %51 = arith.extui %50 : i1 to i32
    %c0_i32_24 = arith.constant 0 : i32
    %52 = arith.cmpi ne, %51, %c0_i32_24 : i32
    scf.if %52 {
      %c0_27 = arith.constant 0 : index
      %c0_28 = arith.constant 0 : index
      %56 = vector.load %arg9[%c0_27, %c0_28] : memref<2x4xf32, #tpu.memory_space<vmem>>, vector<2x4xf32>
      %57 = arith.addf %56, %46 : vector<2x4xf32>
      %c0_29 = arith.constant 0 : index
      %c0_30 = arith.constant 0 : index
      %58 = vector.load %arg9[%c0_29, %c0_30] : memref<2x4xf32, #tpu.memory_space<vmem>>, vector<2x4xf32>
      tpu.vector_store %arg9[%c0_29, %c0_30], %57 {strides = array<i32>} : memref<2x4xf32, #tpu.memory_space<vmem>>, vector<2x4xf32>,
    } else {
    }
    %c1_i32_25 = arith.constant 1 : i32
    %53 = arith.cmpi eq, %arg2, %c1_i32_25 : i32
    %54 = arith.extui %53 : i1 to i32
    %c0_i32_26 = arith.constant 0 : i32
    %55 = arith.cmpi ne, %54, %c0_i32_26 : i32
    scf.if %55 {
      %c0_27 = arith.constant 0 : index
      %c0_28 = arith.constant 0 : index
      %56 = vector.load %arg9[%c0_27, %c0_28] : memref<2x4xf32, #tpu.memory_space<vmem>>, vector<2x4xf32>
      %c0_29 = arith.constant 0 : index
      %c0_30 = arith.constant 0 : index
      %c0_31 = arith.constant 0 : index
      %c0_32 = arith.constant 0 : index
      %57 = vector.load %arg8[%c0_29, %c0_30, %c0_31, %c0_32] : memref<1x1x2x4xf32, #tpu.memory_space<vmem>>, vector<1x1x2x4xf32>
      %58 = vector.shape_cast %57 : vector<1x1x2x4xf32> to vector<2x4xf32>
      %59 = vector.shape_cast %56 : vector<2x4xf32> to vector<1x1x2x4xf32>
      tpu.vector_store %arg8[%c0_29, %c0_30, %c0_31, %c0_32], %59 {strides = array<i32>} : memref<1x1x2x4xf32, #tpu.memory_space<vmem>>, vector<1x1x2x4xf32>,
    } else {
    }
    return
  }
  func.func @transform_0(%arg0: i32, %arg1: i32, %arg2: i32) -> (i32, i32, i32, i32) {
    %c2_i32 = arith.constant 2 : i32
    %0 = arith.muli %arg1, %c2_i32 : i32
    %1 = arith.addi %0, %arg2 : i32
    %c0_i32 = arith.constant 0 : i32
    %c0_i32_0 = arith.constant 0 : i32
    %c0_i32_1 = arith.constant 0 : i32
    return %arg0, %1, %c0_i32, %c0_i32_0 : i32, i32, i32, i32
  }
  func.func @transform_1(%arg0: i32, %arg1: i32, %arg2: i32) -> (i32, i32, i32, i32) {
    %c2_i32 = arith.constant 2 : i32
    %0 = arith.muli %arg1, %c2_i32 : i32
    %1 = arith.addi %0, %arg2 : i32
    %c8_i32 = arith.constant 8 : i32
    %2 = arith.muli %1, %c8_i32 : i32
    %c1_i32 = arith.constant 1 : i32
    %3 = arith.subi %2, %c1_i32 : i32
    %c0_i32 = arith.constant 0 : i32
    %4 = arith.maxsi %3, %c0_i32 : i32
    %c0_i32_0 = arith.constant 0 : i32
    %c0_i32_1 = arith.constant 0 : i32
    %c0_i32_2 = arith.constant 0 : i32
    return %arg0, %4, %c0_i32_0, %c0_i32_1 : i32, i32, i32, i32
  }
  func.func @transform_2(%arg0: i32, %arg1: i32, %arg2: i32) -> (i32, i32, i32, i32) {
    %c2_i32 = arith.constant 2 : i32
    %0 = arith.muli %arg1, %c2_i32 : i32
    %1 = arith.addi %0, %arg2 : i32
    %c1_i32 = arith.constant 1 : i32
    %2 = arith.addi %1, %c1_i32 : i32
    %c8_i32 = arith.constant 8 : i32
    %3 = arith.muli %2, %c8_i32 : i32
    %c15_i32 = arith.constant 15 : i32
    %4 = arith.minsi %3, %c15_i32 : i32
    %c0_i32 = arith.constant 0 : i32
    %c0_i32_0 = arith.constant 0 : i32
    %c0_i32_1 = arith.constant 0 : i32
    return %arg0, %4, %c0_i32, %c0_i32_0 : i32, i32, i32, i32
  }
  func.func @transform_3(%arg0: i32, %arg1: i32, %arg2: i32) -> (i32, i32) {
    %c0_i32 = arith.constant 0 : i32
    %c0_i32_0 = arith.constant 0 : i32
    %c0_i32_1 = arith.constant 0 : i32
    return %c0_i32, %c0_i32_0 : i32, i32
  }
  func.func @transform_4(%arg0: i32, %arg1: i32, %arg2: i32) -> (i32, i32, i32, i32) {
    %c2_i32 = arith.constant 2 : i32
    %0 = arith.muli %arg1, %c2_i32 : i32
    %1 = arith.addi %0, %arg2 : i32
    %c0_i32 = arith.constant 0 : i32
    %c0_i32_0 = arith.constant 0 : i32
    %c0_i32_1 = arith.constant 0 : i32
    return %arg0, %1, %c0_i32, %c0_i32_0 : i32, i32, i32, i32
  }
  func.func @transform_5(%arg0: i32, %arg1: i32, %arg2: i32) -> (i32, i32, i32, i32) {
    %c0_i32 = arith.constant 0 : i32
    %c0_i32_0 = arith.constant 0 : i32
    %c0_i32_1 = arith.constant 0 : i32
    return %arg0, %arg1, %c0_i32, %c0_i32_0 : i32, i32, i32, i32
  }
}

module attributes {stable_mosaic.version = 11 : i64} {
  func.func @kernel(%arg0: i32, %arg1: i32, %arg2: i32, %arg3: memref<1x8x16x4xf32, #tpu.memory_space<vmem>>, %arg4: memref<1x1x16x4xf32, #tpu.memory_space<vmem>>, %arg5: memref<1x1x16x4xf32, #tpu.memory_space<vmem>>, %arg6: memref<1x4xf32, #tpu.memory_space<vmem>>, %arg7: memref<1x4xf32, #tpu.memory_space<vmem>>, %arg8: memref<36x4xf32, #tpu.memory_space<vmem>>, %arg9: memref<1x8x16x4xf32, #tpu.memory_space<vmem>>, %arg10: memref<1x1x2x4xf32, #tpu.memory_space<vmem>>, %arg11: memref<2x4xf32, #tpu.memory_space<vmem>>) attributes {dimension_semantics = [#tpu.dimension_semantics<parallel>, #tpu.dimension_semantics<parallel>, #tpu.dimension_semantics<arbitrary>], iteration_bounds = array<i64: 2, 1, 2>, scalar_prefetch = 0 : i64, scratch_operands = 1 : i64, tpu.core_type = #tpu.core_type<tc>, window_params = [{transform_indices = @transform_0, window_bounds = array<i64: 1, 8, 16, 4>}, {transform_indices = @transform_1, window_bounds = array<i64: 1, 1, 16, 4>}, {transform_indices = @transform_2, window_bounds = array<i64: 1, 1, 16, 4>}, {pipeline_mode = #tpu.pipeline_mode<synchronous>, transform_indices = @transform_3, window_bounds = array<i64: 1, 4>}, {pipeline_mode = #tpu.pipeline_mode<synchronous>, transform_indices = @transform_4, window_bounds = array<i64: 1, 4>}, {pipeline_mode = #tpu.pipeline_mode<synchronous>, transform_indices = @transform_5, window_bounds = array<i64: 36, 4>}, {transform_indices = @transform_6, window_bounds = array<i64: 1, 8, 16, 4>}, {transform_indices = @transform_7, window_bounds = array<i64: 1, 1, 2, 4>}]} {
    %c2_i32 = arith.constant 2 : i32
    %0 = arith.muli %arg1, %c2_i32 : i32
    %1 = arith.addi %0, %arg2 : i32
    %c0 = arith.constant 0 : index
    %c0_0 = arith.constant 0 : index
    %c0_1 = arith.constant 0 : index
    %c0_2 = arith.constant 0 : index
    %2 = vector.load %arg3[%c0, %c0_0, %c0_1, %c0_2] : memref<1x8x16x4xf32, #tpu.memory_space<vmem>>, vector<1x8x16x4xf32>
    %3 = vector.shape_cast %2 : vector<1x8x16x4xf32> to vector<8x16x4xf32>
    %c0_3 = arith.constant 0 : index
    %c0_4 = arith.constant 0 : index
    %4 = vector.load %arg6[%c0_3, %c0_4] : memref<1x4xf32, #tpu.memory_space<vmem>>, vector<1x4xf32>
    %5 = vector.shape_cast %4 : vector<1x4xf32> to vector<1x1x4xf32>
    %6 = vector.broadcast %5 : vector<1x1x4xf32> to vector<8x16x4xf32>
    %7 = arith.mulf %3, %6 : vector<8x16x4xf32>
    %c0_5 = arith.constant 0 : index
    %c0_6 = arith.constant 0 : index
    %8 = vector.load %arg7[%c0_5, %c0_6] : memref<1x4xf32, #tpu.memory_space<vmem>>, vector<1x4xf32>
    %9 = vector.shape_cast %8 : vector<1x4xf32> to vector<1x1x4xf32>
    %10 = vector.broadcast %9 : vector<1x1x4xf32> to vector<8x16x4xf32>
    %11 = arith.addf %7, %10 : vector<8x16x4xf32>
    %cst = arith.constant 0.000000e+00 : f32
    %12 = vector.broadcast %cst : f32 to vector<8x16x4xf32>
    %13 = arith.maximumf %11, %12 : vector<8x16x4xf32>
    %cst_7 = arith.constant 0.000000e+00 : f32
    %14 = vector.broadcast %cst_7 : f32 to vector<1x16x4xf32>
    %c0_i32 = arith.constant 0 : i32
    %15 = arith.cmpi sgt, %1, %c0_i32 : i32
    %c0_8 = arith.constant 0 : index
    %c0_9 = arith.constant 0 : index
    %c0_10 = arith.constant 0 : index
    %c0_11 = arith.constant 0 : index
    %16 = vector.load %arg4[%c0_8, %c0_9, %c0_10, %c0_11] : memref<1x1x16x4xf32, #tpu.memory_space<vmem>>, vector<1x1x16x4xf32>
    %17 = vector.shape_cast %16 : vector<1x1x16x4xf32> to vector<1x16x4xf32>
    %c0_12 = arith.constant 0 : index
    %c0_13 = arith.constant 0 : index
    %18 = vector.load %arg6[%c0_12, %c0_13] : memref<1x4xf32, #tpu.memory_space<vmem>>, vector<1x4xf32>
    %19 = vector.shape_cast %18 : vector<1x4xf32> to vector<1x1x4xf32>
    %20 = vector.broadcast %19 : vector<1x1x4xf32> to vector<1x16x4xf32>
    %21 = arith.mulf %17, %20 : vector<1x16x4xf32>
    %c0_14 = arith.constant 0 : index
    %c0_15 = arith.constant 0 : index
    %22 = vector.load %arg7[%c0_14, %c0_15] : memref<1x4xf32, #tpu.memory_space<vmem>>, vector<1x4xf32>
    %23 = vector.shape_cast %22 : vector<1x4xf32> to vector<1x1x4xf32>
    %24 = vector.broadcast %23 : vector<1x1x4xf32> to vector<1x16x4xf32>
    %25 = arith.addf %21, %24 : vector<1x16x4xf32>
    %cst_16 = arith.constant 0.000000e+00 : f32
    %26 = vector.broadcast %cst_16 : f32 to vector<1x16x4xf32>
    %27 = arith.maximumf %25, %26 : vector<1x16x4xf32>
    %28 = arith.select %15, %27, %14 : vector<1x16x4xf32>
    %c1_i32 = arith.constant 1 : i32
    %29 = arith.cmpi slt, %1, %c1_i32 : i32
    %c0_17 = arith.constant 0 : index
    %c0_18 = arith.constant 0 : index
    %c0_19 = arith.constant 0 : index
    %c0_20 = arith.constant 0 : index
    %30 = vector.load %arg5[%c0_17, %c0_18, %c0_19, %c0_20] : memref<1x1x16x4xf32, #tpu.memory_space<vmem>>, vector<1x1x16x4xf32>
    %31 = vector.shape_cast %30 : vector<1x1x16x4xf32> to vector<1x16x4xf32>
    %c0_21 = arith.constant 0 : index
    %c0_22 = arith.constant 0 : index
    %32 = vector.load %arg6[%c0_21, %c0_22] : memref<1x4xf32, #tpu.memory_space<vmem>>, vector<1x4xf32>
    %33 = vector.shape_cast %32 : vector<1x4xf32> to vector<1x1x4xf32>
    %34 = vector.broadcast %33 : vector<1x1x4xf32> to vector<1x16x4xf32>
    %35 = arith.mulf %31, %34 : vector<1x16x4xf32>
    %c0_23 = arith.constant 0 : index
    %c0_24 = arith.constant 0 : index
    %36 = vector.load %arg7[%c0_23, %c0_24] : memref<1x4xf32, #tpu.memory_space<vmem>>, vector<1x4xf32>
    %37 = vector.shape_cast %36 : vector<1x4xf32> to vector<1x1x4xf32>
    %38 = vector.broadcast %37 : vector<1x1x4xf32> to vector<1x16x4xf32>
    %39 = arith.addf %35, %38 : vector<1x16x4xf32>
    %cst_25 = arith.constant 0.000000e+00 : f32
    %40 = vector.broadcast %cst_25 : f32 to vector<1x16x4xf32>
    %41 = arith.maximumf %39, %40 : vector<1x16x4xf32>
    %42 = arith.select %29, %41, %14 : vector<1x16x4xf32>
    %43 = tpu.concatenate %28, %13, %42 in 0 : vector<1x16x4xf32>, vector<8x16x4xf32>, vector<1x16x4xf32> -> vector<10x16x4xf32>
    %cst_26 = arith.constant 0.000000e+00 : f32
    %44 = vector.broadcast %cst_26 : f32 to vector<10x1x4xf32>
    %45 = tpu.concatenate %44, %43, %44 in 1 : vector<10x1x4xf32>, vector<10x16x4xf32>, vector<10x1x4xf32> -> vector<10x18x4xf32>
    %46 = vector.extract_strided_slice %45 {offsets = [0, 0, 0], sizes = [8, 16, 4], strides = [1, 1, 1]} : vector<10x18x4xf32> to vector<8x16x4xf32>
    %47 = vector.shape_cast %46 : vector<8x16x4xf32> to vector<128x4xf32>
    %48 = vector.extract_strided_slice %45 {offsets = [0, 1, 0], sizes = [8, 16, 4], strides = [1, 1, 1]} : vector<10x18x4xf32> to vector<8x16x4xf32>
    %49 = vector.shape_cast %48 : vector<8x16x4xf32> to vector<128x4xf32>
    %50 = vector.extract_strided_slice %45 {offsets = [0, 2, 0], sizes = [8, 16, 4], strides = [1, 1, 1]} : vector<10x18x4xf32> to vector<8x16x4xf32>
    %51 = vector.shape_cast %50 : vector<8x16x4xf32> to vector<128x4xf32>
    %52 = vector.extract_strided_slice %45 {offsets = [1, 0, 0], sizes = [8, 16, 4], strides = [1, 1, 1]} : vector<10x18x4xf32> to vector<8x16x4xf32>
    %53 = vector.shape_cast %52 : vector<8x16x4xf32> to vector<128x4xf32>
    %54 = vector.extract_strided_slice %45 {offsets = [1, 1, 0], sizes = [8, 16, 4], strides = [1, 1, 1]} : vector<10x18x4xf32> to vector<8x16x4xf32>
    %55 = vector.shape_cast %54 : vector<8x16x4xf32> to vector<128x4xf32>
    %56 = vector.extract_strided_slice %45 {offsets = [1, 2, 0], sizes = [8, 16, 4], strides = [1, 1, 1]} : vector<10x18x4xf32> to vector<8x16x4xf32>
    %57 = vector.shape_cast %56 : vector<8x16x4xf32> to vector<128x4xf32>
    %58 = vector.extract_strided_slice %45 {offsets = [2, 0, 0], sizes = [8, 16, 4], strides = [1, 1, 1]} : vector<10x18x4xf32> to vector<8x16x4xf32>
    %59 = vector.shape_cast %58 : vector<8x16x4xf32> to vector<128x4xf32>
    %60 = vector.extract_strided_slice %45 {offsets = [2, 1, 0], sizes = [8, 16, 4], strides = [1, 1, 1]} : vector<10x18x4xf32> to vector<8x16x4xf32>
    %61 = vector.shape_cast %60 : vector<8x16x4xf32> to vector<128x4xf32>
    %62 = vector.extract_strided_slice %45 {offsets = [2, 2, 0], sizes = [8, 16, 4], strides = [1, 1, 1]} : vector<10x18x4xf32> to vector<8x16x4xf32>
    %63 = vector.shape_cast %62 : vector<8x16x4xf32> to vector<128x4xf32>
    %64 = tpu.concatenate %47, %49, %51, %53, %55, %57, %59, %61, %63 in 1 : vector<128x4xf32>, vector<128x4xf32>, vector<128x4xf32>, vector<128x4xf32>, vector<128x4xf32>, vector<128x4xf32>, vector<128x4xf32>, vector<128x4xf32>, vector<128x4xf32> -> vector<128x36xf32>
    %c0_27 = arith.constant 0 : index
    %c0_28 = arith.constant 0 : index
    %65 = vector.load %arg8[%c0_27, %c0_28] : memref<36x4xf32, #tpu.memory_space<vmem>>, vector<36x4xf32>
    %cst_29 = arith.constant dense<0.000000e+00> : vector<128x4xf32>
    %66 = tpu.matmul %64, %65, %cst_29 {dimension_numbers = #tpu.dot_dimension_numbers<[1], [0], [0], [1], [0, 0, 1, 1], [], []>} : vector<128x36xf32>, vector<36x4xf32>, vector<128x4xf32> -> vector<128x4xf32>
    %67 = vector.shape_cast %66 : vector<128x4xf32> to vector<8x16x4xf32>
    %c0_30 = arith.constant 0 : index
    %c0_31 = arith.constant 0 : index
    %c0_32 = arith.constant 0 : index
    %c0_33 = arith.constant 0 : index
    %68 = vector.load %arg9[%c0_30, %c0_31, %c0_32, %c0_33] : memref<1x8x16x4xf32, #tpu.memory_space<vmem>>, vector<1x8x16x4xf32>
    %69 = vector.shape_cast %68 : vector<1x8x16x4xf32> to vector<8x16x4xf32>
    %70 = vector.shape_cast %67 : vector<8x16x4xf32> to vector<1x8x16x4xf32>
    tpu.vector_store %arg9[%c0_30, %c0_31, %c0_32, %c0_33], %70 {strides = array<i32>} : memref<1x8x16x4xf32, #tpu.memory_space<vmem>>, vector<1x8x16x4xf32>,
    %cst_34 = arith.constant dense<0.000000e+00> : vector<4xf32>
    %71 = vector.multi_reduction <add>, %66, %cst_34 [0] : vector<128x4xf32> to vector<4xf32>
    %72 = vector.shape_cast %71 : vector<4xf32> to vector<1x4xf32>
    %73 = arith.mulf %66, %66 : vector<128x4xf32>
    %cst_35 = arith.constant dense<0.000000e+00> : vector<4xf32>
    %74 = vector.multi_reduction <add>, %73, %cst_35 [0] : vector<128x4xf32> to vector<4xf32>
    %75 = vector.shape_cast %74 : vector<4xf32> to vector<1x4xf32>
    %76 = tpu.concatenate %72, %75 in 0 : vector<1x4xf32>, vector<1x4xf32> -> vector<2x4xf32>
    %c0_i32_36 = arith.constant 0 : i32
    %77 = arith.cmpi eq, %arg2, %c0_i32_36 : i32
    %78 = arith.extui %77 : i1 to i32
    %c0_i32_37 = arith.constant 0 : i32
    %79 = arith.cmpi ne, %78, %c0_i32_37 : i32
    scf.if %79 {
      %c0_42 = arith.constant 0 : index
      %c0_43 = arith.constant 0 : index
      %86 = vector.load %arg11[%c0_42, %c0_43] : memref<2x4xf32, #tpu.memory_space<vmem>>, vector<2x4xf32>
      tpu.vector_store %arg11[%c0_42, %c0_43], %76 {strides = array<i32>} : memref<2x4xf32, #tpu.memory_space<vmem>>, vector<2x4xf32>,
    } else {
    }
    %c0_i32_38 = arith.constant 0 : i32
    %80 = arith.cmpi sgt, %arg2, %c0_i32_38 : i32
    %81 = arith.extui %80 : i1 to i32
    %c0_i32_39 = arith.constant 0 : i32
    %82 = arith.cmpi ne, %81, %c0_i32_39 : i32
    scf.if %82 {
      %c0_42 = arith.constant 0 : index
      %c0_43 = arith.constant 0 : index
      %86 = vector.load %arg11[%c0_42, %c0_43] : memref<2x4xf32, #tpu.memory_space<vmem>>, vector<2x4xf32>
      %87 = arith.addf %86, %76 : vector<2x4xf32>
      %c0_44 = arith.constant 0 : index
      %c0_45 = arith.constant 0 : index
      %88 = vector.load %arg11[%c0_44, %c0_45] : memref<2x4xf32, #tpu.memory_space<vmem>>, vector<2x4xf32>
      tpu.vector_store %arg11[%c0_44, %c0_45], %87 {strides = array<i32>} : memref<2x4xf32, #tpu.memory_space<vmem>>, vector<2x4xf32>,
    } else {
    }
    %c1_i32_40 = arith.constant 1 : i32
    %83 = arith.cmpi eq, %arg2, %c1_i32_40 : i32
    %84 = arith.extui %83 : i1 to i32
    %c0_i32_41 = arith.constant 0 : i32
    %85 = arith.cmpi ne, %84, %c0_i32_41 : i32
    scf.if %85 {
      %c0_42 = arith.constant 0 : index
      %c0_43 = arith.constant 0 : index
      %86 = vector.load %arg11[%c0_42, %c0_43] : memref<2x4xf32, #tpu.memory_space<vmem>>, vector<2x4xf32>
      %c0_44 = arith.constant 0 : index
      %c0_45 = arith.constant 0 : index
      %c0_46 = arith.constant 0 : index
      %c0_47 = arith.constant 0 : index
      %87 = vector.load %arg10[%c0_44, %c0_45, %c0_46, %c0_47] : memref<1x1x2x4xf32, #tpu.memory_space<vmem>>, vector<1x1x2x4xf32>
      %88 = vector.shape_cast %87 : vector<1x1x2x4xf32> to vector<2x4xf32>
      %89 = vector.shape_cast %86 : vector<2x4xf32> to vector<1x1x2x4xf32>
      tpu.vector_store %arg10[%c0_44, %c0_45, %c0_46, %c0_47], %89 {strides = array<i32>} : memref<1x1x2x4xf32, #tpu.memory_space<vmem>>, vector<1x1x2x4xf32>,
    } else {
    }
    return
  }
  func.func @transform_0(%arg0: i32, %arg1: i32, %arg2: i32) -> (i32, i32, i32, i32) {
    %c2_i32 = arith.constant 2 : i32
    %0 = arith.muli %arg1, %c2_i32 : i32
    %1 = arith.addi %0, %arg2 : i32
    %c0_i32 = arith.constant 0 : i32
    %c0_i32_0 = arith.constant 0 : i32
    %c0_i32_1 = arith.constant 0 : i32
    return %arg0, %1, %c0_i32, %c0_i32_0 : i32, i32, i32, i32
  }
  func.func @transform_1(%arg0: i32, %arg1: i32, %arg2: i32) -> (i32, i32, i32, i32) {
    %c2_i32 = arith.constant 2 : i32
    %0 = arith.muli %arg1, %c2_i32 : i32
    %1 = arith.addi %0, %arg2 : i32
    %c8_i32 = arith.constant 8 : i32
    %2 = arith.muli %1, %c8_i32 : i32
    %c1_i32 = arith.constant 1 : i32
    %3 = arith.subi %2, %c1_i32 : i32
    %c0_i32 = arith.constant 0 : i32
    %4 = arith.maxsi %3, %c0_i32 : i32
    %c0_i32_0 = arith.constant 0 : i32
    %c0_i32_1 = arith.constant 0 : i32
    %c0_i32_2 = arith.constant 0 : i32
    return %arg0, %4, %c0_i32_0, %c0_i32_1 : i32, i32, i32, i32
  }
  func.func @transform_2(%arg0: i32, %arg1: i32, %arg2: i32) -> (i32, i32, i32, i32) {
    %c2_i32 = arith.constant 2 : i32
    %0 = arith.muli %arg1, %c2_i32 : i32
    %1 = arith.addi %0, %arg2 : i32
    %c1_i32 = arith.constant 1 : i32
    %2 = arith.addi %1, %c1_i32 : i32
    %c8_i32 = arith.constant 8 : i32
    %3 = arith.muli %2, %c8_i32 : i32
    %c15_i32 = arith.constant 15 : i32
    %4 = arith.minsi %3, %c15_i32 : i32
    %c0_i32 = arith.constant 0 : i32
    %c0_i32_0 = arith.constant 0 : i32
    %c0_i32_1 = arith.constant 0 : i32
    return %arg0, %4, %c0_i32, %c0_i32_0 : i32, i32, i32, i32
  }
  func.func @transform_3(%arg0: i32, %arg1: i32, %arg2: i32) -> (i32, i32) {
    %c0_i32 = arith.constant 0 : i32
    %c0_i32_0 = arith.constant 0 : i32
    %c0_i32_1 = arith.constant 0 : i32
    return %c0_i32, %c0_i32_0 : i32, i32
  }
  func.func @transform_4(%arg0: i32, %arg1: i32, %arg2: i32) -> (i32, i32) {
    %c0_i32 = arith.constant 0 : i32
    %c0_i32_0 = arith.constant 0 : i32
    %c0_i32_1 = arith.constant 0 : i32
    return %c0_i32, %c0_i32_0 : i32, i32
  }
  func.func @transform_5(%arg0: i32, %arg1: i32, %arg2: i32) -> (i32, i32) {
    %c0_i32 = arith.constant 0 : i32
    %c0_i32_0 = arith.constant 0 : i32
    %c0_i32_1 = arith.constant 0 : i32
    return %c0_i32, %c0_i32_0 : i32, i32
  }
  func.func @transform_6(%arg0: i32, %arg1: i32, %arg2: i32) -> (i32, i32, i32, i32) {
    %c2_i32 = arith.constant 2 : i32
    %0 = arith.muli %arg1, %c2_i32 : i32
    %1 = arith.addi %0, %arg2 : i32
    %c0_i32 = arith.constant 0 : i32
    %c0_i32_0 = arith.constant 0 : i32
    %c0_i32_1 = arith.constant 0 : i32
    return %arg0, %1, %c0_i32, %c0_i32_0 : i32, i32, i32, i32
  }
  func.func @transform_7(%arg0: i32, %arg1: i32, %arg2: i32) -> (i32, i32, i32, i32) {
    %c0_i32 = arith.constant 0 : i32
    %c0_i32_0 = arith.constant 0 : i32
    %c0_i32_1 = arith.constant 0 : i32
    return %arg0, %arg1, %c0_i32, %c0_i32_0 : i32, i32, i32, i32
  }
}

module attributes {stable_mosaic.version = 11 : i64} {
  func.func @_bn_add_relu_kernel(%arg0: i32, %arg1: memref<32x64xf32, #tpu.memory_space<vmem>>, %arg2: memref<1x64xf32, #tpu.memory_space<vmem>>, %arg3: memref<1x64xf32, #tpu.memory_space<vmem>>, %arg4: memref<32x64xf32, #tpu.memory_space<vmem>>, %arg5: memref<32x64xf32, #tpu.memory_space<vmem>>) attributes {dimension_semantics = [#tpu.dimension_semantics<parallel>], iteration_bounds = array<i64: 1>, scalar_prefetch = 0 : i64, scratch_operands = 0 : i64, tpu.core_type = #tpu.core_type<tc>, window_params = [{transform_indices = @transform_0, window_bounds = array<i64: 32, 64>}, {pipeline_mode = #tpu.pipeline_mode<synchronous>, transform_indices = @transform_1, window_bounds = array<i64: 1, 64>}, {pipeline_mode = #tpu.pipeline_mode<synchronous>, transform_indices = @transform_2, window_bounds = array<i64: 1, 64>}, {transform_indices = @transform_3, window_bounds = array<i64: 32, 64>}, {transform_indices = @transform_4, window_bounds = array<i64: 32, 64>}]} {
    %c0 = arith.constant 0 : index
    %c0_0 = arith.constant 0 : index
    %0 = vector.load %arg1[%c0, %c0_0] : memref<32x64xf32, #tpu.memory_space<vmem>>, vector<32x64xf32>
    %c0_1 = arith.constant 0 : index
    %c0_2 = arith.constant 0 : index
    %1 = vector.load %arg2[%c0_1, %c0_2] : memref<1x64xf32, #tpu.memory_space<vmem>>, vector<1x64xf32>
    %2 = vector.broadcast %1 : vector<1x64xf32> to vector<32x64xf32>
    %3 = arith.mulf %0, %2 : vector<32x64xf32>
    %c0_3 = arith.constant 0 : index
    %c0_4 = arith.constant 0 : index
    %4 = vector.load %arg3[%c0_3, %c0_4] : memref<1x64xf32, #tpu.memory_space<vmem>>, vector<1x64xf32>
    %5 = vector.broadcast %4 : vector<1x64xf32> to vector<32x64xf32>
    %6 = arith.addf %3, %5 : vector<32x64xf32>
    %c0_5 = arith.constant 0 : index
    %c0_6 = arith.constant 0 : index
    %7 = vector.load %arg4[%c0_5, %c0_6] : memref<32x64xf32, #tpu.memory_space<vmem>>, vector<32x64xf32>
    %8 = arith.addf %6, %7 : vector<32x64xf32>
    %cst = arith.constant 0.000000e+00 : f32
    %9 = vector.broadcast %cst : f32 to vector<32x64xf32>
    %10 = arith.maximumf %8, %9 : vector<32x64xf32>
    %c0_7 = arith.constant 0 : index
    %c0_8 = arith.constant 0 : index
    %11 = vector.load %arg5[%c0_7, %c0_8] : memref<32x64xf32, #tpu.memory_space<vmem>>, vector<32x64xf32>
    tpu.vector_store %arg5[%c0_7, %c0_8], %10 {strides = array<i32>} : memref<32x64xf32, #tpu.memory_space<vmem>>, vector<32x64xf32>,
    return
  }
  func.func @transform_0(%arg0: i32) -> (i32, i32) {
    %c0_i32 = arith.constant 0 : i32
    %c0_i32_0 = arith.constant 0 : i32
    return %arg0, %c0_i32 : i32, i32
  }
  func.func @transform_1(%arg0: i32) -> (i32, i32) {
    %c0_i32 = arith.constant 0 : i32
    %c0_i32_0 = arith.constant 0 : i32
    %c0_i32_1 = arith.constant 0 : i32
    return %c0_i32, %c0_i32_0 : i32, i32
  }
  func.func @transform_2(%arg0: i32) -> (i32, i32) {
    %c0_i32 = arith.constant 0 : i32
    %c0_i32_0 = arith.constant 0 : i32
    %c0_i32_1 = arith.constant 0 : i32
    return %c0_i32, %c0_i32_0 : i32, i32
  }
  func.func @transform_3(%arg0: i32) -> (i32, i32) {
    %c0_i32 = arith.constant 0 : i32
    %c0_i32_0 = arith.constant 0 : i32
    return %arg0, %c0_i32 : i32, i32
  }
  func.func @transform_4(%arg0: i32) -> (i32, i32) {
    %c0_i32 = arith.constant 0 : i32
    %c0_i32_0 = arith.constant 0 : i32
    return %arg0, %c0_i32 : i32, i32
  }
}

</mosaic_0001>

<bundles_post_ra>
// kernel: basic_block_forward.5
= control target key start
LH: loop header
LB: loop body
LE: loop exit
PB: predicated region body
PF: predicated region fallthrough
CT: control target
= control target key end

     0   :  { %vm55_vm0 = vcmask 523264   ;;  %s133_s0 = inlined_call_operand.vmem [shape: f32[32,64], index: 0, kind: input, shape index: {}]   ;;  %s134_s1 = inlined_call_operand.vmem [shape: f32[1,64], index: 1, kind: input, shape index: {}]   ;;  %s135_s2 = inlined_call_operand.vmem [shape: f32[1,64], index: 2, kind: input, shape index: {}]   ;;  %s136_s3 = inlined_call_operand.vmem [shape: f32[32,64], index: 3, kind: input, shape index: {}]   ;;  %s137_s4 = inlined_call_operand.vmem [shape: f32[32,64], index: 4, kind: output, shape index: {}]  }
   0x1   :  { %v17_v0 = vld [vmem:[%s133_s0] sm:$0xff]  ;;  %v18_v4 = vld [vmem:[%s133_s0 + $0x8] sm:$0xff]  ;;  %v19_v7 = vld [vmem:[%s133_s0 + $0x10] sm:$0xff] }
   0x2   :  { %v64_v1 = vld [vmem:[%s134_s1] ss:$0 sm:$0xff]  ;;  %v20_v8 = vld [vmem:[%s133_s0 + $0x18] sm:$0xff]  ;;  %v44_v10 = vld [vmem:[%s136_s3 + $0x8] sm:$0xff] }
   0x3   :  { %v65_v2 = vld [vmem:[%s135_s2] ss:$0 sm:$0xff]  ;;  %v28_v3 = vmul.f32 %v64_v1, %v17_v0  ;;  %v29_v6 = vmul.f32 %v64_v1, %v18_v4  ;;  %v30_v11 = vmul.f32 %v64_v1, %v19_v7  ;;  %v31_v12 = vmul.f32 %v64_v1, %v20_v8  ;;  %v45_v14 = vld [vmem:[%s136_s3 + $0x10] sm:$0xff]  ;;  %v46_v15 = vld [vmem:[%s136_s3 + $0x18] sm:$0xff] }
   0x4   :  { %v43_v5 = vld [vmem:[%s136_s3] sm:$0xff] }
   0x5   :  { %v39_v9 = vadd.f32 %v65_v2, %v28_v3  ;;  %v40_v13 = vadd.f32 %v65_v2, %v29_v6  ;;  %v41_v17 = vadd.f32 %v65_v2, %v30_v11  ;;  %v42_v18 = vadd.f32 %v65_v2, %v31_v12 }
   0x7   :  { %v47_v16 = vadd.f32 %v43_v5, %v39_v9  ;;  %v48_v19 = vadd.f32 %v44_v10, %v40_v13  ;;  %v49_v21 = vadd.f32 %v45_v14, %v41_v17  ;;  %v50_v22 = vadd.f32 %v46_v15, %v42_v18 }
   0x9   :  { %v51_v20 = vmax.f32 %v47_v16, 0.0  ;;  %v52_v23 = vmax.f32 %v48_v19, 0.0  ;;  %v53_v24 = vmax.f32 %v49_v21, 0.0  ;;  %v54_v25 = vmax.f32 %v50_v22, 0.0 }
   0xb   :  { %56 = vst.msk [vmem:[%s137_s4] sm:$0xff] %vm55_vm0, %v51_v20  ;;  %57 = vst.msk [vmem:[%s137_s4 + $0x8] sm:$0xff] %vm55_vm0, %v52_v23 }
   0xc   :  { %58 = vst.msk [vmem:[%s137_s4 + $0x10] sm:$0xff] %vm55_vm0, %v53_v24  ;;  %59 = vst.msk [vmem:[%s137_s4 + $0x18] sm:$0xff] %vm55_vm0, %v54_v25 }

// kernel: basic_block_forward.3
= control target key start
LH: loop header
LB: loop body
LE: loop exit
PB: predicated region body
PF: predicated region fallthrough
CT: control target
= control target key end

     0   :  { %s2042_s18 = smov 0   ;;  %s2044_s19 = smov 0   ;;  %s2782_s0 = inlined_call_operand.vmem [shape: f32[2,16,16,4], index: 0, kind: input, shape index: {}, may-alias: {0,1,2}]   ;;  %s2783_s1 = inlined_call_operand.vmem [shape: f32[2,16,16,4], index: 1, kind: input, shape index: {}, may-alias: {0,1,2}]   ;;  %s2784_s2 = inlined_call_operand.vmem [shape: f32[2,16,16,4], index: 2, kind: input, shape index: {}, may-alias: {0,1,2}]   ;;  %s2785_s3 = inlined_call_operand.vmem [shape: f32[36,4], index: 3, kind: input, shape index: {}]   ;;  %s2786_s4 = inlined_call_operand.vmem [shape: f32[2,16,16,4], index: 4, kind: output, shape index: {0}]   ;;  %s2787_s5 = inlined_call_operand.vmem [shape: f32[2,1,2,4], index: 5, kind: output, shape index: {1}]  }
   0x1   :  { %s2046_s20 = smov 0   ;;  %s2048_s21 = smov 0  }
   0x2   :  { %s2050_s22 = smov 0  }
   0x3 LB: > { %s28_s23 = sadd.s32 1, %s1994_s20  ;;  %s35_s24 = sadd.s32 1, %s1998_s21  ;;  %s2002_s22 = sphi %s2050_s22, %s16_s22   ;;  %s1998_s21 = sphi %s2048_s21, %s2792_s21   ;;  %s1994_s20 = sphi %s2046_s20, %s2791_s20   ;;  %s1990_s19 = sphi %s2044_s19, %s2790_s19   ;;  %s1986_s18 = sphi %s2042_s18, %s2789_s18  }
   0x4   : > { %p29_p0 = scmp.ge.s32.totalorder %s28_s23, 2  ;;  %p1778_p1 = scmp.ge.s32.totalorder %s2002_s22, 1 }
   0x5   : > { %p313_p2 = scmp.lt.s32.totalorder %s2002_s22, 5 }
   0x6   : > { %s2794_s23 = smov (%p29_p0, %s28_s23), 0  ;;  %s2796_s24 = smov (!%p29_p0, %s35_s24), %s1998_s21 }
   0x7   : > { %p314_p3 = pnand %p1778_p1, %p313_p2  ;;  %p37_p4 = scmp.ge.s32.totalorder %s2796_s24, 2 }
   0x8   : > { %s2075_s25 = sshll.u32 (!%p314_p3), %s1986_s18, 3  ;;  %p395_p5 = scmp.lt.s32.totalorder (!%p314_p3), %s1990_s19, 1  ;;  %vm525_vm0 = vcmask (!%p314_p3), 1040384   ;;  %vm620_vm1 = vcmask (!%p314_p3), 1046528   ;;  %vm661_vm2 = vcmask (!%p314_p3), 1045504   ;;  %v1246_v40 = vld [vmem:[%s2785_s3] sm:$0xff] (!%p314_p3) }
   0x9   : > { %s2798_s24 = smov (%p37_p4, %s2796_s24), 0  ;;  %317 = sbr.rel (%p314_p3) target bundleno = 649 (0x289), region = 36 }
   0xa   : > { %p397_p6 = scmp.lt.s32.totalorder (!%p314_p3), %s2075_s25, 15  ;;  %s1784_s13 = sadd.s32 (!%p314_p3), 4294967295, %s2075_s25  ;;  %v1247_v41 = vld [vmem:[%s2785_s3 + $0x8] sm:$0xff] (!%p314_p3)  ;;  %v1248_v45 = vld [vmem:[%s2785_s3 + $0x10] sm:$0xff] (!%p314_p3)  ;;  %v1249_v46 = vld [vmem:[%s2785_s3 + $0x18] sm:$0xff] (!%p314_p3)  ;;  %vm1300_vm3 = vcmask (!%p314_p3), 1043456  }
   0xb   : > { %p411_p7 = scmp.gt.s32.totalorder (!%p314_p3), %s1784_s13, 0  ;;  %p1785_p8 = scmp.lt.s32.totalorder (!%p314_p3), %s1784_s13, 15  ;;  %v1890_v42 = vpack.c.bf16 (!%p314_p3), %v1247_v41, %v1246_v40  ;;  %v1894_v48 = vpack.c.bf16 (!%p314_p3), %v1249_v46, %v1248_v45  ;;  %v1250_v50 = vld [vmem:[%s2785_s3 + $0x20] sm:$0xf] (!%p314_p3)  ;;  %vm1110_vm4 = vcmask (!%p314_p3), 31744   ;;  %vm1127_vm5 = vcmask (!%p314_p3), 64512  }
   0xc   : > { %p489_p9 = scmp.gt.s32.totalorder (!%p314_p3), %s1986_s18, 0  ;;  %s2004_s15 = smov (!%p314_p3), 12   ;;  %vm1144_vm6 = vcmask (!%p314_p3), 97280   ;;  %vm1161_vm7 = vcmask (!%p314_p3), 130048   ;;  %vm1178_vm8 = vcmask (!%p314_p3), 162816   ;;  %vm1195_vm9 = vcmask (!%p314_p3), 195584  }
   0xd   : > { %s2005_s17 = smov (!%p314_p3), 4   ;;  %s2007_s11 = smov (!%p314_p3), 20   ;;  %1891 = vmatprep.subr.bf16.mxu0 (!%p314_p3), %v1890_v42  ;;  %1898 = vmatprep.subr.bf16.mxu1 (!%p314_p3), %v1890_v42  ;;  %vm1212_vm10 = vcmask (!%p314_p3), 228352   ;;  %vm1229_vm11 = vcmask (!%p314_p3), 261120   ;;  %vm1251_vm12 = vcmask (!%p314_p3), 293888  }
   0xe   : > { %1893 = vmatpush3.bf16.msra.mxu0 (!%p314_p3), %v1890_v42  ;;  %1901 = vmatpush3.bf16.msra.mxu1 (!%p314_p3), %v1890_v42  ;;  %s2011_s30 = smov (!%p314_p3), 32   ;;  %p497_p10 = scmp.lt.s32.totalorder (!%p314_p3), %s1986_s18, 1 }
   0xf   : > { %1895 = vmatprep.subr.bf16.mxu0 (!%p314_p3), %v1894_v48  ;;  %1899 = vmatprep.subr.bf16.mxu1 (!%p314_p3), %v1894_v48  ;;  %p1822_p12 = scmp.ne.s32.totalorder (!%p314_p3), %s1986_s18, 0 }
  0x10   : > { %s2800_s19 = smov (!%p395_p5, %s1990_s19), 1  ;;  %vm1560_vm13 = vcmask (!%p1822_p12), 25600  }
  0x11   : > { %s398_s26 = scalar_select %p397_p6, %s2075_s25, 15 }
  0x12   : > { %s2079_s27 = sshll.u32 %s2800_s19, 5  ;;  %s1804_s28 = sshll.u32 %s2800_s19, 1  ;;  %1897 = vmatpush3.bf16.msra.mxu0 %v1894_v48  ;;  %1902 = vmatpush3.bf16.msra.mxu1 %v1894_v48 }
  0x13   : > { %s1780_s29 = sshll.u32 %s398_s26, 1  ;;  %s2084_s7 = scalar_lea.vmem %s2787_s5, %s1804_s28  ;;  %1864 = vmatprep.subr.msk.mxu0 %vm1300_vm3, %v1250_v50  ;;  %1900 = vmatprep.subr.msk.mxu1 %vm1300_vm3, %v1250_v50 }
  0x14   : > { %s2087_s8 = sadd.s32 %s2079_s27, %s1780_s29  ;;  %s2006_s19 = smov 16  }
  0x15   : > { %s1782_s9 = sshll.u32 %s2087_s8, 3  ;;  %s2009_s29 = smov 24  }
  0x16   : > { %s2095_s12 = scalar_lea.vmem %s2782_s0, %s1782_s9  ;;  %1865 = vmatpush3.msk.msra.mxu0 %vm1300_vm3, %v1250_v50  ;;  %1903 = vmatpush3.msk.msra.mxu1 %vm1300_vm3, %v1250_v50 }
  0x17   : > { %v473_v0 = vld [vmem:[%s2095_s12] sm:$0xff]  ;;  %v474_v1 = vld [vmem:[%s2095_s12 + $0x8] sm:$0xff]  ;;  %s412_s14 = scalar_select %p411_p7, %s1784_s13, 0  ;;  %v475_v28 = vld [vmem:[%s2095_s12 + $0x10] sm:$0xff] }
  0x18   : > { %v529_v2 = vrot.slane %v473_v0, 7  ;;  %v530_v3 = vrot.slane %v474_v1, 7  ;;  %s1953_s10 = scalar_select %p489_p9, 255, 0  ;;  %v476_v31 = vld [vmem:[%s2095_s12 + $0x18] sm:$0xff]  ;;  %v532_v34 = vrot.slane %v475_v28, 7 }
  0x19   : > { %s2802_s14 = smov (!%p1785_p8, %s412_s14), 15  ;;  %s2008_s13 = smov 8   ;;  %v533_v36 = vrot.slane %v476_v31, 7  ;;  %v477_v58 = vld [vmem:[%s2095_s12 + $0x20] sm:$0xff]  ;;  %v478_v59 = vld [vmem:[%s2095_s12 + $0x28] sm:$0xff] }
  0x1a   : > { %v2102_v4 = vsel %vm525_vm0, 0.0, %v529_v2  ;;  %v2105_v5 = vsel %vm525_vm0, %v529_v2, %v530_v3  ;;  %v595_v6 = vsel %vm525_vm0, %v530_v3, 0.0  ;;  %s1790_s16 = sshll.u32 %s2802_s14, 1  ;;  %v2154_v37 = vsel %vm525_vm0, 0.0, %v532_v34 }
  0x1b   : > { %822 = vrot.lane.b32.xlu0 %v2102_v4, %s2004_s15  ;;  %824 = vrot.lane.b32.xlu1 %v2105_v5, %s2004_s15  ;;  %v626_v7 = vrot.slane %v2102_v4, 1  ;;  %v627_v8 = vrot.slane %v2105_v5, 1  ;;  %v667_v9 = vrot.slane %v2102_v4, 2  ;;  %v668_v10 = vrot.slane %v2105_v5, 2  ;;  %s419_s26 = sadd.s32 %s1790_s16, %s2079_s27  ;;  %s2010_s16 = smov 28  }
  0x1c   : > { %v629_v11 = vrot.slane %v595_v6, 1  ;;  %s1792_s28 = sshll.u32 %s419_s26, 3  ;;  %v670_v35 = vrot.slane %v595_v6, 2  ;;  %v2158_v39 = vsel %vm525_vm0, %v532_v34, %v533_v36  ;;  %v631_v43 = vrot.slane %v2154_v37, 1 }
  0x1d   : > { %v628_v12 = vsel %vm620_vm1, %v626_v7, %v627_v8  ;;  %v669_v13 = vsel %vm661_vm2, %v667_v9, %v668_v10  ;;  %s421_s6 = scalar_lea.vmem %s2783_s1, %s1792_s28  ;;  %v632_v44 = vrot.slane %v2158_v39, 1  ;;  %v596_v49 = vsel %vm525_vm0, %v533_v36, 0.0 }
  0x1e   : > { %v630_v14 = vsel %vm620_vm1, %v627_v8, %v629_v11  ;;  %v1954_v15 = vld [vmem:[%s421_s6] sm:%s1953_s10]  ;;  %v1957_v16 = vld [vmem:[%s421_s6 + $0x8] sm:%s1953_s10]  ;;  %v671_v38 = vsel %vm661_vm2, %v668_v10, %v670_v35  ;;  %v672_v51 = vrot.slane %v2154_v37, 2  ;;  %v673_v52 = vrot.slane %v2158_v39, 2  ;;  %s1834_s6 = sadd.s32 8, %s2075_s25 }
  0x1f   : > { %730 = vrot.lane.b32.xlu1 %v628_v12, %s2005_s17  ;;  %870 = vrot.lane.b32.xlu0 %v628_v12, %s2006_s19  ;;  %v526_v17 = vrot.slane %v1954_v15, 7  ;;  %v527_v18 = vrot.slane %v1957_v16, 7  ;;  %v633_v47 = vsel %vm620_vm1, %v631_v43, %v632_v44  ;;  %v634_v53 = vrot.slane %v596_v49, 1  ;;  %p2485_p11 = scmp.lt.s32.totalorder %s1834_s6, 15 }
  0x20   : > { %v674_v54 = vsel %vm661_vm2, %v672_v51, %v673_v52  ;;  %v675_v56 = vrot.slane %v596_v49, 2  ;;  %v535_v60 = vrot.slane %v477_v58, 7  ;;  %v536_v61 = vrot.slane %v478_v59, 7 }
  0x21   : > { %v2133_v19 = vsel %vm525_vm0, 0.0, %v526_v17  ;;  %v2136_v20 = vsel %vm525_vm0, %v526_v17, %v527_v18  ;;  %v594_v23 = vsel %vm525_vm0, %v527_v18, 0.0  ;;  %v635_v55 = vsel %vm620_vm1, %v632_v44, %v634_v53  ;;  %s2804_s6 = smov (!%p2485_p11, %s1834_s6), 15 }
  0x22   : > { %v662_v21 = vrot.slane %v2133_v19, 2  ;;  %v621_v22 = vrot.slane %v2133_v19, 1  ;;  %v663_v24 = vrot.slane %v2136_v20, 2  ;;  %v622_v25 = vrot.slane %v2136_v20, 1  ;;  %s2806_s6 = smov (!%p2485_p11, %s2804_s6), 15 }
  0x23   : > { %918 = vrot.lane.b32.xlu1 %v669_v13, %s2007_s11  ;;  %872 = vrot.lane.b32.xlu0 %v630_v14, %s2006_s19  ;;  %v665_v26 = vrot.slane %v594_v23, 2  ;;  %v624_v27 = vrot.slane %v594_v23, 1  ;;  %v676_v57 = vsel %vm661_vm2, %v673_v52, %v675_v56  ;;  %v2207_v62 = vsel %vm525_vm0, 0.0, %v535_v60  ;;  %s1797_s25 = sshll.u32 %s2806_s6, 1 }
  0x24   : > { %v664_v29 = vsel %vm661_vm2, %v662_v21, %v663_v24  ;;  %v623_v30 = vsel %vm620_vm1, %v621_v22, %v622_v25  ;;  %v2210_v63 = vsel %vm525_vm0, %v535_v60, %v536_v61  ;;  %v636_v0 = vrot.slane %v2207_v62, 1 }
  0x25   : > { %v666_v32 = vsel %vm661_vm2, %v663_v24, %v665_v26  ;;  %v625_v33 = vsel %vm620_vm1, %v622_v25, %v624_v27  ;;  %v637_v1 = vrot.slane %v2210_v63, 1  ;;  %v597_v3 = vsel %vm525_vm0, %v536_v61, 0.0 }
  0x26   : > { %v677_v6 = vrot.slane %v2207_v62, 2  ;;  %v678_v7 = vrot.slane %v2210_v63, 2  ;;  %v639_v8 = vrot.slane %v597_v3, 1  ;;  %v680_v11 = vrot.slane %v597_v3, 2 }
  0x27   : > { %778 = vrot.lane.b32.xlu1 %v669_v13, %s2008_s13  ;;  %732 = vrot.lane.b32.xlu0 %v630_v14, %s2005_s17  ;;  %v638_v2 = vsel %vm620_vm1, %v636_v0, %v637_v1  ;;  %v479_v13 = vld [vmem:[%s2095_s12 + $0x30] sm:$0xff]  ;;  %v480_v14 = vld [vmem:[%s2095_s12 + $0x38] sm:$0xff] }
  0x28   : > { %v679_v9 = vsel %vm661_vm2, %v677_v6, %v678_v7  ;;  %v640_v10 = vsel %vm620_vm1, %v637_v1, %v639_v8  ;;  %v681_v12 = vsel %vm661_vm2, %v678_v7, %v680_v11  ;;  %v538_v15 = vrot.slane %v479_v13, 7  ;;  %v483_v8 = vld [vmem:[%s2095_s12 + $0x50] sm:$0xff] }
  0x29   : > { %v539_v16 = vrot.slane %v480_v14, 7 }
  0x2a   : > { %v2244_v17 = vsel %vm525_vm0, 0.0, %v538_v15 }
  0x2b   : > { %774 = vrot.lane.b32.xlu1 %v664_v29, %s2008_s13  ;;  %726 = vrot.lane.b32.xlu0 %v623_v30, %s2005_s17  ;;  %v2247_v18 = vsel %vm525_vm0, %v538_v15, %v539_v16  ;;  %v641_v21 = vrot.slane %v2244_v17, 1  ;;  %v598_v24 = vsel %vm525_vm0, %v539_v16, 0.0  ;;  %v682_v25 = vrot.slane %v2244_v17, 2 }
  0x2c   : > { %v642_v22 = vrot.slane %v2247_v18, 1  ;;  %v683_v26 = vrot.slane %v2247_v18, 2  ;;  %v644_v27 = vrot.slane %v598_v24, 1  ;;  %v685_v30 = vrot.slane %v598_v24, 2 }
  0x2e   : > { %v643_v23 = vsel %vm620_vm1, %v641_v21, %v642_v22  ;;  %v684_v28 = vsel %vm661_vm2, %v682_v25, %v683_v26  ;;  %v645_v29 = vsel %vm620_vm1, %v642_v22, %v644_v27  ;;  %v686_v31 = vsel %vm661_vm2, %v683_v26, %v685_v30 }
  0x2f   : > { %776 = vrot.lane.b32.xlu1 %v666_v32, %s2008_s13  ;;  %728 = vrot.lane.b32.xlu0 %v625_v33, %s2005_s17  ;;  %v481_v32 = vld [vmem:[%s2095_s12 + $0x40] sm:$0xff]  ;;  %v482_v33 = vld [vmem:[%s2095_s12 + $0x48] sm:$0xff] }
  0x30   : > { %v541_v36 = vrot.slane %v481_v32, 7 }
  0x32   : > { %v2286_v42 = vsel %vm525_vm0, 0.0, %v541_v36 }
  0x33   : > { %966 = vrot.lane.b32.xlu1 %v2154_v37, %s2009_s29  ;;  %920 = vrot.lane.b32.xlu0 %v671_v38, %s2007_s11  ;;  %v646_v46 = vrot.slane %v2286_v42, 1  ;;  %v687_v52 = vrot.slane %v2286_v42, 2 }
  0x37   : > { %826 = vrot.lane.b32.xlu1 %v2154_v37, %s2004_s15  ;;  %780 = vrot.lane.b32.xlu0 %v671_v38, %s2008_s13  ;;  %v542_v38 = vrot.slane %v482_v33, 7 }
  0x39   : > { %v2289_v43 = vsel %vm525_vm0, %v541_v36, %v542_v38  ;;  %v599_v51 = vsel %vm525_vm0, %v542_v38, 0.0 }
  0x3a   : > { %v688_v53 = vrot.slane %v2289_v43, 2  ;;  %v690_v61 = vrot.slane %v599_v51, 2 }
  0x3b   : > { %1014 = vrot.lane.b32.xlu1 %v633_v47, %s2010_s16  ;;  %968 = vrot.lane.b32.xlu0 %v2158_v39, %s2009_s29 }
  0x3c   : > { %v691_v3 = vsel %vm661_vm2, %v688_v53, %v690_v61 }
  0x3f   : > { %874 = vrot.lane.b32.xlu1 %v633_v47, %s2006_s19  ;;  %828 = vrot.lane.b32.xlu0 %v2158_v39, %s2004_s15 }
  0x43   : > { %1062 = vrot.lane.b32.xlu1 %v674_v54, %s2011_s30  ;;  %1016 = vrot.lane.b32.xlu0 %v635_v55, %s2010_s16 }
  0x47   : > { %876 = vrot.lane.b32.xlu1 %v635_v55, %s2006_s19  ;;  %734 = vrot.lane.b32.xlu0 %v633_v47, %s2005_s17  ;;  %v647_v47 = vrot.slane %v2289_v43, 1 }
  0x49   : > { %v648_v50 = vsel %vm620_vm1, %v646_v46, %v647_v47 }
  0x4b   : > { %1064 = vrot.lane.b32.xlu1 %v676_v57, %s2011_s30  ;;  %922 = vrot.lane.b32.xlu0 %v674_v54, %s2007_s11 }
  0x4f   : > { %782 = vrot.lane.b32.xlu1 %v674_v54, %s2008_s13  ;;  %736 = vrot.lane.b32.xlu0 %v635_v55, %s2005_s17  ;;  %v649_v54 = vrot.slane %v599_v51, 1 }
  0x51   : > { %v650_v58 = vsel %vm620_vm1, %v647_v47, %v649_v54 }
  0x53   : > { %970 = vrot.lane.b32.xlu1 %v2207_v62, %s2009_s29  ;;  %924 = vrot.lane.b32.xlu0 %v676_v57, %s2007_s11 }
  0x57   : > { %830 = vrot.lane.b32.xlu1 %v2207_v62, %s2004_s15  ;;  %784 = vrot.lane.b32.xlu0 %v676_v57, %s2008_s13  ;;  %v689_v57 = vsel %vm661_vm2, %v687_v52, %v688_v53 }
  0x5b   : > { %1018 = vrot.lane.b32.xlu1 %v638_v2, %s2010_s16  ;;  %972 = vrot.lane.b32.xlu0 %v2210_v63, %s2009_s29 }
  0x5f   : > { %878 = vrot.lane.b32.xlu1 %v638_v2, %s2006_s19  ;;  %832 = vrot.lane.b32.xlu0 %v2210_v63, %s2004_s15 }
  0x63   : > { %1066 = vrot.lane.b32.xlu1 %v679_v9, %s2011_s30  ;;  %1020 = vrot.lane.b32.xlu0 %v640_v10, %s2010_s16 }
  0x67   : > { %880 = vrot.lane.b32.xlu1 %v640_v10, %s2006_s19  ;;  %738 = vrot.lane.b32.xlu0 %v638_v2, %s2005_s17 }
  0x6b   : > { %1068 = vrot.lane.b32.xlu1 %v681_v12, %s2011_s30  ;;  %926 = vrot.lane.b32.xlu0 %v679_v9, %s2007_s11 }
  0x6f   : > { %786 = vrot.lane.b32.xlu1 %v679_v9, %s2008_s13  ;;  %740 = vrot.lane.b32.xlu0 %v640_v10, %s2005_s17  ;;  %v484_v10 = vld [vmem:[%s2095_s12 + $0x58] sm:$0xff] }
  0x70   : > { %v545_v14 = vrot.slane %v484_v10, 7 }
  0x73   : > { %974 = vrot.lane.b32.xlu1 %v2244_v17, %s2009_s29  ;;  %928 = vrot.lane.b32.xlu0 %v681_v12, %s2007_s11 }
  0x77   : > { %834 = vrot.lane.b32.xlu1 %v2244_v17, %s2004_s15  ;;  %788 = vrot.lane.b32.xlu0 %v681_v12, %s2008_s13 }
  0x7b   : > { %1022 = vrot.lane.b32.xlu1 %v643_v23, %s2010_s16  ;;  %976 = vrot.lane.b32.xlu0 %v2247_v18, %s2009_s29 }
  0x7f   : > { %882 = vrot.lane.b32.xlu1 %v643_v23, %s2006_s19  ;;  %836 = vrot.lane.b32.xlu0 %v2247_v18, %s2004_s15 }
  0x83   : > { %1070 = vrot.lane.b32.xlu1 %v684_v28, %s2011_s30  ;;  %1024 = vrot.lane.b32.xlu0 %v645_v29, %s2010_s16 }
  0x87   : > { %884 = vrot.lane.b32.xlu1 %v645_v29, %s2006_s19  ;;  %742 = vrot.lane.b32.xlu0 %v643_v23, %s2005_s17 }
  0x8b   : > { %1072 = vrot.lane.b32.xlu1 %v686_v31, %s2011_s30  ;;  %930 = vrot.lane.b32.xlu0 %v684_v28, %s2007_s11 }
  0x8d   : > { %v823_v34 = vpop.permute.xlu0 %822  ;;  %v2279_v35 = vpop.permute.xlu1 %824 }
  0x8f   : > { %790 = vrot.lane.b32.xlu1 %v684_v28, %s2008_s13  ;;  %744 = vrot.lane.b32.xlu0 %v645_v29, %s2005_s17 }
  0x91   : > { %v2283_v40 = vpop.permute.xlu1 %730  ;;  %v871_v41 = vpop.permute.xlu0 %870 }
  0x93   : > { %978 = vrot.lane.b32.xlu1 %v2286_v42, %s2009_s29  ;;  %932 = vrot.lane.b32.xlu0 %v686_v31, %s2007_s11 }
  0x95   : > { %v919_v44 = vpop.permute.xlu1 %918  ;;  %v2294_v45 = vpop.permute.xlu0 %872 }
  0x97   : > { %838 = vrot.lane.b32.xlu1 %v2286_v42, %s2004_s15  ;;  %792 = vrot.lane.b32.xlu0 %v686_v31, %s2008_s13 }
  0x99   : > { %v2301_v48 = vpop.permute.xlu1 %778  ;;  %v2303_v49 = vpop.permute.xlu0 %732 }
  0x9b   : > { %1026 = vrot.lane.b32.xlu1 %v648_v50, %s2010_s16  ;;  %980 = vrot.lane.b32.xlu0 %v2289_v43, %s2009_s29 }
  0x9d   : > { %v775_v55 = vpop.permute.xlu1 %774  ;;  %v727_v56 = vpop.permute.xlu0 %726 }
  0x9e   : > { %v1111_v2 = vsel %vm1110_vm4, %v2133_v19, %v727_v56  ;;  %v544_v19 = vrot.slane %v483_v8, 7  ;;  %v486_v8 = vld [vmem:[%s2095_s12 + $0x68] sm:$0xff] }
  0x9f   : > { %886 = vrot.lane.b32.xlu1 %v648_v50, %s2006_s19  ;;  %840 = vrot.lane.b32.xlu0 %v2289_v43, %s2004_s15  ;;  %v1128_v9 = vsel %vm1127_vm5, %v1111_v2, %v775_v55 }
  0xa0   : > { %v1145_v11 = vsel %vm1144_vm6, %v1128_v9, %v823_v34  ;;  %v2340_v21 = vsel %vm525_vm0, 0.0, %v544_v19  ;;  %v2347_v24 = vsel %vm525_vm0, %v544_v19, %v545_v14 }
  0xa1   : > { %v777_v59 = vpop.permute.xlu1 %776  ;;  %v729_v60 = vpop.permute.xlu0 %728  ;;  %v1162_v16 = vsel %vm1161_vm7, %v1145_v11, %v871_v41  ;;  %v651_v27 = vrot.slane %v2340_v21, 1  ;;  %v652_v28 = vrot.slane %v2347_v24, 1  ;;  %v600_v41 = vsel %vm525_vm0, %v545_v14, 0.0 }
  0xa2   : > { %v1112_v15 = vsel %vm1110_vm4, %v2136_v20, %v729_v60  ;;  %v1179_v25 = vsel %vm1178_vm8, %v1162_v16, %v919_v44  ;;  %v693_v47 = vrot.slane %v2347_v24, 2  ;;  %v548_v11 = vrot.slane %v486_v8, 7  ;;  %v488_v8 = vld [vmem:[%s2095_s12 + $0x78] sm:$0xff] }
  0xa3   : > { %1074 = vrot.lane.b32.xlu1 %v689_v57, %s2011_s30  ;;  %1028 = vrot.lane.b32.xlu0 %v650_v58, %s2010_s16  ;;  %v1129_v20 = vsel %vm1127_vm5, %v1112_v15, %v777_v59  ;;  %v653_v36 = vsel %vm620_vm1, %v651_v27, %v652_v28  ;;  %v695_v59 = vrot.slane %v600_v41, 2 }
  0xa4   : > { %v1146_v29 = vsel %vm1144_vm6, %v1129_v20, %v2279_v35 }
  0xa5   : > { %v967_v0 = vpop.permute.xlu1 %966  ;;  %v921_v1 = vpop.permute.xlu0 %920  ;;  %v1163_v34 = vsel %vm1161_vm7, %v1146_v29, %v2294_v45  ;;  %v692_v45 = vrot.slane %v2340_v21, 2 }
  0xa6   : > { %v1196_v26 = vsel %vm1195_vm9, %v1179_v25, %v967_v0  ;;  %v1180_v44 = vsel %vm1178_vm8, %v1163_v34, %v921_v1  ;;  %v696_v0 = vsel %vm661_vm2, %v693_v47, %v695_v59 }
  0xa7   : > { %888 = vrot.lane.b32.xlu1 %v650_v58, %s2006_s19  ;;  %746 = vrot.lane.b32.xlu0 %v648_v50, %s2005_s17  ;;  %v654_v50 = vrot.slane %v600_v41, 1  ;;  %v694_v55 = vsel %vm661_vm2, %v692_v45, %v693_v47 }
  0xa9   : > { %v2324_v6 = vpop.permute.xlu1 %826  ;;  %v2326_v7 = vpop.permute.xlu0 %780  ;;  %v655_v56 = vsel %vm620_vm1, %v652_v28, %v654_v50 }
  0xab   : > { %1076 = vrot.lane.b32.xlu1 %v691_v3, %s2011_s30  ;;  %934 = vrot.lane.b32.xlu0 %v689_v57, %s2007_s11 }
  0xad   : > { %v1015_v12 = vpop.permute.xlu1 %1014  ;;  %v969_v13 = vpop.permute.xlu0 %968 }
  0xae   : > { %v1213_v30 = vsel %vm1212_vm10, %v1196_v26, %v1015_v12  ;;  %v1197_v46 = vsel %vm1195_vm9, %v1180_v44, %v969_v13  ;;  %v1113_v12 = vsel %vm1110_vm4, %v2102_v4, %v2283_v40 }
  0xaf   : > { %794 = vrot.lane.b32.xlu1 %v689_v57, %s2008_s13  ;;  %748 = vrot.lane.b32.xlu0 %v650_v58, %s2005_s17  ;;  %v1130_v13 = vsel %vm1127_vm5, %v1113_v12, %v2301_v48 }
  0xb0   : > { %v1147_v15 = vsel %vm1144_vm6, %v1130_v13, %v2324_v6 }
  0xb1   : > { %v2342_v22 = vpop.permute.xlu1 %874  ;;  %v2344_v23 = vpop.permute.xlu0 %828 }
  0xb2   : > { %v1164_v4 = vsel %vm1161_vm7, %v1147_v15, %v2342_v22  ;;  %v1114_v22 = vsel %vm1110_vm4, %v2105_v5, %v2303_v49  ;;  %v601_v5 = vsel %vm525_vm0, %v548_v11, 0.0 }
  0xb3   : > { %982 = vrot.lane.b32.xlu1 %v2340_v21, %s2009_s29  ;;  %936 = vrot.lane.b32.xlu0 %v691_v3, %s2007_s11 }
  0xb5   : > { %v1063_v31 = vpop.permute.xlu1 %1062  ;;  %v1017_v32 = vpop.permute.xlu0 %1016 }
  0xb6   : > { %v1230_v33 = vsel %vm1229_vm11, %v1213_v30, %v1063_v31  ;;  %v1214_v51 = vsel %vm1212_vm10, %v1197_v46, %v1017_v32  ;;  %v1131_v31 = vsel %vm1127_vm5, %v1114_v22, %v2326_v7  ;;  %v659_v46 = vrot.slane %v601_v5, 1 }
  0xb7   : > { %842 = vrot.lane.b32.xlu1 %v2340_v21, %s2004_s15  ;;  %796 = vrot.lane.b32.xlu0 %v691_v3, %s2008_s13  ;;  %v485_v3 = vld [vmem:[%s2095_s12 + $0x60] sm:$0xff] }
  0xb8   : > { %1866 = vmatprep.mubr.msk.f32.mxu0 %vm1251_vm12, %v1230_v33  ;;  %v547_v9 = vrot.slane %v485_v3, 7  ;;  %v1148_v33 = vsel %vm1144_vm6, %v1131_v31, %v2344_v23  ;;  %v487_v3 = vld [vmem:[%s2095_s12 + $0x70] sm:$0xff]  ;;  %s440_s12 = sadd.s32 %s1797_s25, %s2079_s27 }
  0xb9   : > { %v2368_v35 = vpop.permute.xlu1 %876  ;;  %v2370_v38 = vpop.permute.xlu0 %734  ;;  %s1959_s27 = scalar_select %p497_p10, 255, 0 }
  0xba   : > { %v2413_v14 = vsel %vm525_vm0, 0.0, %v547_v9  ;;  %v2422_v25 = vsel %vm525_vm0, %v547_v9, %v548_v11  ;;  %v1165_v49 = vsel %vm1161_vm7, %v1148_v33, %v2368_v35  ;;  %v550_v9 = vrot.slane %v487_v3, 7 }
  0xbb   : > { %1030 = vrot.lane.b32.xlu1 %v653_v36, %s2010_s16  ;;  %984 = vrot.lane.b32.xlu0 %v2347_v24, %s2009_s29  ;;  %v656_v6 = vrot.slane %v2413_v14, 1  ;;  %v657_v26 = vrot.slane %v2422_v25, 1  ;;  %v697_v23 = vrot.slane %v2413_v14, 2  ;;  %v698_v44 = vrot.slane %v2422_v25, 2 }
  0xbc   : > { %v551_v11 = vrot.slane %v488_v8, 7  ;;  %v1115_v12 = vsel %vm1110_vm4, %v2154_v37, %v2370_v38  ;;  %v592_v15 = vsel %vm525_vm0, 0.0, %v550_v9 }
  0xbd   : > { %v1065_v52 = vpop.permute.xlu1 %1064  ;;  %v923_v53 = vpop.permute.xlu0 %922  ;;  %v658_v32 = vsel %vm620_vm1, %v656_v6, %v657_v26 }
  0xbe   : > { %v1231_v54 = vsel %vm1229_vm11, %v1214_v51, %v1065_v52  ;;  %v1181_v40 = vsel %vm1178_vm8, %v1164_v4, %v923_v53  ;;  %v699_v51 = vsel %vm661_vm2, %v697_v23, %v698_v44  ;;  %v660_v52 = vsel %vm620_vm1, %v657_v26, %v659_v46 }
  0xbf   : > { %890 = vrot.lane.b32.xlu1 %v653_v36, %s2006_s19  ;;  %844 = vrot.lane.b32.xlu0 %v2347_v24, %s2004_s15  ;;  %v552_v6 = vsel %vm525_vm0, %v550_v9, %v551_v11 }
  0xc0   : > { %1867 = vmatmul.mubr.msk.f32.vlgmr.msra.gmra.mrb[0].mxu0 %vm1251_vm12, %v1231_v54  ;;  %v705_v26 = vrot.slane %v552_v6, 1 }
  0xc1   : > { %v2388_v57 = vpop.permute.xlu1 %782  ;;  %v2390_v58 = vpop.permute.xlu0 %736 }
  0xc2   : > { %v1132_v13 = vsel %vm1127_vm5, %v1115_v12, %v2388_v57 }
  0xc3   : > { %1078 = vrot.lane.b32.xlu1 %v694_v55, %s2011_s30  ;;  %1032 = vrot.lane.b32.xlu0 %v655_v56, %s2010_s16 }
  0xc5   : > { %v971_v60 = vpop.permute.xlu1 %970  ;;  %v925_v61 = vpop.permute.xlu0 %924 }
  0xc6   : > { %v1198_v48 = vsel %vm1195_vm9, %v1181_v40, %v971_v60  ;;  %v1182_v41 = vsel %vm1178_vm8, %v1165_v49, %v925_v61 }
  0xc7   : > { %892 = vrot.lane.b32.xlu1 %v655_v56, %s2006_s19  ;;  %750 = vrot.lane.b32.xlu0 %v653_v36, %s2005_s17 }
  0xc9   : > { %v2397_v1 = vpop.permute.xlu1 %830  ;;  %v2399_v2 = vpop.permute.xlu0 %784 }
  0xca   : > { %v1149_v4 = vsel %vm1144_vm6, %v1132_v13, %v2397_v1  ;;  %v704_v1 = vrot.slane %v592_v15, 1 }
  0xcb   : > { %1080 = vrot.lane.b32.xlu1 %v696_v0, %s2011_s30  ;;  %938 = vrot.lane.b32.xlu0 %v694_v55, %s2007_s11 }
  0xcc   : > { %v706_v31 = vsel %vm620_vm1, %v704_v1, %v705_v26 }
  0xcd   : > { %v1019_v10 = vpop.permute.xlu1 %1018  ;;  %v973_v19 = vpop.permute.xlu0 %972 }
  0xce   : > { %v1215_v27 = vsel %vm1212_vm10, %v1198_v48, %v1019_v10  ;;  %v1199_v7 = vsel %vm1195_vm9, %v1182_v41, %v973_v19  ;;  %v710_v41 = vrot.slane %v552_v6, 2 }
  0xcf   : > { %798 = vrot.lane.b32.xlu1 %v694_v55, %s2008_s13  ;;  %752 = vrot.lane.b32.xlu0 %v655_v56, %s2005_s17  ;;  %v700_v55 = vrot.slane %v601_v5, 2 }
  0xd1   : > { %v2417_v16 = vpop.permute.xlu1 %878  ;;  %v2419_v20 = vpop.permute.xlu0 %832  ;;  %v701_v60 = vsel %vm661_vm2, %v698_v44, %v700_v55 }
  0xd2   : > { %v1166_v37 = vsel %vm1161_vm7, %v1149_v4, %v2417_v16  ;;  %v1116_v16 = vsel %vm1110_vm4, %v2158_v39, %v2390_v58  ;;  %v602_v39 = vsel %vm525_vm0, %v551_v11, 0.0 }
  0xd3   : > { %986 = vrot.lane.b32.xlu1 %v2413_v14, %s2009_s29  ;;  %940 = vrot.lane.b32.xlu0 %v696_v0, %s2007_s11  ;;  %v1133_v22 = vsel %vm1127_vm5, %v1116_v16, %v2399_v2  ;;  %v712_v55 = vrot.slane %v602_v39, 2 }
  0xd5   : > { %v1067_v28 = vpop.permute.xlu1 %1066  ;;  %v1021_v29 = vpop.permute.xlu0 %1020  ;;  %v713_v8 = vsel %vm661_vm2, %v710_v41, %v712_v55 }
  0xd6   : > { %v1232_v30 = vsel %vm1229_vm11, %v1215_v27, %v1067_v28  ;;  %v1216_v45 = vsel %vm1212_vm10, %v1199_v7, %v1021_v29  ;;  %v707_v7 = vrot.slane %v602_v39, 1 }
  0xd7   : > { %846 = vrot.lane.b32.xlu1 %v2413_v14, %s2004_s15  ;;  %800 = vrot.lane.b32.xlu0 %v696_v0, %s2008_s13 }
  0xd8   : > { %1869 = vmatprep.mubr.msk.f32.mxu0 %vm1251_vm12, %v1232_v30 }
  0xd9   : > { %v2447_v34 = vpop.permute.xlu1 %880  ;;  %v2449_v36 = vpop.permute.xlu0 %738 }
  0xdb   : > { %1034 = vrot.lane.b32.xlu1 %v658_v32, %s2010_s16  ;;  %988 = vrot.lane.b32.xlu0 %v2422_v25, %s2009_s29 }
  0xdd   : > { %v1069_v47 = vpop.permute.xlu1 %1068  ;;  %v927_v50 = vpop.permute.xlu0 %926 }
  0xde   : > { %v1233_v35 = vsel %vm1229_vm11, %v1216_v45, %v1069_v47  ;;  %v1183_v38 = vsel %vm1178_vm8, %v1166_v37, %v927_v50  ;;  %v708_v47 = vsel %vm620_vm1, %v705_v26, %v707_v7 }
  0xdf   : > { %894 = vrot.lane.b32.xlu1 %v658_v32, %s2006_s19  ;;  %848 = vrot.lane.b32.xlu0 %v2422_v25, %s2004_s15 }
  0xe0   : > { %1870 = vmatmul.mubr.msk.f32.gmra.mrb[2].mxu0 %vm1251_vm12, %v1233_v35 }
  0xe1   : > { %v2469_v53 = vpop.permute.xlu1 %786  ;;  %v2471_v54 = vpop.permute.xlu0 %740 }
  0xe3   : > { %1082 = vrot.lane.b32.xlu1 %v699_v51, %s2011_s30  ;;  %1036 = vrot.lane.b32.xlu0 %v660_v52, %s2010_s16 }
  0xe5   : > { %v975_v56 = vpop.permute.xlu1 %974  ;;  %v929_v59 = vpop.permute.xlu0 %928 }
  0xe6   : > { %v1200_v57 = vsel %vm1195_vm9, %v1183_v38, %v975_v56  ;;  %v1117_v38 = vsel %vm1110_vm4, %v2207_v62, %v2449_v36 }
  0xe7   : > { %896 = vrot.lane.b32.xlu1 %v660_v52, %s2006_s19  ;;  %754 = vrot.lane.b32.xlu0 %v658_v32, %s2005_s17  ;;  %v1150_v32 = vsel %vm1144_vm6, %v1133_v22, %v2419_v20  ;;  %v709_v20 = vrot.slane %v592_v15, 2  ;;  %v1134_v26 = vsel %vm1127_vm5, %v1117_v38, %v2469_v53 }
  0xe8   : > { %v1167_v58 = vsel %vm1161_vm7, %v1150_v32, %v2447_v34 }
  0xe9   : > { %v2479_v61 = vpop.permute.xlu1 %834  ;;  %v2481_v0 = vpop.permute.xlu0 %788  ;;  %v1184_v2 = vsel %vm1178_vm8, %v1167_v58, %v929_v59  ;;  %v711_v45 = vsel %vm661_vm2, %v709_v20, %v710_v41 }
  0xeb   : > { %1084 = vrot.lane.b32.xlu1 %v701_v60, %s2011_s30  ;;  %942 = vrot.lane.b32.xlu0 %v699_v51, %s2007_s11 }
  0xed   : > { %v1023_v10 = vpop.permute.xlu1 %1022  ;;  %v977_v19 = vpop.permute.xlu0 %976 }
  0xee   : > { %v1217_v27 = vsel %vm1212_vm10, %v1200_v57, %v1023_v10  ;;  %v1201_v49 = vsel %vm1195_vm9, %v1184_v2, %v977_v19 }
  0xef   : > { %802 = vrot.lane.b32.xlu1 %v699_v51, %s2008_s13  ;;  %756 = vrot.lane.b32.xlu0 %v660_v52, %s2005_s17  ;;  %s1799_s17 = sshll.u32 %s440_s12, 3 }
  0xf0   : > { %s442_s26 = scalar_lea.vmem %s2784_s2, %s1799_s17 }
  0xf1   : > { %v2503_v40 = vpop.permute.xlu1 %882  ;;  %v2505_v48 = vpop.permute.xlu0 %836  ;;  %v1960_v51 = vld [vmem:[%s442_s26] sm:%s1959_s27]  ;;  %v1963_v52 = vld [vmem:[%s442_s26 + $0x8] sm:%s1959_s27] }
  0xf2   : > { %v554_v3 = vrot.slane %v1963_v52, 7 }
  0xf3   : > { %990 = vrot.lane.b32.xlu1 %v592_v15, %s2009_s29  ;;  %944 = vrot.lane.b32.xlu0 %v701_v60, %s2007_s11 }
  0xf4   : > { %v603_v12 = vsel %vm525_vm0, %v554_v3, 0.0 }
  0xf5   : > { %v1071_v28 = vpop.permute.xlu1 %1070  ;;  %v1025_v29 = vpop.permute.xlu0 %1024  ;;  %v719_v4 = vrot.slane %v603_v12, 1 }
  0xf6   : > { %v1234_v30 = vsel %vm1229_vm11, %v1217_v27, %v1071_v28  ;;  %v1218_v23 = vsel %vm1212_vm10, %v1201_v49, %v1025_v29  ;;  %v724_v29 = vrot.slane %v603_v12, 2 }
  0xf7   : > { %850 = vrot.lane.b32.xlu1 %v592_v15, %s2004_s15  ;;  %804 = vrot.lane.b32.xlu0 %v701_v60, %s2008_s13  ;;  %v553_v60 = vrot.slane %v1960_v51, 7 }
  0xf8   : > { %1872 = vmatprep.mubr.msk.f32.mxu0 %vm1251_vm12, %v1234_v30  ;;  %v1151_v30 = vsel %vm1144_vm6, %v1134_v26, %v2479_v61 }
  0xf9   : > { %v2529_v33 = vpop.permute.xlu1 %884  ;;  %v2531_v5 = vpop.permute.xlu0 %742  ;;  %v555_v19 = vsel %vm525_vm0, %v553_v60, %v554_v3  ;;  %v593_v11 = vsel %vm525_vm0, 0.0, %v553_v60  ;;  %v1168_v62 = vsel %vm1161_vm7, %v1151_v30, %v2503_v40  ;;  %v1118_v40 = vsel %vm1110_vm4, %v2210_v63, %v2471_v54 }
  0xfa   : > { %v717_v13 = vrot.slane %v555_v19, 1  ;;  %v716_v15 = vrot.slane %v593_v11, 1  ;;  %v722_v57 = vrot.slane %v555_v19, 2  ;;  %v721_v1 = vrot.slane %v593_v11, 2 }
  0xfb   : > { %1038 = vrot.lane.b32.xlu1 %v706_v31, %s2010_s16  ;;  %992 = vrot.lane.b32.xlu0 %v552_v6, %s2009_s29  ;;  %v1135_v49 = vsel %vm1127_vm5, %v1118_v40, %v2481_v0 }
  0xfc   : > { %v720_v27 = vsel %vm620_vm1, %v717_v13, %v719_v4  ;;  %v718_v28 = vsel %vm620_vm1, %v716_v15, %v717_v13  ;;  %v723_v32 = vsel %vm661_vm2, %v721_v1, %v722_v57  ;;  %v1152_v20 = vsel %vm1144_vm6, %v1135_v49, %v2505_v48 }
  0xfd   : > { %v1073_v44 = vpop.permute.xlu1 %1072  ;;  %v931_v46 = vpop.permute.xlu0 %930 }
  0xfe   : > { %v1235_v34 = vsel %vm1229_vm11, %v1218_v23, %v1073_v44  ;;  %v1185_v36 = vsel %vm1178_vm8, %v1168_v62, %v931_v46  ;;  %v1169_v23 = vsel %vm1161_vm7, %v1152_v20, %v2529_v33 }
  0xff   : > { %898 = vrot.lane.b32.xlu1 %v706_v31, %s2006_s19  ;;  %852 = vrot.lane.b32.xlu0 %v552_v6, %s2004_s15  ;;  %v725_v31 = vsel %vm661_vm2, %v722_v57, %v724_v29 }
 0x100   : > { %1873 = vmatmul.mubr.msk.f32.gmra.mrb[4].mxu0 %vm1251_vm12, %v1235_v34 }
 0x101   : > { %v2553_v50 = vpop.permute.xlu1 %790  ;;  %v2555_v35 = vpop.permute.xlu0 %744 }
 0x103   : > { %1086 = vrot.lane.b32.xlu1 %v711_v45, %s2011_s30  ;;  %1040 = vrot.lane.b32.xlu0 %v708_v47, %s2010_s16 }
 0x105   : > { %v979_v56 = vpop.permute.xlu1 %978  ;;  %v933_v59 = vpop.permute.xlu0 %932 }
 0x106   : > { %v1202_v53 = vsel %vm1195_vm9, %v1185_v36, %v979_v56  ;;  %v1186_v44 = vsel %vm1178_vm8, %v1169_v23, %v933_v59  ;;  %v1119_v59 = vsel %vm1110_vm4, %v2244_v17, %v2531_v5  ;;  %v1120_v17 = vsel %vm1110_vm4, %v2247_v18, %v2555_v35 }
 0x107   : > { %946 = vrot.lane.b32.xlu1 %v711_v45, %s2007_s11  ;;  %900 = vrot.lane.b32.xlu0 %v708_v47, %s2006_s19  ;;  %v1136_v60 = vsel %vm1127_vm5, %v1119_v59, %v2553_v50 }
 0x109   : > { %v839_v9 = vpop.permute.xlu1 %838  ;;  %v2562_v10 = vpop.permute.xlu0 %792 }
 0x10a   : > { %v1153_v3 = vsel %vm1144_vm6, %v1136_v60, %v839_v9  ;;  %v1137_v5 = vsel %vm1127_vm5, %v1120_v17, %v2562_v10 }
 0x10b   : > { %948 = vrot.lane.b32.xlu1 %v713_v8, %s2007_s11  ;;  %1088 = vrot.lane.b32.xlu0 %v713_v8, %s2011_s30  ;;  %s2696_s11 = scalar_lea.vmem %s2786_s4, %s1782_s9 }
 0x10d   : > { %v1027_v6 = vpop.permute.xlu1 %1026  ;;  %v981_v37 = vpop.permute.xlu0 %980 }
 0x10e   : > { %v1219_v39 = vsel %vm1212_vm10, %v1202_v53, %v1027_v6  ;;  %v1203_v63 = vsel %vm1195_vm9, %v1186_v44, %v981_v37 }
 0x10f   : > { %996 = vrot.lane.b32.xlu1 %v555_v19, %s2009_s29  ;;  %994 = vrot.lane.b32.xlu0 %v593_v11, %s2009_s29 }
 0x111   : > { %v887_v16 = vpop.permute.xlu1 %886  ;;  %v841_v22 = vpop.permute.xlu0 %840 }
 0x112   : > { %v1170_v11 = vsel %vm1161_vm7, %v1153_v3, %v887_v16  ;;  %v1154_v50 = vsel %vm1144_vm6, %v1137_v5, %v841_v22 }
 0x113   : > { %1044 = vrot.lane.b32.xlu1 %v720_v27, %s2010_s16  ;;  %1042 = vrot.lane.b32.xlu0 %v718_v28, %s2010_s16 }
 0x115   : > { %v1075_v61 = vpop.permute.xlu1 %1074  ;;  %v1029_v58 = vpop.permute.xlu0 %1028 }
 0x116   : > { %v1236_v2 = vsel %vm1229_vm11, %v1219_v39, %v1075_v61  ;;  %v1220_v54 = vsel %vm1212_vm10, %v1203_v63, %v1029_v58 }
 0x117   : > { %1092 = vrot.lane.b32.xlu1 %v725_v31, %s2011_s30  ;;  %1090 = vrot.lane.b32.xlu0 %v723_v32, %s2011_s30 }
 0x118   : > { %1875 = vmatprep.mubr.msk.f32.mxu0 %vm1251_vm12, %v1236_v2 }
 0x119   : > { %v889_v41 = vpop.permute.xlu1 %888  ;;  %v747_v7 = vpop.permute.xlu0 %746 }
 0x11a   : > { %v1171_v57 = vsel %vm1161_vm7, %v1154_v50, %v889_v41  ;;  %v1121_v31 = vsel %vm1110_vm4, %v2286_v42, %v747_v7 }
 0x11d   : > { %v1077_v46 = vpop.permute.xlu1 %1076  ;;  %v935_v34 = vpop.permute.xlu0 %934 }
 0x11e   : > { %v1237_v0 = vsel %vm1229_vm11, %v1220_v54, %v1077_v46  ;;  %v1187_v12 = vsel %vm1178_vm8, %v1170_v11, %v935_v34 }
 0x11f   : > { %1876 = vmatmul.mubr.msk.f32.gmra.mrb[6].mxu0 %vm1251_vm12, %v1237_v0 }
 0x121   : > { %v795_v45 = vpop.permute.xlu1 %794  ;;  %v749_v47 = vpop.permute.xlu0 %748 }
 0x122   : > { %v1138_v32 = vsel %vm1127_vm5, %v1121_v31, %v795_v45  ;;  %v1122_v42 = vsel %vm1110_vm4, %v2289_v43, %v749_v47 }
 0x125   : > { %v983_v48 = vpop.permute.xlu1 %982  ;;  %v937_v51 = vpop.permute.xlu0 %936 }
 0x126   : > { %v1204_v13 = vsel %vm1195_vm9, %v1187_v12, %v983_v48  ;;  %v1188_v1 = vsel %vm1178_vm8, %v1171_v57, %v937_v51 }
 0x129   : > { %v843_v52 = vpop.permute.xlu1 %842  ;;  %v797_v55 = vpop.permute.xlu0 %796 }
 0x12a   : > { %v1155_v39 = vsel %vm1144_vm6, %v1138_v32, %v843_v52  ;;  %v1139_v7 = vsel %vm1127_vm5, %v1122_v42, %v797_v55 }
 0x12d   : > { %v1031_v56 = vpop.permute.xlu1 %1030  ;;  %v985_v33 = vpop.permute.xlu0 %984 }
 0x12e   : > { %v1221_v15 = vsel %vm1212_vm10, %v1204_v13, %v1031_v56  ;;  %v1205_v26 = vsel %vm1195_vm9, %v1188_v1, %v985_v33 }
 0x131   : > { %v891_v8 = vpop.permute.xlu1 %890  ;;  %v845_v19 = vpop.permute.xlu0 %844 }
 0x132   : > { %v1172_v2 = vsel %vm1161_vm7, %v1155_v39, %v891_v8  ;;  %v1156_v63 = vsel %vm1144_vm6, %v1139_v7, %v845_v19 }
 0x135   : > { %v1079_v4 = vpop.permute.xlu1 %1078  ;;  %v1033_v6 = vpop.permute.xlu0 %1032 }
 0x136   : > { %v1238_v37 = vsel %vm1229_vm11, %v1221_v15, %v1079_v4  ;;  %v1222_v27 = vsel %vm1212_vm10, %v1205_v26, %v1033_v6 }
 0x137   : > { %1878 = vmatprep.mubr.msk.f32.mxu1 %vm1251_vm12, %v1238_v37 }
 0x139   : > { %v893_v9 = vpop.permute.xlu1 %892  ;;  %v751_v38 = vpop.permute.xlu0 %750 }
 0x13a   : > { %v1173_v34 = vsel %vm1161_vm7, %v1156_v63, %v893_v9  ;;  %v1123_v19 = vsel %vm1110_vm4, %v2340_v21, %v751_v38 }
 0x13d   : > { %v1081_v28 = vpop.permute.xlu1 %1080  ;;  %v939_v29 = vpop.permute.xlu0 %938 }
 0x13e   : > { %v1239_v18 = vsel %vm1229_vm11, %v1222_v27, %v1081_v28  ;;  %v1189_v40 = vsel %vm1178_vm8, %v1172_v2, %v939_v29 }
 0x13f   : > { %1879 = vmatmul.mubr.msk.f32.vlgmr.msra.gmra.mrb[0].mxu1 %vm1251_vm12, %v1239_v18 }
 0x141   : > { %v799_v35 = vpop.permute.xlu1 %798  ;;  %v753_v10 = vpop.permute.xlu0 %752 }
 0x142   : > { %v1140_v11 = vsel %vm1127_vm5, %v1123_v19, %v799_v35  ;;  %v1124_v21 = vsel %vm1110_vm4, %v2347_v24, %v753_v10 }
 0x145   : > { %v987_v30 = vpop.permute.xlu1 %986  ;;  %v941_v16 = vpop.permute.xlu0 %940 }
 0x146   : > { %v1206_v49 = vsel %vm1195_vm9, %v1189_v40, %v987_v30  ;;  %v1190_v0 = vsel %vm1178_vm8, %v1173_v34, %v941_v16 }
 0x149   : > { %v847_v22 = vpop.permute.xlu1 %846  ;;  %v801_v62 = vpop.permute.xlu0 %800 }
 0x14a   : > { %v1157_v12 = vsel %vm1144_vm6, %v1140_v11, %v847_v22  ;;  %v1141_v38 = vsel %vm1127_vm5, %v1124_v21, %v801_v62 }
 0x14d   : > { %v1035_v36 = vpop.permute.xlu1 %1034  ;;  %v989_v53 = vpop.permute.xlu0 %988 }
 0x14e   : > { %v1223_v20 = vsel %vm1212_vm10, %v1206_v49, %v1035_v36  ;;  %v1207_v45 = vsel %vm1195_vm9, %v1190_v0, %v989_v53 }
 0x151   : > { %v895_v61 = vpop.permute.xlu1 %894  ;;  %v849_v58 = vpop.permute.xlu0 %848 }
 0x152   : > { %v1174_v4 = vsel %vm1161_vm7, %v1157_v12, %v895_v61  ;;  %v1158_v57 = vsel %vm1144_vm6, %v1141_v38, %v849_v58 }
 0x155   : > { %v1083_v41 = vpop.permute.xlu1 %1082  ;;  %v1037_v23 = vpop.permute.xlu0 %1036 }
 0x156   : > { %v1240_v44 = vsel %vm1229_vm11, %v1223_v20, %v1083_v41  ;;  %v1224_v48 = vsel %vm1212_vm10, %v1207_v45, %v1037_v23 }
 0x157   : > { %1881 = vmatprep.mubr.msk.f32.mxu1 %vm1251_vm12, %v1240_v44 }
 0x159   : > { %v897_v54 = vpop.permute.xlu1 %896  ;;  %v755_v46 = vpop.permute.xlu0 %754 }
 0x15a   : > { %v1175_v27 = vsel %vm1161_vm7, %v1158_v57, %v897_v54  ;;  %v1125_v22 = vsel %vm1110_vm4, %v2413_v14, %v755_v46 }
 0x15d   : > { %v1085_v51 = vpop.permute.xlu1 %1084  ;;  %v943_v52 = vpop.permute.xlu0 %942 }
 0x15e   : > { %v1241_v43 = vsel %vm1229_vm11, %v1224_v48, %v1085_v51  ;;  %v1191_v6 = vsel %vm1178_vm8, %v1174_v4, %v943_v52 }
 0x15f   : > { %1882 = vmatmul.mubr.msk.f32.gmra.mrb[2].mxu1 %vm1251_vm12, %v1241_v43 }
 0x161   : > { %v803_v47 = vpop.permute.xlu1 %802  ;;  %v757_v55 = vpop.permute.xlu0 %756 }
 0x162   : > { %v1126_v62 = vsel %vm1110_vm4, %v2422_v25, %v757_v55  ;;  %v1142_v36 = vsel %vm1127_vm5, %v1125_v22, %v803_v47 }
 0x165   : > { %v991_v56 = vpop.permute.xlu1 %990  ;;  %v945_v33 = vpop.permute.xlu0 %944 }
 0x166   : > { %v1208_v37 = vsel %vm1195_vm9, %v1191_v6, %v991_v56  ;;  %v1192_v28 = vsel %vm1178_vm8, %v1175_v27, %v945_v33 }
 0x169   : > { %v851_v59 = vpop.permute.xlu1 %850  ;;  %v805_v60 = vpop.permute.xlu0 %804 }
 0x16a   : > { %v1143_v53 = vsel %vm1127_vm5, %v1126_v62, %v805_v60  ;;  %v1159_v31 = vsel %vm1144_vm6, %v1142_v36, %v851_v59 }
 0x16d   : > { %v1039_v3 = vpop.permute.xlu1 %1038  ;;  %v993_v8 = vpop.permute.xlu0 %992 }
 0x16e   : > { %v1225_v17 = vsel %vm1212_vm10, %v1208_v37, %v1039_v3  ;;  %v1209_v29 = vsel %vm1195_vm9, %v1192_v28, %v993_v8 }
 0x171   : > { %v899_v13 = vpop.permute.xlu1 %898  ;;  %v853_v15 = vpop.permute.xlu0 %852 }
 0x172   : > { %v1160_v32 = vsel %vm1144_vm6, %v1143_v53, %v853_v15  ;;  %v1176_v58 = vsel %vm1161_vm7, %v1159_v31, %v899_v13 }
 0x175   : > { %v1087_v5 = vpop.permute.xlu1 %1086  ;;  %v1041_v50 = vpop.permute.xlu0 %1040 }
 0x176   : > { %v1242_v9 = vsel %vm1229_vm11, %v1225_v17, %v1087_v5  ;;  %v1226_v18 = vsel %vm1212_vm10, %v1209_v29, %v1041_v50 }
 0x177   : > { %1884 = vmatprep.mubr.msk.f32.mxu1 %vm1251_vm12, %v1242_v9 }
 0x179   : > { %v947_v1 = vpop.permute.xlu1 %946  ;;  %v901_v26 = vpop.permute.xlu0 %900 }
 0x17a   : > { %v1177_v2 = vsel %vm1161_vm7, %v1160_v32, %v901_v26  ;;  %v1193_v14 = vsel %vm1178_vm8, %v1176_v58, %v947_v1 }
 0x17d   : > { %v949_v35 = vpop.permute.xlu1 %948  ;;  %v1089_v30 = vpop.permute.xlu0 %1088 }
 0x17e   : > { %v1243_v24 = vsel %vm1229_vm11, %v1226_v18, %v1089_v30  ;;  %v1194_v40 = vsel %vm1178_vm8, %v1177_v2, %v949_v35 }
 0x17f   : > { %1885 = vmatmul.mubr.msk.f32.gmra.mrb[4].mxu1 %vm1251_vm12, %v1243_v24 }
 0x181   : > { %v997_v10 = vpop.permute.xlu1 %996  ;;  %v995_v16 = vpop.permute.xlu0 %994 }
 0x182   : > { %v1211_v25 = vsel %vm1195_vm9, %v1194_v40, %v997_v10  ;;  %v1210_v49 = vsel %vm1195_vm9, %v1193_v14, %v995_v16 }
 0x185   : > { %v1045_v39 = vpop.permute.xlu1 %1044  ;;  %v1043_v61 = vpop.permute.xlu0 %1042 }
 0x186   : > { %v1228_v20 = vsel %vm1212_vm10, %v1211_v25, %v1045_v39  ;;  %v1227_v41 = vsel %vm1212_vm10, %v1210_v49, %v1043_v61 }
 0x189   : > { %v1093_v23 = vpop.permute.xlu1 %1092  ;;  %v1091_v44 = vpop.permute.xlu0 %1090 }
 0x18a   : > { %v1245_v42 = vsel %vm1229_vm11, %v1228_v20, %v1093_v23  ;;  %v1244_v7 = vsel %vm1229_vm11, %v1227_v41, %v1091_v44 }
 0x18b   : > { %1887 = vmatprep.mubr.msk.f32.mxu1 %vm1251_vm12, %v1244_v7 }
 0x18c   : > { %1888 = vmatmul.mubr.msk.f32.gmra.mrb[6].mxu1 %vm1251_vm12, %v1245_v42 }
 0x193   : > { %v1868_v63 = vpop.f32.mrb[0].mxu0 }
 0x194   : > { %1450 = vst.msk [vmem:[%s2696_s11 + $0x8] sm:$0xff] %vm1110_vm4, %v1868_v63  ;;  %v1466_v54 = vsel %vm1110_vm4, %v1868_v63, 0.0  ;;  %v1503_v46 = vmul.f32 %v1868_v63, %v1868_v63  ;;  %v1370_v34 = vpop.f32.mrb[1].mxu0 }
 0x195   : > { %1449 = vst.msk [vmem:[%s2696_s11] sm:$0xff] %vm1110_vm4, %v1370_v34  ;;  %v1465_v0 = vsel %vm1110_vm4, %v1370_v34, 0.0  ;;  %v1502_v45 = vmul.f32 %v1370_v34, %v1370_v34 }
 0x196   : > { %v1519_v48 = vsel %vm1110_vm4, %v1503_v46, 0.0  ;;  %v1467_v51 = vadd.f32 %v1466_v54, %v1465_v0 }
 0x197   : > { %v1518_v52 = vsel %vm1110_vm4, %v1502_v45, 0.0 }
 0x198   : > { %v1520_v43 = vadd.f32 %v1519_v48, %v1518_v52 }
 0x1b3   : > { %v1871_v47 = vpop.f32.mrb[2].mxu0 }
 0x1b4   : > { %1452 = vst.msk [vmem:[%s2696_s11 + $0x18] sm:$0xff] %vm1110_vm4, %v1871_v47  ;;  %v1380_v55 = vpop.f32.mrb[3].mxu0  ;;  %v1505_v56 = vmul.f32 %v1871_v47, %v1871_v47  ;;  %v1470_v3 = vsel %vm1110_vm4, %v1871_v47, 0.0 }
 0x1b5   : > { %1451 = vst.msk [vmem:[%s2696_s11 + $0x10] sm:$0xff] %vm1110_vm4, %v1380_v55  ;;  %v1468_v33 = vsel %vm1110_vm4, %v1380_v55, 0.0  ;;  %v1504_v59 = vmul.f32 %v1380_v55, %v1380_v55 }
 0x1b6   : > { %v1469_v60 = vadd.f32 %v1468_v33, %v1467_v51  ;;  %v1523_v12 = vsel %vm1110_vm4, %v1505_v56, 0.0 }
 0x1b7   : > { %v1521_v8 = vsel %vm1110_vm4, %v1504_v59, 0.0 }
 0x1b8   : > { %v1522_v19 = vadd.f32 %v1521_v8, %v1520_v43  ;;  %v1471_v11 = vadd.f32 %v1470_v3, %v1469_v60 }
 0x1ba   : > { %v1524_v13 = vadd.f32 %v1523_v12, %v1522_v19 }
 0x1d3   : > { %v1874_v15 = vpop.f32.mrb[4].mxu0 }
 0x1d4   : > { %1454 = vst.msk [vmem:[%s2696_s11 + $0x28] sm:$0xff] %vm1110_vm4, %v1874_v15  ;;  %v1390_v4 = vpop.f32.mrb[5].mxu0  ;;  %v1507_v6 = vmul.f32 %v1874_v15, %v1874_v15  ;;  %v1474_v50 = vsel %vm1110_vm4, %v1874_v15, 0.0 }
 0x1d5   : > { %1453 = vst.msk [vmem:[%s2696_s11 + $0x20] sm:$0xff] %vm1110_vm4, %v1390_v4  ;;  %v1472_v37 = vsel %vm1110_vm4, %v1390_v4, 0.0  ;;  %v1506_v17 = vmul.f32 %v1390_v4, %v1390_v4 }
 0x1d6   : > { %v1473_v5 = vadd.f32 %v1472_v37, %v1471_v11  ;;  %v1527_v57 = vsel %vm1110_vm4, %v1507_v6, 0.0 }
 0x1d7   : > { %v1525_v9 = vsel %vm1110_vm4, %v1506_v17, 0.0 }
 0x1d8   : > { %v1526_v21 = vadd.f32 %v1525_v9, %v1524_v13  ;;  %v1475_v38 = vadd.f32 %v1474_v50, %v1473_v5 }
 0x1da   : > { %v1528_v1 = vadd.f32 %v1527_v57, %v1526_v21 }
 0x1f2   : > { %v1877_v26 = vpop.f32.mrb[6].mxu0 }
 0x1f3   : > { %1456 = vst.msk [vmem:[%s2696_s11 + $0x38] sm:$0xff] %vm1110_vm4, %v1877_v26  ;;  %v1400_v27 = vpop.f32.mrb[7].mxu0  ;;  %v1509_v28 = vmul.f32 %v1877_v26, %v1877_v26  ;;  %v1478_v30 = vsel %vm1110_vm4, %v1877_v26, 0.0 }
 0x1f4   : > { %1455 = vst.msk [vmem:[%s2696_s11 + $0x30] sm:$0xff] %vm1110_vm4, %v1400_v27  ;;  %v1476_v29 = vsel %vm1110_vm4, %v1400_v27, 0.0  ;;  %v1508_v18 = vmul.f32 %v1400_v27, %v1400_v27 }
 0x1f5   : > { %v1477_v35 = vadd.f32 %v1476_v29, %v1475_v38  ;;  %v1531_v22 = vsel %vm1110_vm4, %v1509_v28, 0.0 }
 0x1f6   : > { %v1529_v24 = vsel %vm1110_vm4, %v1508_v18, 0.0 }
 0x1f7   : > { %v1479_v10 = vadd.f32 %v1478_v30, %v1477_v35  ;;  %v1530_v16 = vadd.f32 %v1529_v24, %v1528_v1 }
 0x1f9   : > { %v1532_v62 = vadd.f32 %v1531_v22, %v1530_v16 }
 0x212   : > { %v1880_v36 = vpop.f32.mrb[0].mxu1 }
 0x213   : > { %1458 = vst.msk [vmem:[%s2696_s11 + $0x48] sm:$0xff] %vm1110_vm4, %v1880_v36  ;;  %v1410_v53 = vpop.f32.mrb[1].mxu1  ;;  %v1511_v31 = vmul.f32 %v1880_v36, %v1880_v36  ;;  %v1482_v58 = vsel %vm1110_vm4, %v1880_v36, 0.0 }
 0x214   : > { %1457 = vst.msk [vmem:[%s2696_s11 + $0x40] sm:$0xff] %vm1110_vm4, %v1410_v53  ;;  %v1480_v32 = vsel %vm1110_vm4, %v1410_v53, 0.0  ;;  %v1510_v39 = vmul.f32 %v1410_v53, %v1410_v53 }
 0x215   : > { %v1481_v61 = vadd.f32 %v1480_v32, %v1479_v10  ;;  %v1535_v25 = vsel %vm1110_vm4, %v1511_v31, 0.0 }
 0x216   : > { %v1533_v2 = vsel %vm1110_vm4, %v1510_v39, 0.0 }
 0x217   : > { %v1534_v14 = vadd.f32 %v1533_v2, %v1532_v62  ;;  %v1483_v40 = vadd.f32 %v1482_v58, %v1481_v61 }
 0x219   : > { %v1536_v49 = vadd.f32 %v1535_v25, %v1534_v14 }
 0x232   : > { %v1883_v20 = vpop.f32.mrb[2].mxu1 }
 0x233   : > { %1460 = vst.msk [vmem:[%s2696_s11 + $0x58] sm:$0xff] %vm1110_vm4, %v1883_v20  ;;  %v1420_v41 = vpop.f32.mrb[3].mxu1  ;;  %v1513_v23 = vmul.f32 %v1883_v20, %v1883_v20  ;;  %v1486_v63 = vsel %vm1110_vm4, %v1883_v20, 0.0 }
 0x234   : > { %1459 = vst.msk [vmem:[%s2696_s11 + $0x50] sm:$0xff] %vm1110_vm4, %v1420_v41  ;;  %v1484_v44 = vsel %vm1110_vm4, %v1420_v41, 0.0  ;;  %v1512_v42 = vmul.f32 %v1420_v41, %v1420_v41 }
 0x235   : > { %v1485_v7 = vadd.f32 %v1484_v44, %v1483_v40  ;;  %v1539_v0 = vsel %vm1110_vm4, %v1513_v23, 0.0 }
 0x236   : > { %v1537_v54 = vsel %vm1110_vm4, %v1512_v42, 0.0 }
 0x237   : > { %v1538_v46 = vadd.f32 %v1537_v54, %v1536_v49  ;;  %v1487_v34 = vadd.f32 %v1486_v63, %v1485_v7 }
 0x239   : > { %v1540_v45 = vadd.f32 %v1539_v0, %v1538_v46 }
 0x252   : > { %v1886_v48 = vpop.f32.mrb[4].mxu1 }
 0x253   : > { %1462 = vst.msk [vmem:[%s2696_s11 + $0x68] sm:$0xff] %vm1110_vm4, %v1886_v48  ;;  %v1430_v51 = vpop.f32.mrb[5].mxu1  ;;  %v1515_v52 = vmul.f32 %v1886_v48, %v1886_v48  ;;  %v1490_v56 = vsel %vm1110_vm4, %v1886_v48, 0.0 }
 0x254   : > { %1461 = vst.msk [vmem:[%s2696_s11 + $0x60] sm:$0xff] %vm1110_vm4, %v1430_v51  ;;  %v1488_v43 = vsel %vm1110_vm4, %v1430_v51, 0.0  ;;  %v1514_v47 = vmul.f32 %v1430_v51, %v1430_v51 }
 0x255   : > { %v1489_v55 = vadd.f32 %v1488_v43, %v1487_v34  ;;  %v1543_v3 = vsel %vm1110_vm4, %v1515_v52, 0.0 }
 0x256   : > { %v1541_v33 = vsel %vm1110_vm4, %v1514_v47, 0.0 }
 0x257   : > { %v1542_v59 = vadd.f32 %v1541_v33, %v1540_v45  ;;  %v1491_v60 = vadd.f32 %v1490_v56, %v1489_v55 }
 0x259   : > { %v1544_v8 = vadd.f32 %v1543_v3, %v1542_v59 }
 0x25f   : > { %v1889_v19 = vpop.f32.mrb[6].mxu1 }
 0x260   : > { %1464 = vst.msk [vmem:[%s2696_s11 + $0x78] sm:$0xff] %vm1110_vm4, %v1889_v19  ;;  %v1440_v11 = vpop.f32.mrb[7].mxu1  ;;  %v1517_v12 = vmul.f32 %v1889_v19, %v1889_v19  ;;  %v1494_v6 = vsel %vm1110_vm4, %v1889_v19, 0.0 }
 0x261   : > { %1463 = vst.msk [vmem:[%s2696_s11 + $0x70] sm:$0xff] %vm1110_vm4, %v1440_v11  ;;  %v1492_v13 = vsel %vm1110_vm4, %v1440_v11, 0.0  ;;  %v1516_v15 = vmul.f32 %v1440_v11, %v1440_v11 }
 0x262   : > { %v1493_v4 = vadd.f32 %v1492_v13, %v1491_v60  ;;  %v1547_v50 = vsel %vm1110_vm4, %v1517_v12, 0.0 }
 0x263   : > { %v1545_v37 = vsel %vm1110_vm4, %v1516_v15, 0.0 }
 0x264   : > { %v1495_v17 = vadd.f32 %v1494_v6, %v1493_v4  ;;  %v1546_v5 = vadd.f32 %v1545_v37, %v1544_v8 }
 0x266   : > { %v1496_v9 = vrot.slane %v1495_v17, 4  ;;  %v1548_v21 = vadd.f32 %v1547_v50, %v1546_v5 }
 0x268   : > { %v1497_v38 = vadd.f32 %v1496_v9, %v1495_v17  ;;  %v1549_v57 = vrot.slane %v1548_v21, 4 }
 0x26a   : > { %v1498_v1 = vrot.slane %v1497_v38, 2  ;;  %v1550_v26 = vadd.f32 %v1549_v57, %v1548_v21 }
 0x26c   : > { %v1499_v27 = vadd.f32 %v1498_v1, %v1497_v38  ;;  %v1551_v28 = vrot.slane %v1550_v26, 2 }
 0x26e   : > { %v1500_v29 = vrot.slane %v1499_v27, 1  ;;  %v1552_v18 = vadd.f32 %v1551_v28, %v1550_v26  ;;  %1559 = sbr.rel (%p1822_p12) target bundleno = 630 (0x276), region = 40 }
 0x270   : > { %v1553_v35 = vrot.slane %v1552_v18, 1  ;;  %v1501_v30 = vadd.f32 %v1500_v29, %v1499_v27 }
 0x272   : > { %v1554_v24 = vadd.f32 %v1553_v35, %v1552_v18 }
 0x274   : > { %v1555_v10 = vsel %vm525_vm0, %v1501_v30, %v1554_v24 }
 0x275   : > { %1561 = vst.msk [vmem:[#allocation2] sm:$0x3] %vm1560_vm13, %v1555_v10 }
 0x276 PF: > { %p1823_p13 = scmp.le.s32.totalorder %s1986_s18, 0 }
 0x277   : > { %vm1568_vm14 = vcmask (!%p1823_p13), 25600  }
 0x278   : > { %1565 = sbr.rel (%p1823_p13) target bundleno = 640 (0x280), region = 44 }
 0x27c   : > { %v1566_v16 = vld [vmem:[#allocation2] sm:$0x3] (!%p1823_p13) }
 0x27d   : > { %v1567_v22 = vadd.f32 (!%p1823_p13), %v1566_v16, %v1555_v10 }
 0x27f   : > { %1569 = vst.msk [vmem:[#allocation2] sm:$0x3] %vm1568_vm14, %v1567_v22 }
 0x280 PF: > { %p1824_p0 = scmp.ne.s32.totalorder %s1986_s18, 1 }
 0x281   : > { %vm1575_vm15 = vcmask (!%p1824_p0), 25600  }
 0x282   : > { %1573 = sbr.rel (%p1824_p0) target bundleno = 649 (0x289), region = 48 }
 0x286   : > { %v1574_v62 = vld [vmem:[#allocation2] sm:$0x3] (!%p1824_p0) }
 0x287   : > { %1576 = vst.msk [vmem:[%s2084_s7] sm:$0x3] (!%p1824_p0), %vm1575_vm15, %v1574_v62 }
 0x289 PF: > { %s16_s22 = sadd.s32 1, %s2002_s22   ;;  %s2789_s18 = smov %s1994_s20 }
 0x28a   : > { %p13_p1 = scmp.ge.s32.totalorder %s16_s22, 6   ;;  %s2790_s19 = smov %s1998_s21 }
 0x28b   : > { %s2791_s20 = smov %s2794_s23  ;;  %s2792_s21 = smov %s2798_s24 }
 0x28c   :  { %15 = sbr.rel (!%p13_p1) target bundleno = 3 (0x3), region = 96 }

// kernel: basic_block_forward.4
= control target key start
LH: loop header
LB: loop body
LE: loop exit
PB: predicated region body
PF: predicated region fallthrough
CT: control target
= control target key end

     0   :  { %s2170_s24 = smov 0   ;;  %s2172_s25 = smov 0   ;;  %s2978_s0 = inlined_call_operand.vmem [shape: f32[2,16,16,4], index: 0, kind: input, shape index: {}, may-alias: {0,1,2}]   ;;  %s2979_s1 = inlined_call_operand.vmem [shape: f32[2,16,16,4], index: 1, kind: input, shape index: {}, may-alias: {0,1,2}]   ;;  %s2980_s2 = inlined_call_operand.vmem [shape: f32[2,16,16,4], index: 2, kind: input, shape index: {}, may-alias: {0,1,2}]   ;;  %s2981_s3 = inlined_call_operand.vmem [shape: f32[1,4], index: 3, kind: input, shape index: {}]   ;;  %s2982_s4 = inlined_call_operand.vmem [shape: f32[1,4], index: 4, kind: input, shape index: {}]   ;;  %s2983_s5 = inlined_call_operand.vmem [shape: f32[36,4], index: 5, kind: input, shape index: {}]   ;;  %s2984_s6 = inlined_call_operand.vmem [shape: f32[2,16,16,4], index: 6, kind: output, shape index: {0}]   ;;  %s2985_s7 = inlined_call_operand.vmem [shape: f32[2,1,2,4], index: 7, kind: output, shape index: {1}]  }
   0x1   :  { %s2174_s26 = smov 0   ;;  %s2176_s27 = smov 0  }
   0x2   :  { %s2178_s28 = smov 0  }
   0x3 LB: > { %s30_s29 = sadd.s32 1, %s2112_s26  ;;  %s37_s30 = sadd.s32 1, %s2116_s27  ;;  %s2120_s28 = sphi %s2178_s28, %s18_s28   ;;  %s2116_s27 = sphi %s2176_s27, %s2992_s27   ;;  %s2112_s26 = sphi %s2174_s26, %s2991_s26   ;;  %s2108_s25 = sphi %s2172_s25, %s2990_s25   ;;  %s2104_s24 = sphi %s2170_s24, %s2989_s24  }
   0x4   : > { %p31_p0 = scmp.ge.s32.totalorder %s30_s29, 2  ;;  %p1906_p1 = scmp.ge.s32.totalorder %s2120_s28, 1 }
   0x5   : > { %p363_p2 = scmp.lt.s32.totalorder %s2120_s28, 5 }
   0x6   : > { %s2994_s29 = smov (%p31_p0, %s30_s29), 0  ;;  %s2996_s30 = smov (!%p31_p0, %s37_s30), %s2116_s27 }
   0x7   : > { %p364_p3 = pnand %p1906_p1, %p363_p2  ;;  %p39_p4 = scmp.ge.s32.totalorder %s2996_s30, 2 }
   0x8   : > { %s2203_s8 = sshll.u32 (!%p364_p3), %s2104_s24, 3  ;;  %p449_p5 = scmp.lt.s32.totalorder (!%p364_p3), %s2108_s25, 1  ;;  %v2221_v0 = vld [vmem:[%s2981_s3] ss:$0 sm:$0xff] (!%p364_p3)  ;;  %vm653_vm0 = vcmask (!%p364_p3), 1040384   ;;  %vm748_vm1 = vcmask (!%p364_p3), 1046528  }
   0x9   : > { %s2998_s30 = smov (%p39_p4, %s2996_s30), 0  ;;  %367 = sbr.rel (%p364_p3) target bundleno = 655 (0x28f), region = 44 }
   0xa   : > { %p451_p6 = scmp.lt.s32.totalorder (!%p364_p3), %s2203_s8, 15  ;;  %v2233_v1 = vld [vmem:[%s2982_s4] ss:$0 sm:$0xff] (!%p364_p3)  ;;  %p605_p9 = scmp.gt.s32.totalorder (!%p364_p3), %s2104_s24, 0  ;;  %vm789_vm2 = vcmask (!%p364_p3), 1045504   ;;  %vm1428_vm4 = vcmask (!%p364_p3), 1043456  }
   0xb   : > { %s2122_s14 = smov (!%p364_p3), 12   ;;  %s2123_s23 = smov (!%p364_p3), 24   ;;  %v1374_v63 = vld [vmem:[%s2983_s5] sm:$0xff] (!%p364_p3)  ;;  %vm1238_vm5 = vcmask (!%p364_p3), 31744   ;;  %vm1255_vm6 = vcmask (!%p364_p3), 64512   ;;  %vm1272_vm7 = vcmask (!%p364_p3), 97280  }
   0xc   : > { %s2128_s20 = smov (!%p364_p3), 28   ;;  %vm1289_vm8 = vcmask (!%p364_p3), 130048   ;;  %vm1306_vm9 = vcmask (!%p364_p3), 162816   ;;  %vm1323_vm10 = vcmask (!%p364_p3), 195584   ;;  %vm1340_vm11 = vcmask (!%p364_p3), 228352   ;;  %p619_p11 = scmp.lt.s32.totalorder (!%p364_p3), %s2104_s24, 1 }
   0xd   : > { %vm1357_vm12 = vcmask (!%p364_p3), 261120   ;;  %vm1379_vm13 = vcmask (!%p364_p3), 293888   ;;  %p1952_p12 = scmp.ne.s32.totalorder (!%p364_p3), %s2104_s24, 0 }
  0x10   : > { %s3000_s25 = smov (!%p449_p5, %s2108_s25), 1  ;;  %vm1688_vm15 = vcmask (!%p1952_p12), 25600  }
  0x11   : > { %s452_s9 = scalar_select %p451_p6, %s2203_s8, 15 }
  0x12   : > { %s2207_s10 = sshll.u32 %s3000_s25, 5  ;;  %s1932_s11 = sshll.u32 %s3000_s25, 1 }
  0x13   : > { %s1908_s12 = sshll.u32 %s452_s9, 1  ;;  %s2212_s15 = scalar_lea.vmem %s2985_s7, %s1932_s11 }
  0x14   : > { %s2215_s16 = sadd.s32 %s2207_s10, %s1908_s12  ;;  %s1912_s9 = sadd.s32 4294967295, %s2203_s8 }
  0x15   : > { %s2986_s17 = sshll.u32 %s2215_s16, 3  ;;  %p465_p7 = scmp.gt.s32.totalorder %s1912_s9, 0 }
  0x16   : > { %s2228_s22 = scalar_lea.vmem %s2978_s0, %s2986_s17  ;;  %p1913_p8 = scmp.lt.s32.totalorder %s1912_s9, 15 }
  0x17   : > { %v527_v2 = vld [vmem:[%s2228_s22] sm:$0xff]  ;;  %v528_v3 = vld [vmem:[%s2228_s22 + $0x8] sm:$0xff]  ;;  %v529_v4 = vld [vmem:[%s2228_s22 + $0x10] sm:$0xff]  ;;  %s3002_s9 = smov (!%p465_p7, %s1912_s9), 0  ;;  %s2124_s25 = smov 16  }
  0x18   : > { %v550_v5 = vmul.f32 %v2221_v0, %v527_v2  ;;  %v551_v6 = vmul.f32 %v2221_v0, %v528_v3  ;;  %v552_v7 = vmul.f32 %v2221_v0, %v529_v4  ;;  %s3004_s9 = smov (!%p1913_p8, %s3002_s9), 15  ;;  %v530_v27 = vld [vmem:[%s2228_s22 + $0x18] sm:$0xff]  ;;  %v1375_v2 = vld [vmem:[%s2983_s5 + $0x8] sm:$0xff]  ;;  %s2129_s17 = smov 32  }
  0x19   : > { %s2248_s11 = scalar_select %p605_p9, 1, 0  ;;  %v553_v36 = vmul.f32 %v2221_v0, %v530_v27  ;;  %v2020_v3 = vpack.c.bf16 %v1375_v2, %v1374_v63 }
  0x1a   : > { %v573_v8 = vadd.f32 %v2233_v1, %v550_v5  ;;  %v574_v9 = vadd.f32 %v2233_v1, %v551_v6  ;;  %v575_v10 = vadd.f32 %v2233_v1, %v552_v7  ;;  %s1918_s12 = sshll.u32 %s3004_s9, 1  ;;  %s2125_s9 = smov 4   ;;  %v1376_v6 = vld [vmem:[%s2983_s5 + $0x10] sm:$0xff]  ;;  %v1377_v7 = vld [vmem:[%s2983_s5 + $0x18] sm:$0xff] }
  0x1b   : > { %s473_s13 = sadd.s32 %s1918_s12, %s2207_s10  ;;  %v615_v30 = vstv %s2248_s11  ;;  %v576_v43 = vadd.f32 %v2233_v1, %v553_v36  ;;  %s2126_s11 = smov 20   ;;  %2021 = vmatprep.subr.bf16.mxu0 %v2020_v3  ;;  %2028 = vmatprep.subr.bf16.mxu1 %v2020_v3 }
  0x1c   : > { %v589_v11 = vmax.f32 %v573_v8, 0.0  ;;  %v590_v12 = vmax.f32 %v574_v9, 0.0  ;;  %v591_v13 = vmax.f32 %v575_v10, 0.0  ;;  %s1920_s18 = sshll.u32 %s473_s13, 3  ;;  %vm616_vm3 = vcmp.eq.s32.totalorder %v615_v30, 1  ;;  %s2127_s12 = smov 8   ;;  %2023 = vmatpush3.bf16.msra.mxu0 %v2020_v3  ;;  %2031 = vmatpush3.bf16.msra.mxu1 %v2020_v3 }
  0x1d   : > { %s475_s21 = scalar_lea.vmem %s2979_s1, %s1920_s18  ;;  %v592_v53 = vmax.f32 %v576_v43, 0.0  ;;  %v2024_v10 = vpack.c.bf16 %v1377_v7, %v1376_v6  ;;  %v536_v6 = vld [vmem:[%s2228_s22 + $0x48] sm:$0xff]  ;;  %s1964_s13 = sadd.s32 8, %s2203_s8 }
  0x1e   : > { %v657_v14 = vrot.slane %v589_v11, 7  ;;  %v658_v15 = vrot.slane %v590_v12, 7  ;;  %v2246_v16 = vrot.slane %v591_v13, 7  ;;  %v606_v25 = vld [vmem:[%s475_s21] sm:$0xff]  ;;  %v607_v26 = vld [vmem:[%s475_s21 + $0x8] sm:$0xff]  ;;  %p2642_p10 = scmp.lt.s32.totalorder %s1964_s13, 15 }
  0x1f   : > { %v608_v28 = vmul.f32 %v2221_v0, %v606_v25  ;;  %v609_v29 = vmul.f32 %v2221_v0, %v607_v26  ;;  %v661_v59 = vrot.slane %v592_v53, 7  ;;  %v1378_v11 = vld [vmem:[%s2983_s5 + $0x20] sm:$0xf]  ;;  %2025 = vmatprep.subr.bf16.mxu0 %v2024_v10  ;;  %2029 = vmatprep.subr.bf16.mxu1 %v2024_v10 }
  0x20   : > { %v2251_v17 = vsel %vm653_vm0, 0.0, %v657_v14  ;;  %v2254_v18 = vsel %vm653_vm0, %v657_v14, %v658_v15  ;;  %v723_v19 = vsel %vm653_vm0, %v658_v15, 0.0  ;;  %v2266_v22 = vsel %vm653_vm0, 0.0, %v2246_v16  ;;  %v531_v15 = vld [vmem:[%s2228_s22 + $0x20] sm:$0xff]  ;;  %2027 = vmatpush3.bf16.msra.mxu0 %v2024_v10  ;;  %2032 = vmatpush3.bf16.msra.mxu1 %v2024_v10  ;;  %s3006_s13 = smov (!%p2642_p10, %s1964_s13), 15 }
  0x21   : > { %950 = vrot.lane.b32.xlu0 %v2251_v17, %s2122_s14  ;;  %952 = vrot.lane.b32.xlu1 %v2254_v18, %s2122_s14  ;;  %v754_v20 = vrot.slane %v2251_v17, 1  ;;  %v755_v21 = vrot.slane %v2254_v18, 1  ;;  %v757_v23 = vrot.slane %v723_v19, 1  ;;  %v795_v31 = vrot.slane %v2251_v17, 2  ;;  %s3008_s13 = smov (!%p2642_p10, %s3006_s13), 15 }
  0x22   : > { %v796_v33 = vrot.slane %v2254_v18, 2  ;;  %v610_v34 = vadd.f32 %v2233_v1, %v608_v28  ;;  %v611_v35 = vadd.f32 %v2233_v1, %v609_v29  ;;  %v798_v39 = vrot.slane %v723_v19, 2  ;;  %1994 = vmatprep.subr.msk.mxu0 %vm1428_vm4, %v1378_v11  ;;  %2030 = vmatprep.subr.msk.mxu1 %vm1428_vm4, %v1378_v11 }
  0x23   : > { %v756_v24 = vsel %vm748_vm1, %v754_v20, %v755_v21  ;;  %v758_v32 = vsel %vm748_vm1, %v755_v21, %v757_v23  ;;  %v2313_v62 = vsel %vm653_vm0, %v2246_v16, %v661_v59  ;;  %v759_v4 = vrot.slane %v2266_v22, 1  ;;  %v532_v16 = vld [vmem:[%s2228_s22 + $0x28] sm:$0xff] }
  0x24   : > { %v612_v37 = vmax.f32 %v610_v34, 0.0  ;;  %v613_v38 = vmax.f32 %v611_v35, 0.0  ;;  %v797_v40 = vsel %vm789_vm2, %v795_v31, %v796_v33  ;;  %v799_v46 = vsel %vm789_vm2, %v796_v33, %v798_v39  ;;  %1995 = vmatpush3.msk.msra.mxu0 %vm1428_vm4, %v1378_v11  ;;  %2033 = vmatpush3.msk.msra.mxu1 %vm1428_vm4, %v1378_v11 }
  0x25   : > { %1094 = vrot.lane.b32.xlu1 %v2266_v22, %s2123_s23  ;;  %998 = vrot.lane.b32.xlu0 %v756_v24, %s2124_s25  ;;  %v760_v5 = vrot.slane %v2313_v62, 1  ;;  %v724_v9 = vsel %vm653_vm0, %v661_v59, 0.0  ;;  %v800_v12 = vrot.slane %v2266_v22, 2  ;;  %v801_v13 = vrot.slane %v2313_v62, 2 }
  0x26   : > { %v617_v41 = vsel %vm616_vm3, %v612_v37, 0.0  ;;  %v618_v42 = vsel %vm616_vm3, %v613_v38, 0.0  ;;  %v762_v14 = vrot.slane %v724_v9, 1  ;;  %v554_v21 = vmul.f32 %v2221_v0, %v531_v15 }
  0x27   : > { %v654_v44 = vrot.slane %v617_v41, 7  ;;  %v655_v45 = vrot.slane %v618_v42, 7  ;;  %v761_v8 = vsel %vm748_vm1, %v759_v4, %v760_v5  ;;  %v802_v19 = vsel %vm789_vm2, %v800_v12, %v801_v13  ;;  %v533_v41 = vld [vmem:[%s2228_s22 + $0x30] sm:$0xff]  ;;  %v534_v42 = vld [vmem:[%s2228_s22 + $0x38] sm:$0xff] }
  0x28   : > { %v763_v20 = vsel %vm748_vm1, %v760_v5, %v762_v14  ;;  %v555_v23 = vmul.f32 %v2221_v0, %v532_v16  ;;  %v577_v25 = vadd.f32 %v2233_v1, %v554_v21  ;;  %v535_v5 = vld [vmem:[%s2228_s22 + $0x40] sm:$0xff]  ;;  %v559_v10 = vmul.f32 %v2221_v0, %v536_v6 }
  0x29   : > { %858 = vrot.lane.b32.xlu1 %v756_v24, %s2125_s9  ;;  %1000 = vrot.lane.b32.xlu0 %v758_v32, %s2124_s25  ;;  %v2293_v47 = vsel %vm653_vm0, %v654_v44, %v655_v45  ;;  %v2296_v48 = vsel %vm653_vm0, 0.0, %v654_v44  ;;  %v722_v54 = vsel %vm653_vm0, %v655_v45, 0.0  ;;  %v803_v24 = vrot.slane %v724_v9, 2 }
  0x2a   : > { %v790_v49 = vrot.slane %v2296_v48, 2  ;;  %v791_v50 = vrot.slane %v2293_v47, 2  ;;  %v749_v51 = vrot.slane %v2296_v48, 1  ;;  %v750_v52 = vrot.slane %v2293_v47, 1 }
  0x2b   : > { %v793_v57 = vrot.slane %v722_v54, 2  ;;  %v752_v58 = vrot.slane %v722_v54, 1  ;;  %v578_v26 = vadd.f32 %v2233_v1, %v555_v23  ;;  %v804_v27 = vsel %vm789_vm2, %v801_v13, %v803_v24 }
  0x2c   : > { %v792_v55 = vsel %vm789_vm2, %v790_v49, %v791_v50  ;;  %v751_v56 = vsel %vm748_vm1, %v749_v51, %v750_v52  ;;  %v593_v28 = vmax.f32 %v577_v25, 0.0  ;;  %v556_v45 = vmul.f32 %v2221_v0, %v533_v41 }
  0x2d   : > { %1046 = vrot.lane.b32.xlu1 %v797_v40, %s2126_s11  ;;  %860 = vrot.lane.b32.xlu0 %v758_v32, %s2125_s9  ;;  %v794_v60 = vsel %vm789_vm2, %v791_v50, %v793_v57  ;;  %v753_v61 = vsel %vm748_vm1, %v750_v52, %v752_v58  ;;  %v594_v29 = vmax.f32 %v578_v26, 0.0  ;;  %v558_v9 = vmul.f32 %v2221_v0, %v535_v5 }
  0x2e   : > { %v663_v30 = vrot.slane %v593_v28, 7  ;;  %v579_v50 = vadd.f32 %v2233_v1, %v556_v45  ;;  %v582_v13 = vadd.f32 %v2233_v1, %v559_v10 }
  0x2f   : > { %v664_v31 = vrot.slane %v594_v29, 7  ;;  %v581_v12 = vadd.f32 %v2233_v1, %v558_v9 }
  0x30   : > { %v2369_v32 = vsel %vm653_vm0, 0.0, %v663_v30  ;;  %v595_v53 = vmax.f32 %v579_v50, 0.0  ;;  %v598_v16 = vmax.f32 %v582_v13, 0.0 }
  0x31   : > { %906 = vrot.lane.b32.xlu1 %v797_v40, %s2127_s12  ;;  %1048 = vrot.lane.b32.xlu0 %v799_v46, %s2126_s11  ;;  %v2372_v33 = vsel %vm653_vm0, %v663_v30, %v664_v31  ;;  %v764_v34 = vrot.slane %v2369_v32, 1  ;;  %v725_v37 = vsel %vm653_vm0, %v664_v31, 0.0  ;;  %v805_v38 = vrot.slane %v2369_v32, 2 }
  0x32   : > { %v765_v35 = vrot.slane %v2372_v33, 1  ;;  %v806_v39 = vrot.slane %v2372_v33, 2  ;;  %v767_v40 = vrot.slane %v725_v37, 1  ;;  %v808_v49 = vrot.slane %v725_v37, 2 }
  0x33   : > { %v597_v15 = vmax.f32 %v581_v12, 0.0  ;;  %v670_v23 = vrot.slane %v598_v16, 7 }
  0x34   : > { %v766_v36 = vsel %vm748_vm1, %v764_v34, %v765_v35  ;;  %v807_v43 = vsel %vm789_vm2, %v805_v38, %v806_v39  ;;  %v768_v44 = vsel %vm748_vm1, %v765_v35, %v767_v40  ;;  %v809_v52 = vsel %vm789_vm2, %v806_v39, %v808_v49 }
  0x35   : > { %902 = vrot.lane.b32.xlu1 %v792_v55, %s2127_s12  ;;  %854 = vrot.lane.b32.xlu0 %v751_v56, %s2125_s9  ;;  %v666_v55 = vrot.slane %v595_v53, 7  ;;  %v727_v37 = vsel %vm653_vm0, %v670_v23, 0.0 }
  0x36   : > { %v777_v40 = vrot.slane %v727_v37, 1  ;;  %v818_v53 = vrot.slane %v727_v37, 2 }
  0x37   : > { %v2410_v57 = vsel %vm653_vm0, 0.0, %v666_v55 }
  0x38   : > { %v769_v59 = vrot.slane %v2410_v57, 1  ;;  %v810_v2 = vrot.slane %v2410_v57, 2 }
  0x39   : > { %904 = vrot.lane.b32.xlu1 %v794_v60, %s2127_s12  ;;  %856 = vrot.lane.b32.xlu0 %v753_v61, %s2125_s9 }
  0x3d   : > { %954 = vrot.lane.b32.xlu1 %v2266_v22, %s2122_s14  ;;  %908 = vrot.lane.b32.xlu0 %v799_v46, %s2127_s12  ;;  %v557_v46 = vmul.f32 %v2221_v0, %v534_v42 }
  0x3f   : > { %v580_v51 = vadd.f32 %v2233_v1, %v557_v46 }
  0x41   : > { %1142 = vrot.lane.b32.xlu1 %v761_v8, %s2128_s20  ;;  %1096 = vrot.lane.b32.xlu0 %v2313_v62, %s2123_s23  ;;  %v596_v54 = vmax.f32 %v580_v51, 0.0 }
  0x43   : > { %v667_v56 = vrot.slane %v596_v54, 7 }
  0x45   : > { %1002 = vrot.lane.b32.xlu1 %v761_v8, %s2124_s25  ;;  %956 = vrot.lane.b32.xlu0 %v2313_v62, %s2122_s14  ;;  %v2413_v58 = vsel %vm653_vm0, %v666_v55, %v667_v56  ;;  %v726_v63 = vsel %vm653_vm0, %v667_v56, 0.0 }
  0x46   : > { %v770_v60 = vrot.slane %v2413_v58, 1  ;;  %v811_v3 = vrot.slane %v2413_v58, 2  ;;  %v772_v4 = vrot.slane %v726_v63, 1  ;;  %v813_v11 = vrot.slane %v726_v63, 2 }
  0x48   : > { %v771_v61 = vsel %vm748_vm1, %v769_v59, %v770_v60  ;;  %v812_v7 = vsel %vm789_vm2, %v810_v2, %v811_v3  ;;  %v814_v14 = vsel %vm789_vm2, %v811_v3, %v813_v11 }
  0x49   : > { %1190 = vrot.lane.b32.xlu1 %v802_v19, %s2129_s17  ;;  %1144 = vrot.lane.b32.xlu0 %v763_v20, %s2128_s20 }
  0x4d   : > { %1004 = vrot.lane.b32.xlu1 %v763_v20, %s2124_s25  ;;  %862 = vrot.lane.b32.xlu0 %v761_v8, %s2125_s9  ;;  %v773_v8 = vsel %vm748_vm1, %v770_v60, %v772_v4 }
  0x51   : > { %1192 = vrot.lane.b32.xlu1 %v804_v27, %s2129_s17  ;;  %1050 = vrot.lane.b32.xlu0 %v802_v19, %s2126_s11 }
  0x55   : > { %910 = vrot.lane.b32.xlu1 %v802_v19, %s2127_s12  ;;  %864 = vrot.lane.b32.xlu0 %v763_v20, %s2125_s9  ;;  %v669_v19 = vrot.slane %v597_v15, 7 }
  0x57   : > { %v2453_v24 = vsel %vm653_vm0, 0.0, %v669_v19 }
  0x58   : > { %v774_v28 = vrot.slane %v2453_v24, 1  ;;  %v815_v38 = vrot.slane %v2453_v24, 2 }
  0x59   : > { %1098 = vrot.lane.b32.xlu1 %v2369_v32, %s2123_s23  ;;  %1052 = vrot.lane.b32.xlu0 %v804_v27, %s2126_s11 }
  0x5d   : > { %958 = vrot.lane.b32.xlu1 %v2369_v32, %s2122_s14  ;;  %912 = vrot.lane.b32.xlu0 %v804_v27, %s2127_s12  ;;  %v2458_v27 = vsel %vm653_vm0, %v669_v19, %v670_v23 }
  0x5e   : > { %v775_v29 = vrot.slane %v2458_v27, 1  ;;  %v816_v39 = vrot.slane %v2458_v27, 2 }
  0x60   : > { %v776_v34 = vsel %vm748_vm1, %v774_v28, %v775_v29  ;;  %v817_v45 = vsel %vm789_vm2, %v815_v38, %v816_v39  ;;  %v778_v46 = vsel %vm748_vm1, %v775_v29, %v777_v40  ;;  %v819_v63 = vsel %vm789_vm2, %v816_v39, %v818_v53 }
  0x61   : > { %1146 = vrot.lane.b32.xlu1 %v766_v36, %s2128_s20  ;;  %1100 = vrot.lane.b32.xlu0 %v2372_v33, %s2123_s23 }
  0x65   : > { %1006 = vrot.lane.b32.xlu1 %v766_v36, %s2124_s25  ;;  %960 = vrot.lane.b32.xlu0 %v2372_v33, %s2122_s14 }
  0x69   : > { %1194 = vrot.lane.b32.xlu1 %v807_v43, %s2129_s17  ;;  %1148 = vrot.lane.b32.xlu0 %v768_v44, %s2128_s20 }
  0x6d   : > { %1008 = vrot.lane.b32.xlu1 %v768_v44, %s2124_s25  ;;  %866 = vrot.lane.b32.xlu0 %v766_v36, %s2125_s9 }
  0x71   : > { %1196 = vrot.lane.b32.xlu1 %v809_v52, %s2129_s17  ;;  %1054 = vrot.lane.b32.xlu0 %v807_v43, %s2126_s11 }
  0x75   : > { %914 = vrot.lane.b32.xlu1 %v807_v43, %s2127_s12  ;;  %868 = vrot.lane.b32.xlu0 %v768_v44, %s2125_s9  ;;  %v537_v43 = vld [vmem:[%s2228_s22 + $0x50] sm:$0xff]  ;;  %v538_v44 = vld [vmem:[%s2228_s22 + $0x58] sm:$0xff] }
  0x76   : > { %v560_v49 = vmul.f32 %v2221_v0, %v537_v43 }
  0x78   : > { %v583_v54 = vadd.f32 %v2233_v1, %v560_v49 }
  0x79   : > { %1102 = vrot.lane.b32.xlu1 %v2410_v57, %s2123_s23  ;;  %1056 = vrot.lane.b32.xlu0 %v809_v52, %s2126_s11 }
  0x7a   : > { %v599_v2 = vmax.f32 %v583_v54, 0.0 }
  0x7c   : > { %v672_v6 = vrot.slane %v599_v2, 7 }
  0x7d   : > { %962 = vrot.lane.b32.xlu1 %v2410_v57, %s2122_s14  ;;  %916 = vrot.lane.b32.xlu0 %v809_v52, %s2127_s12  ;;  %v561_v52 = vmul.f32 %v2221_v0, %v538_v44 }
  0x7e   : > { %v2517_v12 = vsel %vm653_vm0, 0.0, %v672_v6 }
  0x7f   : > { %v584_v60 = vadd.f32 %v2233_v1, %v561_v52  ;;  %v820_v43 = vrot.slane %v2517_v12, 2 }
  0x81   : > { %1150 = vrot.lane.b32.xlu1 %v771_v61, %s2128_s20  ;;  %1104 = vrot.lane.b32.xlu0 %v2413_v58, %s2123_s23 }
  0x85   : > { %1010 = vrot.lane.b32.xlu1 %v771_v61, %s2124_s25  ;;  %964 = vrot.lane.b32.xlu0 %v2413_v58, %s2122_s14 }
  0x89   : > { %1198 = vrot.lane.b32.xlu1 %v812_v7, %s2129_s17  ;;  %1152 = vrot.lane.b32.xlu0 %v773_v8, %s2128_s20 }
  0x8d   : > { %1012 = vrot.lane.b32.xlu1 %v773_v8, %s2124_s25  ;;  %870 = vrot.lane.b32.xlu0 %v771_v61, %s2125_s9 }
  0x91   : > { %1200 = vrot.lane.b32.xlu1 %v814_v14, %s2129_s17  ;;  %1058 = vrot.lane.b32.xlu0 %v812_v7, %s2126_s11 }
  0x93   : > { %v951_v20 = vpop.permute.xlu0 %950  ;;  %v2448_v21 = vpop.permute.xlu1 %952 }
  0x95   : > { %918 = vrot.lane.b32.xlu1 %v812_v7, %s2127_s12  ;;  %872 = vrot.lane.b32.xlu0 %v773_v8, %s2125_s9 }
  0x97   : > { %v2455_v25 = vpop.permute.xlu1 %1094  ;;  %v999_v26 = vpop.permute.xlu0 %998 }
  0x99   : > { %1106 = vrot.lane.b32.xlu1 %v2453_v24, %s2123_s23  ;;  %1060 = vrot.lane.b32.xlu0 %v814_v14, %s2126_s11 }
  0x9b   : > { %v2465_v30 = vpop.permute.xlu1 %858  ;;  %v2467_v31 = vpop.permute.xlu0 %1000 }
  0x9d   : > { %966 = vrot.lane.b32.xlu1 %v2453_v24, %s2122_s14  ;;  %920 = vrot.lane.b32.xlu0 %v814_v14, %s2127_s12 }
  0x9f   : > { %v1047_v35 = vpop.permute.xlu1 %1046  ;;  %v2473_v36 = vpop.permute.xlu0 %860 }
  0xa1   : > { %1154 = vrot.lane.b32.xlu1 %v776_v34, %s2128_s20  ;;  %1108 = vrot.lane.b32.xlu0 %v2458_v27, %s2123_s23 }
  0xa3   : > { %v2481_v41 = vpop.permute.xlu1 %906  ;;  %v2483_v42 = vpop.permute.xlu0 %1048 }
  0xa5   : > { %1014 = vrot.lane.b32.xlu1 %v776_v34, %s2124_s25  ;;  %968 = vrot.lane.b32.xlu0 %v2458_v27, %s2122_s14 }
  0xa7   : > { %v903_v50 = vpop.permute.xlu1 %902  ;;  %v855_v51 = vpop.permute.xlu0 %854 }
  0xa8   : > { %v1239_v55 = vsel %vm1238_vm5, %v2296_v48, %v855_v51  ;;  %v600_v48 = vmax.f32 %v584_v60, 0.0  ;;  %v539_v51 = vld [vmem:[%s2228_s22 + $0x60] sm:$0xff] }
  0xa9   : > { %1202 = vrot.lane.b32.xlu1 %v817_v45, %s2129_s17  ;;  %1156 = vrot.lane.b32.xlu0 %v778_v46, %s2128_s20  ;;  %v1256_v61 = vsel %vm1255_vm6, %v1239_v55, %v903_v50  ;;  %v562_v55 = vmul.f32 %v2221_v0, %v539_v51 }
  0xaa   : > { %v1273_v5 = vsel %vm1272_vm7, %v1256_v61, %v951_v20  ;;  %v673_v9 = vrot.slane %v600_v48, 7  ;;  %v779_v20 = vrot.slane %v2517_v12, 1 }
  0xab   : > { %v905_v56 = vpop.permute.xlu1 %904  ;;  %v857_v59 = vpop.permute.xlu0 %856  ;;  %v1290_v10 = vsel %vm1289_vm8, %v1273_v5, %v999_v26 }
  0xac   : > { %v1240_v11 = vsel %vm1238_vm5, %v2293_v47, %v857_v59  ;;  %v1307_v13 = vsel %vm1306_vm9, %v1290_v10, %v1047_v35  ;;  %v2525_v16 = vsel %vm653_vm0, %v672_v6, %v673_v9  ;;  %v728_v39 = vsel %vm653_vm0, %v673_v9, 0.0 }
  0xad   : > { %1016 = vrot.lane.b32.xlu1 %v778_v46, %s2124_s25  ;;  %874 = vrot.lane.b32.xlu0 %v776_v34, %s2125_s9  ;;  %v1257_v19 = vsel %vm1255_vm6, %v1240_v11, %v905_v56  ;;  %v1324_v47 = vsel %vm1323_vm10, %v1307_v13, %v2455_v25  ;;  %v780_v23 = vrot.slane %v2525_v16, 1  ;;  %v821_v44 = vrot.slane %v2525_v16, 2 }
  0xae   : > { %v1274_v26 = vsel %vm1272_vm7, %v1257_v19, %v2448_v21  ;;  %v823_v61 = vrot.slane %v728_v39, 2 }
  0xaf   : > { %v2504_v3 = vpop.permute.xlu1 %954  ;;  %v2506_v4 = vpop.permute.xlu0 %908  ;;  %v1291_v25 = vsel %vm1289_vm8, %v1274_v26, %v2467_v31  ;;  %v781_v21 = vsel %vm748_vm1, %v779_v20, %v780_v23  ;;  %v822_v53 = vsel %vm789_vm2, %v820_v43, %v821_v44  ;;  %v1241_v20 = vsel %vm1238_vm5, %v2251_v17, %v2465_v30 }
  0xb0   : > { %v1308_v40 = vsel %vm1306_vm9, %v1291_v25, %v2483_v42  ;;  %v540_v42 = vld [vmem:[%s2228_s22 + $0x68] sm:$0xff]  ;;  %v824_v6 = vsel %vm789_vm2, %v821_v44, %v823_v61 }
  0xb1   : > { %1204 = vrot.lane.b32.xlu1 %v819_v63, %s2129_s17  ;;  %1062 = vrot.lane.b32.xlu0 %v817_v45, %s2126_s11  ;;  %v563_v60 = vmul.f32 %v2221_v0, %v540_v42 }
  0xb3   : > { %v1143_v7 = vpop.permute.xlu1 %1142  ;;  %v1097_v8 = vpop.permute.xlu0 %1096  ;;  %v586_v5 = vadd.f32 %v2233_v1, %v563_v60  ;;  %v542_v60 = vld [vmem:[%s2228_s22 + $0x78] sm:$0xff] }
  0xb4   : > { %v1341_v28 = vsel %vm1340_vm11, %v1324_v47, %v1143_v7  ;;  %v1325_v31 = vsel %vm1323_vm10, %v1308_v40, %v1097_v8 }
  0xb5   : > { %922 = vrot.lane.b32.xlu1 %v817_v45, %s2127_s12  ;;  %876 = vrot.lane.b32.xlu0 %v778_v46, %s2125_s9  ;;  %v782_v45 = vrot.slane %v728_v39, 1  ;;  %v602_v10 = vmax.f32 %v586_v5, 0.0 }
  0xb7   : > { %v2520_v14 = vpop.permute.xlu1 %1002  ;;  %v2522_v15 = vpop.permute.xlu0 %956  ;;  %v783_v54 = vsel %vm748_vm1, %v780_v23, %v782_v45  ;;  %v676_v47 = vrot.slane %v602_v10, 7  ;;  %v1258_v23 = vsel %vm1255_vm6, %v1241_v20, %v2481_v41 }
  0xb9   : > { %1110 = vrot.lane.b32.xlu1 %v2517_v12, %s2123_s23  ;;  %1064 = vrot.lane.b32.xlu0 %v819_v63, %s2126_s11 }
  0xbb   : > { %v1191_v29 = vpop.permute.xlu1 %1190  ;;  %v1145_v34 = vpop.permute.xlu0 %1144 }
  0xbc   : > { %v1358_v35 = vsel %vm1357_vm12, %v1341_v28, %v1191_v29  ;;  %v1342_v46 = vsel %vm1340_vm11, %v1325_v31, %v1145_v34  ;;  %v1275_v28 = vsel %vm1272_vm7, %v1258_v23, %v2504_v3  ;;  %v1242_v31 = vsel %vm1238_vm5, %v2254_v18, %v2473_v36 }
  0xbd   : > { %970 = vrot.lane.b32.xlu1 %v2517_v12, %s2122_s14  ;;  %924 = vrot.lane.b32.xlu0 %v819_v63, %s2127_s12  ;;  %v585_v63 = vadd.f32 %v2233_v1, %v562_v55  ;;  %v1292_v17 = vsel %vm1289_vm8, %v1275_v28, %v2520_v14  ;;  %v1259_v43 = vsel %vm1255_vm6, %v1242_v31, %v2506_v4  ;;  %v729_v36 = vsel %vm653_vm0, %v676_v47, 0.0 }
  0xbe   : > { %1996 = vmatprep.mubr.msk.f32.mxu0 %vm1379_vm13, %v1358_v35  ;;  %v1276_v45 = vsel %vm1272_vm7, %v1259_v43, %v2522_v15 }
  0xbf   : > { %v2546_v37 = vpop.permute.xlu1 %1004  ;;  %v2548_v38 = vpop.permute.xlu0 %862  ;;  %v601_v7 = vmax.f32 %v585_v63, 0.0 }
  0xc1   : > { %1158 = vrot.lane.b32.xlu1 %v781_v21, %s2128_s20  ;;  %1112 = vrot.lane.b32.xlu0 %v2525_v16, %s2123_s23  ;;  %v675_v11 = vrot.slane %v601_v7, 7  ;;  %v828_v7 = vrot.slane %v729_v36, 2 }
  0xc3   : > { %v1193_v49 = vpop.permute.xlu1 %1192  ;;  %v1051_v50 = vpop.permute.xlu0 %1050  ;;  %v2596_v26 = vsel %vm653_vm0, 0.0, %v675_v11  ;;  %v2605_v35 = vsel %vm653_vm0, %v675_v11, %v676_v47 }
  0xc4   : > { %v1359_v52 = vsel %vm1357_vm12, %v1342_v46, %v1193_v49  ;;  %v1309_v30 = vsel %vm1306_vm9, %v1292_v17, %v1051_v50  ;;  %v784_v3 = vrot.slane %v2596_v26, 1  ;;  %v785_v25 = vrot.slane %v2605_v35, 1 }
  0xc5   : > { %1018 = vrot.lane.b32.xlu1 %v781_v21, %s2124_s25  ;;  %972 = vrot.lane.b32.xlu0 %v2525_v16, %s2122_s14  ;;  %v1293_v49 = vsel %vm1289_vm8, %v1276_v45, %v2546_v37  ;;  %v825_v50 = vrot.slane %v2596_v26, 2  ;;  %v826_v51 = vrot.slane %v2605_v35, 2 }
  0xc6   : > { %1997 = vmatmul.mubr.msk.f32.vlgmr.msra.gmra.mrb[0].mxu0 %vm1379_vm13, %v1359_v52  ;;  %v786_v44 = vsel %vm748_vm1, %v784_v3, %v785_v25  ;;  %v787_v52 = vrot.slane %v729_v36, 1 }
  0xc7   : > { %v2570_v56 = vpop.permute.xlu1 %910  ;;  %v2572_v59 = vpop.permute.xlu0 %864  ;;  %v827_v61 = vsel %vm789_vm2, %v825_v50, %v826_v51  ;;  %v829_v47 = vsel %vm789_vm2, %v826_v51, %v828_v7 }
  0xc8   : > { %v788_v63 = vsel %vm748_vm1, %v785_v25, %v787_v52 }
  0xc9   : > { %1206 = vrot.lane.b32.xlu1 %v822_v53, %s2129_s17  ;;  %1160 = vrot.lane.b32.xlu0 %v783_v54, %s2128_s20 }
  0xcb   : > { %v1099_v2 = vpop.permute.xlu1 %1098  ;;  %v1053_v48 = vpop.permute.xlu0 %1052 }
  0xcc   : > { %v1326_v41 = vsel %vm1323_vm10, %v1309_v30, %v1099_v2  ;;  %v1310_v4 = vsel %vm1306_vm9, %v1293_v49, %v1053_v48 }
  0xcd   : > { %1020 = vrot.lane.b32.xlu1 %v783_v54, %s2124_s25  ;;  %878 = vrot.lane.b32.xlu0 %v781_v21, %s2125_s9 }
  0xcf   : > { %v2582_v8 = vpop.permute.xlu1 %958  ;;  %v2584_v9 = vpop.permute.xlu0 %912 }
  0xd1   : > { %1208 = vrot.lane.b32.xlu1 %v824_v6, %s2129_s17  ;;  %1066 = vrot.lane.b32.xlu0 %v822_v53, %s2126_s11 }
  0xd3   : > { %v1147_v13 = vpop.permute.xlu1 %1146  ;;  %v1101_v19 = vpop.permute.xlu0 %1100 }
  0xd4   : > { %v1343_v21 = vsel %vm1340_vm11, %v1326_v41, %v1147_v13  ;;  %v1327_v15 = vsel %vm1323_vm10, %v1310_v4, %v1101_v19 }
  0xd5   : > { %926 = vrot.lane.b32.xlu1 %v822_v53, %s2127_s12  ;;  %880 = vrot.lane.b32.xlu0 %v783_v54, %s2125_s9  ;;  %v541_v54 = vld [vmem:[%s2228_s22 + $0x70] sm:$0xff]  ;;  %s1925_s22 = sshll.u32 %s3008_s13, 1 }
  0xd6   : > { %v564_v2 = vmul.f32 %v2221_v0, %v541_v54  ;;  %s494_s18 = sadd.s32 %s1925_s22, %s2207_s10 }
  0xd7   : > { %v2600_v29 = vpop.permute.xlu1 %1006  ;;  %v2602_v34 = vpop.permute.xlu0 %960  ;;  %s1927_s19 = sshll.u32 %s494_s18, 3 }
  0xd8   : > { %v587_v10 = vadd.f32 %v2233_v1, %v564_v2  ;;  %s496_s13 = scalar_lea.vmem %s2980_s2, %s1927_s19 }
  0xd9   : > { %1114 = vrot.lane.b32.xlu1 %v2596_v26, %s2123_s23  ;;  %1068 = vrot.lane.b32.xlu0 %v824_v6, %s2126_s11  ;;  %v621_v45 = vld [vmem:[%s496_s13 + $0x8] sm:$0xff] }
  0xda   : > { %v603_v20 = vmax.f32 %v587_v10, 0.0  ;;  %v623_v52 = vmul.f32 %v2221_v0, %v621_v45 }
  0xdb   : > { %v1195_v39 = vpop.permute.xlu1 %1194  ;;  %v1149_v40 = vpop.permute.xlu0 %1148 }
  0xdc   : > { %v1360_v14 = vsel %vm1357_vm12, %v1343_v21, %v1195_v39  ;;  %v1344_v37 = vsel %vm1340_vm11, %v1327_v15, %v1149_v40  ;;  %v678_v30 = vrot.slane %v603_v20, 7  ;;  %v1243_v21 = vsel %vm1238_vm5, %v2266_v22, %v2548_v38 }
  0xdd   : > { %974 = vrot.lane.b32.xlu1 %v2596_v26, %s2122_s14  ;;  %928 = vrot.lane.b32.xlu0 %v824_v6, %s2127_s12  ;;  %v565_v6 = vmul.f32 %v2221_v0, %v542_v60  ;;  %v1260_v39 = vsel %vm1255_vm6, %v1243_v21, %v2570_v56 }
  0xde   : > { %1999 = vmatprep.mubr.msk.f32.mxu0 %vm1379_vm13, %v1360_v14  ;;  %v720_v40 = vsel %vm653_vm0, 0.0, %v678_v30  ;;  %v1277_v14 = vsel %vm1272_vm7, %v1260_v39, %v2582_v8 }
  0xdf   : > { %v2631_v46 = vpop.permute.xlu1 %1008  ;;  %v2633_v18 = vpop.permute.xlu0 %866  ;;  %v588_v19 = vadd.f32 %v2233_v1, %v565_v6  ;;  %v1294_v56 = vsel %vm1289_vm8, %v1277_v14, %v2600_v29  ;;  %v832_v36 = vrot.slane %v720_v40, 1 }
  0xe1   : > { %1162 = vrot.lane.b32.xlu1 %v786_v44, %s2128_s20  ;;  %1116 = vrot.lane.b32.xlu0 %v2605_v35, %s2123_s23  ;;  %v604_v17 = vmax.f32 %v588_v19, 0.0 }
  0xe3   : > { %v1197_v42 = vpop.permute.xlu1 %1196  ;;  %v1055_v53 = vpop.permute.xlu0 %1054  ;;  %v679_v25 = vrot.slane %v604_v17, 7 }
  0xe4   : > { %v1361_v55 = vsel %vm1357_vm12, %v1344_v37, %v1197_v42  ;;  %v1311_v43 = vsel %vm1306_vm9, %v1294_v56, %v1055_v53  ;;  %v1244_v37 = vsel %vm1238_vm5, %v2313_v62, %v2572_v59 }
  0xe5   : > { %1022 = vrot.lane.b32.xlu1 %v786_v44, %s2124_s25  ;;  %976 = vrot.lane.b32.xlu0 %v2605_v35, %s2122_s14  ;;  %v2701_v38 = vsel %vm653_vm0, %v678_v30, %v679_v25  ;;  %v1261_v42 = vsel %vm1255_vm6, %v1244_v37, %v2584_v9  ;;  %v730_v62 = vsel %vm653_vm0, %v679_v25, 0.0  ;;  %v625_v9 = vadd.f32 %v2233_v1, %v623_v52 }
  0xe6   : > { %2000 = vmatmul.mubr.msk.f32.gmra.mrb[2].mxu0 %vm1379_vm13, %v1361_v55  ;;  %v833_v49 = vrot.slane %v2701_v38, 1  ;;  %v1278_v54 = vsel %vm1272_vm7, %v1261_v42, %v2602_v34  ;;  %v838_v2 = vrot.slane %v2701_v38, 2  ;;  %v835_v6 = vrot.slane %v730_v62, 1 }
  0xe7   : > { %v2662_v48 = vpop.permute.xlu1 %914  ;;  %v2664_v5 = vpop.permute.xlu0 %868  ;;  %v1295_v59 = vsel %vm1289_vm8, %v1278_v54, %v2631_v46  ;;  %v840_v25 = vrot.slane %v730_v62, 2 }
  0xe8   : > { %v834_v53 = vsel %vm748_vm1, %v832_v36, %v833_v49  ;;  %v836_v20 = vsel %vm748_vm1, %v833_v49, %v835_v6 }
  0xe9   : > { %1210 = vrot.lane.b32.xlu1 %v827_v61, %s2129_s17  ;;  %1164 = vrot.lane.b32.xlu0 %v788_v63, %s2128_s20 }
  0xeb   : > { %v1103_v11 = vpop.permute.xlu1 %1102  ;;  %v1057_v13 = vpop.permute.xlu0 %1056 }
  0xec   : > { %v1328_v8 = vsel %vm1323_vm10, %v1311_v43, %v1103_v11 }
  0xed   : > { %1024 = vrot.lane.b32.xlu1 %v788_v63, %s2124_s25  ;;  %882 = vrot.lane.b32.xlu0 %v786_v44, %s2125_s9  ;;  %v620_v44 = vld [vmem:[%s496_s13] sm:$0xff] }
  0xee   : > { %v622_v51 = vmul.f32 %v2221_v0, %v620_v44 }
  0xef   : > { %v2676_v23 = vpop.permute.xlu1 %962  ;;  %v2678_v28 = vpop.permute.xlu0 %916 }
  0xf0   : > { %v624_v60 = vadd.f32 %v2233_v1, %v622_v51 }
  0xf1   : > { %1212 = vrot.lane.b32.xlu1 %v829_v47, %s2129_s17  ;;  %1070 = vrot.lane.b32.xlu0 %v827_v61, %s2126_s11 }
  0xf2   : > { %v626_v19 = vmax.f32 %v624_v60, 0.0 }
  0xf3   : > { %v1151_v41 = vpop.permute.xlu1 %1150  ;;  %v1105_v3 = vpop.permute.xlu0 %1104 }
  0xf4   : > { %v1345_v4 = vsel %vm1340_vm11, %v1328_v8, %v1151_v41 }
  0xf5   : > { %930 = vrot.lane.b32.xlu1 %v827_v61, %s2127_s12  ;;  %884 = vrot.lane.b32.xlu0 %v788_v63, %s2125_s9  ;;  %s628_s9 = scalar_select %p619_p11, 1, 0  ;;  %v1312_v61 = vsel %vm1306_vm9, %v1295_v59, %v1057_v13  ;;  %v837_v63 = vrot.slane %v720_v40, 2  ;;  %v627_v13 = vmax.f32 %v625_v9, 0.0 }
  0xf6   : > { %v1329_v34 = vsel %vm1323_vm10, %v1312_v61, %v1105_v3 }
  0xf7   : > { %v2696_v31 = vpop.permute.xlu1 %1010  ;;  %v2698_v22 = vpop.permute.xlu0 %964  ;;  %v629_v7 = vstv %s628_s9 }
  0xf8   : > { %vm630_vm14 = vcmp.eq.s32.totalorder %v629_v7, 1 }
  0xf9   : > { %1118 = vrot.lane.b32.xlu1 %v720_v40, %s2123_s23  ;;  %1072 = vrot.lane.b32.xlu0 %v829_v47, %s2126_s11  ;;  %v631_v41 = vsel %vm630_vm14, %v626_v19, 0.0  ;;  %v632_v3 = vsel %vm630_vm14, %v627_v13, 0.0 }
  0xfa   : > { %v682_v14 = vrot.slane %v632_v3, 7 }
  0xfb   : > { %v1199_v15 = vpop.permute.xlu1 %1198  ;;  %v1153_v50 = vpop.permute.xlu0 %1152 }
  0xfc   : > { %v1362_v29 = vsel %vm1357_vm12, %v1345_v4, %v1199_v15  ;;  %v1346_v46 = vsel %vm1340_vm11, %v1329_v34, %v1153_v50  ;;  %v731_v8 = vsel %vm653_vm0, %v682_v14, 0.0 }
  0xfd   : > { %978 = vrot.lane.b32.xlu1 %v720_v40, %s2122_s14  ;;  %932 = vrot.lane.b32.xlu0 %v829_v47, %s2127_s12  ;;  %v839_v47 = vsel %vm789_vm2, %v837_v63, %v838_v2  ;;  %v681_v40 = vrot.slane %v631_v41, 7  ;;  %v847_v4 = vrot.slane %v731_v8, 1  ;;  %v852_v54 = vrot.slane %v731_v8, 2 }
  0xfe   : > { %2002 = vmatprep.mubr.msk.f32.mxu0 %vm1379_vm13, %v1362_v29  ;;  %v1245_v29 = vsel %vm1238_vm5, %v2369_v32, %v2633_v18 }
  0xff   : > { %v2726_v0 = vpop.permute.xlu1 %1012  ;;  %v2728_v55 = vpop.permute.xlu0 %870  ;;  %v683_v44 = vsel %vm653_vm0, %v681_v40, %v682_v14  ;;  %v721_v45 = vsel %vm653_vm0, 0.0, %v681_v40  ;;  %v1262_v37 = vsel %vm1255_vm6, %v1245_v29, %v2662_v48 }
 0x100   : > { %v845_v36 = vrot.slane %v683_v44, 1  ;;  %v844_v49 = vrot.slane %v721_v45, 1  ;;  %v850_v51 = vrot.slane %v683_v44, 2  ;;  %v849_v52 = vrot.slane %v721_v45, 2 }
 0x101   : > { %1166 = vrot.lane.b32.xlu1 %v834_v53, %s2128_s20  ;;  %1120 = vrot.lane.b32.xlu0 %v2701_v38, %s2123_s23  ;;  %v1279_v62 = vsel %vm1272_vm7, %v1262_v37, %v2676_v23 }
 0x102   : > { %v848_v42 = vsel %vm748_vm1, %v845_v36, %v847_v4  ;;  %v1296_v32 = vsel %vm1289_vm8, %v1279_v62, %v2696_v31  ;;  %v853_v9 = vsel %vm789_vm2, %v850_v51, %v852_v54  ;;  %v851_v61 = vsel %vm789_vm2, %v849_v52, %v850_v51 }
 0x103   : > { %v1201_v10 = vpop.permute.xlu1 %1200  ;;  %v1059_v11 = vpop.permute.xlu0 %1058  ;;  %v1246_v31 = vsel %vm1238_vm5, %v2372_v33, %v2664_v5 }
 0x104   : > { %v1363_v1 = vsel %vm1357_vm12, %v1346_v46, %v1201_v10  ;;  %v1313_v18 = vsel %vm1306_vm9, %v1296_v32, %v1059_v11  ;;  %v1263_v6 = vsel %vm1255_vm6, %v1246_v31, %v2678_v28 }
 0x105   : > { %1026 = vrot.lane.b32.xlu1 %v834_v53, %s2124_s25  ;;  %980 = vrot.lane.b32.xlu0 %v2701_v38, %s2122_s14  ;;  %v841_v38 = vsel %vm789_vm2, %v838_v2, %v840_v25  ;;  %v846_v53 = vsel %vm748_vm1, %v844_v49, %v845_v36  ;;  %v1280_v7 = vsel %vm1272_vm7, %v1263_v6, %v2698_v22  ;;  %s2988_s14 = sshll.u32 %s2215_s16, 3 }
 0x106   : > { %2003 = vmatmul.mubr.msk.f32.gmra.mrb[4].mxu0 %vm1379_vm13, %v1363_v1  ;;  %v1297_v11 = vsel %vm1289_vm8, %v1280_v7, %v2726_v0 }
 0x107   : > { %v2749_v17 = vpop.permute.xlu1 %918  ;;  %v2751_v30 = vpop.permute.xlu0 %872 }
 0x109   : > { %1214 = vrot.lane.b32.xlu1 %v839_v47, %s2129_s17  ;;  %1168 = vrot.lane.b32.xlu0 %v836_v20, %s2128_s20 }
 0x10b   : > { %v1107_v21 = vpop.permute.xlu1 %1106  ;;  %v1061_v39 = vpop.permute.xlu0 %1060 }
 0x10c   : > { %v1330_v48 = vsel %vm1323_vm10, %v1313_v18, %v1107_v21  ;;  %v1314_v1 = vsel %vm1306_vm9, %v1297_v11, %v1061_v39  ;;  %v1247_v39 = vsel %vm1238_vm5, %v2410_v57, %v2728_v55  ;;  %v1248_v57 = vsel %vm1238_vm5, %v2413_v58, %v2751_v30 }
 0x10d   : > { %1074 = vrot.lane.b32.xlu1 %v839_v47, %s2126_s11  ;;  %1028 = vrot.lane.b32.xlu0 %v836_v20, %s2124_s25  ;;  %v1264_v40 = vsel %vm1255_vm6, %v1247_v39, %v2749_v17 }
 0x10f   : > { %v967_v56 = vpop.permute.xlu1 %966  ;;  %v2758_v43 = vpop.permute.xlu0 %920 }
 0x110   : > { %v1281_v14 = vsel %vm1272_vm7, %v1264_v40, %v967_v56  ;;  %v1265_v55 = vsel %vm1255_vm6, %v1248_v57, %v2758_v43 }
 0x111   : > { %1076 = vrot.lane.b32.xlu1 %v841_v38, %s2126_s11  ;;  %1216 = vrot.lane.b32.xlu0 %v841_v38, %s2129_s17  ;;  %s2892_s11 = scalar_lea.vmem %s2984_s6, %s2988_s14 }
 0x113   : > { %v1155_v15 = vpop.permute.xlu1 %1154  ;;  %v1109_v50 = vpop.permute.xlu0 %1108 }
 0x114   : > { %v1347_v63 = vsel %vm1340_vm11, %v1330_v48, %v1155_v15  ;;  %v1331_v33 = vsel %vm1323_vm10, %v1314_v1, %v1109_v50 }
 0x115   : > { %1124 = vrot.lane.b32.xlu1 %v683_v44, %s2123_s23  ;;  %1122 = vrot.lane.b32.xlu0 %v721_v45, %s2123_s23 }
 0x117   : > { %v1015_v59 = vpop.permute.xlu1 %1014  ;;  %v969_v60 = vpop.permute.xlu0 %968 }
 0x118   : > { %v1298_v45 = vsel %vm1289_vm8, %v1281_v14, %v1015_v59  ;;  %v1282_v17 = vsel %vm1272_vm7, %v1265_v55, %v969_v60 }
 0x119   : > { %1172 = vrot.lane.b32.xlu1 %v848_v42, %s2128_s20  ;;  %1170 = vrot.lane.b32.xlu0 %v846_v53, %s2128_s20 }
 0x11b   : > { %v1203_v23 = vpop.permute.xlu1 %1202  ;;  %v1157_v34 = vpop.permute.xlu0 %1156 }
 0x11c   : > { %v1364_v2 = vsel %vm1357_vm12, %v1347_v63, %v1203_v23  ;;  %v1348_v5 = vsel %vm1340_vm11, %v1331_v33, %v1157_v34 }
 0x11d   : > { %1220 = vrot.lane.b32.xlu1 %v853_v9, %s2129_s17  ;;  %1218 = vrot.lane.b32.xlu0 %v851_v61, %s2129_s17 }
 0x11e   : > { %2005 = vmatprep.mubr.msk.f32.mxu0 %vm1379_vm13, %v1364_v2 }
 0x11f   : > { %v1017_v46 = vpop.permute.xlu1 %1016  ;;  %v875_v10 = vpop.permute.xlu0 %874 }
 0x120   : > { %v1299_v51 = vsel %vm1289_vm8, %v1282_v17, %v1017_v46  ;;  %v1249_v9 = vsel %vm1238_vm5, %v2453_v24, %v875_v10 }
 0x123   : > { %v1205_v19 = vpop.permute.xlu1 %1204  ;;  %v1063_v13 = vpop.permute.xlu0 %1062 }
 0x124   : > { %v1365_v28 = vsel %vm1357_vm12, %v1348_v5, %v1205_v19  ;;  %v1315_v8 = vsel %vm1306_vm9, %v1298_v45, %v1063_v13 }
 0x125   : > { %2006 = vmatmul.mubr.msk.f32.gmra.mrb[6].mxu0 %vm1379_vm13, %v1365_v28 }
 0x127   : > { %v923_v47 = vpop.permute.xlu1 %922  ;;  %v877_v20 = vpop.permute.xlu0 %876 }
 0x128   : > { %v1266_v61 = vsel %vm1255_vm6, %v1249_v9, %v923_v47  ;;  %v1250_v24 = vsel %vm1238_vm5, %v2458_v27, %v877_v20 }
 0x12b   : > { %v1111_v22 = vpop.permute.xlu1 %1110  ;;  %v1065_v41 = vpop.permute.xlu0 %1064 }
 0x12c   : > { %v1332_v36 = vsel %vm1323_vm10, %v1315_v8, %v1111_v22  ;;  %v1316_v52 = vsel %vm1306_vm9, %v1299_v51, %v1065_v41 }
 0x12f   : > { %v971_v3 = vpop.permute.xlu1 %970  ;;  %v925_v25 = vpop.permute.xlu0 %924 }
 0x130   : > { %v1283_v63 = vsel %vm1272_vm7, %v1266_v61, %v971_v3  ;;  %v1267_v10 = vsel %vm1255_vm6, %v1250_v24, %v925_v25 }
 0x133   : > { %v1159_v21 = vpop.permute.xlu1 %1158  ;;  %v1113_v0 = vpop.permute.xlu0 %1112 }
 0x134   : > { %v1349_v49 = vsel %vm1340_vm11, %v1332_v36, %v1159_v21  ;;  %v1333_v37 = vsel %vm1323_vm10, %v1316_v52, %v1113_v0 }
 0x137   : > { %v1019_v38 = vpop.permute.xlu1 %1018  ;;  %v973_v44 = vpop.permute.xlu0 %972 }
 0x138   : > { %v1300_v2 = vsel %vm1289_vm8, %v1283_v63, %v1019_v38  ;;  %v1284_v33 = vsel %vm1272_vm7, %v1267_v10, %v973_v44 }
 0x13b   : > { %v1207_v4 = vpop.permute.xlu1 %1206  ;;  %v1161_v15 = vpop.permute.xlu0 %1160 }
 0x13c   : > { %v1366_v50 = vsel %vm1357_vm12, %v1349_v49, %v1207_v4  ;;  %v1350_v42 = vsel %vm1340_vm11, %v1333_v37, %v1161_v15 }
 0x13d   : > { %2008 = vmatprep.mubr.msk.f32.mxu1 %vm1379_vm13, %v1366_v50 }
 0x13f   : > { %v1021_v56 = vpop.permute.xlu1 %1020  ;;  %v879_v29 = vpop.permute.xlu0 %878 }
 0x140   : > { %v1301_v13 = vsel %vm1289_vm8, %v1284_v33, %v1021_v56  ;;  %v1251_v44 = vsel %vm1238_vm5, %v2517_v12, %v879_v29 }
 0x143   : > { %v1209_v53 = vpop.permute.xlu1 %1208  ;;  %v1067_v54 = vpop.permute.xlu0 %1066 }
 0x144   : > { %v1367_v58 = vsel %vm1357_vm12, %v1350_v42, %v1209_v53  ;;  %v1317_v31 = vsel %vm1306_vm9, %v1300_v2, %v1067_v54 }
 0x145   : > { %2009 = vmatmul.mubr.msk.f32.vlgmr.msra.gmra.mrb[0].mxu1 %vm1379_vm13, %v1367_v58 }
 0x147   : > { %v927_v30 = vpop.permute.xlu1 %926  ;;  %v881_v43 = vpop.permute.xlu0 %880 }
 0x148   : > { %v1268_v45 = vsel %vm1255_vm6, %v1251_v44, %v927_v30  ;;  %v1252_v12 = vsel %vm1238_vm5, %v2525_v16, %v881_v43 }
 0x14b   : > { %v1115_v62 = vpop.permute.xlu1 %1114  ;;  %v1069_v59 = vpop.permute.xlu0 %1068 }
 0x14c   : > { %v1334_v6 = vsel %vm1323_vm10, %v1317_v31, %v1115_v62  ;;  %v1318_v28 = vsel %vm1306_vm9, %v1301_v13, %v1069_v59 }
 0x14f   : > { %v975_v60 = vpop.permute.xlu1 %974  ;;  %v929_v32 = vpop.permute.xlu0 %928 }
 0x150   : > { %v1285_v8 = vsel %vm1272_vm7, %v1268_v45, %v975_v60  ;;  %v1269_v29 = vsel %vm1255_vm6, %v1252_v12, %v929_v32 }
 0x153   : > { %v1163_v18 = vpop.permute.xlu1 %1162  ;;  %v1117_v48 = vpop.permute.xlu0 %1116 }
 0x154   : > { %v1351_v7 = vsel %vm1340_vm11, %v1334_v6, %v1163_v18  ;;  %v1335_v47 = vsel %vm1323_vm10, %v1318_v28, %v1117_v48 }
 0x157   : > { %v1023_v23 = vpop.permute.xlu1 %1022  ;;  %v977_v34 = vpop.permute.xlu0 %976 }
 0x158   : > { %v1302_v4 = vsel %vm1289_vm8, %v1285_v8, %v1023_v23  ;;  %v1286_v51 = vsel %vm1272_vm7, %v1269_v29, %v977_v34 }
 0x15b   : > { %v1211_v46 = vpop.permute.xlu1 %1210  ;;  %v1165_v11 = vpop.permute.xlu0 %1164 }
 0x15c   : > { %v1368_v1 = vsel %vm1357_vm12, %v1351_v7, %v1211_v46  ;;  %v1352_v22 = vsel %vm1340_vm11, %v1335_v47, %v1165_v11 }
 0x15d   : > { %2011 = vmatprep.mubr.msk.f32.mxu1 %vm1379_vm13, %v1368_v1 }
 0x15f   : > { %v1025_v5 = vpop.permute.xlu1 %1024  ;;  %v883_v19 = vpop.permute.xlu0 %882 }
 0x160   : > { %v1303_v42 = vsel %vm1289_vm8, %v1286_v51, %v1025_v5  ;;  %v1253_v60 = vsel %vm1238_vm5, %v2596_v26, %v883_v19 }
 0x163   : > { %v1213_v41 = vpop.permute.xlu1 %1212  ;;  %v1071_v3 = vpop.permute.xlu0 %1070 }
 0x164   : > { %v1369_v27 = vsel %vm1357_vm12, %v1352_v22, %v1213_v41  ;;  %v1319_v15 = vsel %vm1306_vm9, %v1302_v4, %v1071_v3 }
 0x165   : > { %2012 = vmatmul.mubr.msk.f32.gmra.mrb[2].mxu1 %vm1379_vm13, %v1369_v27 }
 0x167   : > { %v931_v20 = vpop.permute.xlu1 %930  ;;  %v885_v25 = vpop.permute.xlu0 %884 }
 0x168   : > { %v1254_v32 = vsel %vm1238_vm5, %v2605_v35, %v885_v25  ;;  %v1270_v18 = vsel %vm1255_vm6, %v1253_v60, %v931_v20 }
 0x16b   : > { %v1119_v21 = vpop.permute.xlu1 %1118  ;;  %v1073_v0 = vpop.permute.xlu0 %1072 }
 0x16c   : > { %v1336_v50 = vsel %vm1323_vm10, %v1319_v15, %v1119_v21  ;;  %v1320_v53 = vsel %vm1306_vm9, %v1303_v42, %v1073_v0 }
 0x16f   : > { %v979_v39 = vpop.permute.xlu1 %978  ;;  %v933_v40 = vpop.permute.xlu0 %932 }
 0x170   : > { %v1271_v48 = vsel %vm1255_vm6, %v1254_v32, %v933_v40  ;;  %v1287_v9 = vsel %vm1272_vm7, %v1270_v18, %v979_v39 }
 0x173   : > { %v1167_v14 = vpop.permute.xlu1 %1166  ;;  %v1121_v38 = vpop.permute.xlu0 %1120 }
 0x174   : > { %v1353_v57 = vsel %vm1340_vm11, %v1336_v50, %v1167_v14  ;;  %v1337_v54 = vsel %vm1323_vm10, %v1320_v53, %v1121_v38 }
 0x177   : > { %v1027_v36 = vpop.permute.xlu1 %1026  ;;  %v981_v49 = vpop.permute.xlu0 %980 }
 0x178   : > { %v1288_v61 = vsel %vm1272_vm7, %v1271_v48, %v981_v49  ;;  %v1304_v34 = vsel %vm1289_vm8, %v1287_v9, %v1027_v36 }
 0x17b   : > { %v1215_v55 = vpop.permute.xlu1 %1214  ;;  %v1169_v17 = vpop.permute.xlu0 %1168 }
 0x17c   : > { %v1370_v56 = vsel %vm1357_vm12, %v1353_v57, %v1215_v55  ;;  %v1354_v58 = vsel %vm1340_vm11, %v1337_v54, %v1169_v17 }
 0x17d   : > { %2014 = vmatprep.mubr.msk.f32.mxu1 %vm1379_vm13, %v1370_v56 }
 0x17f   : > { %v1075_v52 = vpop.permute.xlu1 %1074  ;;  %v1029_v37 = vpop.permute.xlu0 %1028 }
 0x180   : > { %v1305_v2 = vsel %vm1289_vm8, %v1288_v61, %v1029_v37  ;;  %v1321_v26 = vsel %vm1306_vm9, %v1304_v34, %v1075_v52 }
 0x183   : > { %v1077_v30 = vpop.permute.xlu1 %1076  ;;  %v1217_v62 = vpop.permute.xlu0 %1216 }
 0x184   : > { %v1371_v16 = vsel %vm1357_vm12, %v1354_v58, %v1217_v62  ;;  %v1322_v31 = vsel %vm1306_vm9, %v1305_v2, %v1077_v30 }
 0x185   : > { %2015 = vmatmul.mubr.msk.f32.gmra.mrb[4].mxu1 %vm1379_vm13, %v1371_v16 }
 0x187   : > { %v1125_v43 = vpop.permute.xlu1 %1124  ;;  %v1123_v59 = vpop.permute.xlu0 %1122 }
 0x188   : > { %v1339_v35 = vsel %vm1323_vm10, %v1322_v31, %v1125_v43  ;;  %v1338_v6 = vsel %vm1323_vm10, %v1321_v26, %v1123_v59 }
 0x18b   : > { %v1173_v63 = vpop.permute.xlu1 %1172  ;;  %v1171_v23 = vpop.permute.xlu0 %1170 }
 0x18c   : > { %v1356_v7 = vsel %vm1340_vm11, %v1339_v35, %v1173_v63  ;;  %v1355_v46 = vsel %vm1340_vm11, %v1338_v6, %v1171_v23 }
 0x18f   : > { %v1221_v11 = vpop.permute.xlu1 %1220  ;;  %v1219_v1 = vpop.permute.xlu0 %1218 }
 0x190   : > { %v1373_v24 = vsel %vm1357_vm12, %v1356_v7, %v1221_v11  ;;  %v1372_v10 = vsel %vm1357_vm12, %v1355_v46, %v1219_v1 }
 0x191   : > { %2017 = vmatprep.mubr.msk.f32.mxu1 %vm1379_vm13, %v1372_v10 }
 0x192   : > { %2018 = vmatmul.mubr.msk.f32.gmra.mrb[6].mxu1 %vm1379_vm13, %v1373_v24 }
 0x199   : > { %v1998_v33 = vpop.f32.mrb[0].mxu0 }
 0x19a   : > { %1578 = vst.msk [vmem:[%s2892_s11 + $0x8] sm:$0xff] %vm1238_vm5, %v1998_v33  ;;  %v1594_v5 = vsel %vm1238_vm5, %v1998_v33, 0.0  ;;  %v1631_v19 = vmul.f32 %v1998_v33, %v1998_v33  ;;  %v1498_v13 = vpop.f32.mrb[1].mxu0 }
 0x19b   : > { %1577 = vst.msk [vmem:[%s2892_s11] sm:$0xff] %vm1238_vm5, %v1498_v13  ;;  %v1593_v28 = vsel %vm1238_vm5, %v1498_v13, 0.0  ;;  %v1630_v47 = vmul.f32 %v1498_v13, %v1498_v13 }
 0x19c   : > { %v1647_v22 = vsel %vm1238_vm5, %v1631_v19, 0.0  ;;  %v1595_v41 = vadd.f32 %v1594_v5, %v1593_v28 }
 0x19d   : > { %v1646_v3 = vsel %vm1238_vm5, %v1630_v47, 0.0 }
 0x19e   : > { %v1648_v27 = vadd.f32 %v1647_v22, %v1646_v3 }
 0x1b9   : > { %v2001_v20 = vpop.f32.mrb[2].mxu0 }
 0x1ba   : > { %1580 = vst.msk [vmem:[%s2892_s11 + $0x18] sm:$0xff] %vm1238_vm5, %v2001_v20  ;;  %v1508_v25 = vpop.f32.mrb[3].mxu0  ;;  %v1633_v21 = vmul.f32 %v2001_v20, %v2001_v20  ;;  %v1598_v14 = vsel %vm1238_vm5, %v2001_v20, 0.0 }
 0x1bb   : > { %1579 = vst.msk [vmem:[%s2892_s11 + $0x10] sm:$0xff] %vm1238_vm5, %v1508_v25  ;;  %v1596_v0 = vsel %vm1238_vm5, %v1508_v25, 0.0  ;;  %v1632_v39 = vmul.f32 %v1508_v25, %v1508_v25 }
 0x1bc   : > { %v1597_v40 = vadd.f32 %v1596_v0, %v1595_v41  ;;  %v1651_v8 = vsel %vm1238_vm5, %v1633_v21, 0.0 }
 0x1bd   : > { %v1649_v38 = vsel %vm1238_vm5, %v1632_v39, 0.0 }
 0x1be   : > { %v1650_v44 = vadd.f32 %v1649_v38, %v1648_v27  ;;  %v1599_v45 = vadd.f32 %v1598_v14, %v1597_v40 }
 0x1c0   : > { %v1652_v36 = vadd.f32 %v1651_v8, %v1650_v44 }
 0x1d9   : > { %v2004_v49 = vpop.f32.mrb[4].mxu0 }
 0x1da   : > { %1582 = vst.msk [vmem:[%s2892_s11 + $0x28] sm:$0xff] %vm1238_vm5, %v2004_v49  ;;  %v1518_v4 = vpop.f32.mrb[5].mxu0  ;;  %v1635_v15 = vmul.f32 %v2004_v49, %v2004_v49  ;;  %v1602_v17 = vsel %vm1238_vm5, %v2004_v49, 0.0 }
 0x1db   : > { %1581 = vst.msk [vmem:[%s2892_s11 + $0x20] sm:$0xff] %vm1238_vm5, %v1518_v4  ;;  %v1600_v50 = vsel %vm1238_vm5, %v1518_v4, 0.0  ;;  %v1634_v57 = vmul.f32 %v1518_v4, %v1518_v4 }
 0x1dc   : > { %v1601_v55 = vadd.f32 %v1600_v50, %v1599_v45  ;;  %v1655_v51 = vsel %vm1238_vm5, %v1635_v15, 0.0 }
 0x1dd   : > { %v1653_v56 = vsel %vm1238_vm5, %v1634_v57, 0.0 }
 0x1de   : > { %v1654_v12 = vadd.f32 %v1653_v56, %v1652_v36  ;;  %v1603_v29 = vadd.f32 %v1602_v17, %v1601_v55 }
 0x1e0   : > { %v1656_v52 = vadd.f32 %v1655_v51, %v1654_v12 }
 0x1f8   : > { %v2007_v37 = vpop.f32.mrb[6].mxu0 }
 0x1f9   : > { %1584 = vst.msk [vmem:[%s2892_s11 + $0x38] sm:$0xff] %vm1238_vm5, %v2007_v37  ;;  %v1528_v42 = vpop.f32.mrb[7].mxu0  ;;  %v1637_v53 = vmul.f32 %v2007_v37, %v2007_v37  ;;  %v1606_v62 = vsel %vm1238_vm5, %v2007_v37, 0.0 }
 0x1fa   : > { %1583 = vst.msk [vmem:[%s2892_s11 + $0x30] sm:$0xff] %vm1238_vm5, %v1528_v42  ;;  %v1604_v54 = vsel %vm1238_vm5, %v1528_v42, 0.0  ;;  %v1636_v58 = vmul.f32 %v1528_v42, %v1528_v42 }
 0x1fb   : > { %v1605_v30 = vadd.f32 %v1604_v54, %v1603_v29  ;;  %v1659_v60 = vsel %vm1238_vm5, %v1637_v53, 0.0 }
 0x1fc   : > { %v1657_v16 = vsel %vm1238_vm5, %v1636_v58, 0.0 }
 0x1fd   : > { %v1607_v43 = vadd.f32 %v1606_v62, %v1605_v30  ;;  %v1658_v59 = vadd.f32 %v1657_v16, %v1656_v52 }
 0x1ff   : > { %v1660_v32 = vadd.f32 %v1659_v60, %v1658_v59 }
 0x218   : > { %v2010_v18 = vpop.f32.mrb[0].mxu1 }
 0x219   : > { %1586 = vst.msk [vmem:[%s2892_s11 + $0x48] sm:$0xff] %vm1238_vm5, %v2010_v18  ;;  %v1538_v48 = vpop.f32.mrb[1].mxu1  ;;  %v1639_v9 = vmul.f32 %v2010_v18, %v2010_v18  ;;  %v1610_v34 = vsel %vm1238_vm5, %v2010_v18, 0.0 }
 0x21a   : > { %1585 = vst.msk [vmem:[%s2892_s11 + $0x40] sm:$0xff] %vm1238_vm5, %v1538_v48  ;;  %v1608_v61 = vsel %vm1238_vm5, %v1538_v48, 0.0  ;;  %v1638_v63 = vmul.f32 %v1538_v48, %v1538_v48 }
 0x21b   : > { %v1609_v23 = vadd.f32 %v1608_v61, %v1607_v43  ;;  %v1663_v35 = vsel %vm1238_vm5, %v1639_v9, 0.0 }
 0x21c   : > { %v1661_v2 = vsel %vm1238_vm5, %v1638_v63, 0.0 }
 0x21d   : > { %v1662_v26 = vadd.f32 %v1661_v2, %v1660_v32  ;;  %v1611_v31 = vadd.f32 %v1610_v34, %v1609_v23 }
 0x21f   : > { %v1664_v6 = vadd.f32 %v1663_v35, %v1662_v26 }
 0x238   : > { %v2013_v7 = vpop.f32.mrb[2].mxu1 }
 0x239   : > { %1588 = vst.msk [vmem:[%s2892_s11 + $0x58] sm:$0xff] %vm1238_vm5, %v2013_v7  ;;  %v1548_v46 = vpop.f32.mrb[3].mxu1  ;;  %v1641_v11 = vmul.f32 %v2013_v7, %v2013_v7  ;;  %v1614_v33 = vsel %vm1238_vm5, %v2013_v7, 0.0 }
 0x23a   : > { %1587 = vst.msk [vmem:[%s2892_s11 + $0x50] sm:$0xff] %vm1238_vm5, %v1548_v46  ;;  %v1612_v1 = vsel %vm1238_vm5, %v1548_v46, 0.0  ;;  %v1640_v24 = vmul.f32 %v1548_v46, %v1548_v46 }
 0x23b   : > { %v1613_v10 = vadd.f32 %v1612_v1, %v1611_v31  ;;  %v1667_v28 = vsel %vm1238_vm5, %v1641_v11, 0.0 }
 0x23c   : > { %v1665_v5 = vsel %vm1238_vm5, %v1640_v24, 0.0 }
 0x23d   : > { %v1666_v19 = vadd.f32 %v1665_v5, %v1664_v6  ;;  %v1615_v13 = vadd.f32 %v1614_v33, %v1613_v10 }
 0x23f   : > { %v1668_v47 = vadd.f32 %v1667_v28, %v1666_v19 }
 0x258   : > { %v2016_v22 = vpop.f32.mrb[4].mxu1 }
 0x259   : > { %1590 = vst.msk [vmem:[%s2892_s11 + $0x68] sm:$0xff] %vm1238_vm5, %v2016_v22  ;;  %v1558_v41 = vpop.f32.mrb[5].mxu1  ;;  %v1643_v3 = vmul.f32 %v2016_v22, %v2016_v22  ;;  %v1618_v21 = vsel %vm1238_vm5, %v2016_v22, 0.0 }
 0x25a   : > { %1589 = vst.msk [vmem:[%s2892_s11 + $0x60] sm:$0xff] %vm1238_vm5, %v1558_v41  ;;  %v1616_v27 = vsel %vm1238_vm5, %v1558_v41, 0.0  ;;  %v1642_v20 = vmul.f32 %v1558_v41, %v1558_v41 }
 0x25b   : > { %v1617_v25 = vadd.f32 %v1616_v27, %v1615_v13  ;;  %v1671_v14 = vsel %vm1238_vm5, %v1643_v3, 0.0 }
 0x25c   : > { %v1669_v0 = vsel %vm1238_vm5, %v1642_v20, 0.0 }
 0x25d   : > { %v1670_v39 = vadd.f32 %v1669_v0, %v1668_v47  ;;  %v1619_v40 = vadd.f32 %v1618_v21, %v1617_v25 }
 0x25f   : > { %v1672_v38 = vadd.f32 %v1671_v14, %v1670_v39 }
 0x265   : > { %v2019_v44 = vpop.f32.mrb[6].mxu1 }
 0x266   : > { %1592 = vst.msk [vmem:[%s2892_s11 + $0x78] sm:$0xff] %vm1238_vm5, %v2019_v44  ;;  %v1568_v45 = vpop.f32.mrb[7].mxu1  ;;  %v1645_v8 = vmul.f32 %v2019_v44, %v2019_v44  ;;  %v1622_v15 = vsel %vm1238_vm5, %v2019_v44, 0.0 }
 0x267   : > { %1591 = vst.msk [vmem:[%s2892_s11 + $0x70] sm:$0xff] %vm1238_vm5, %v1568_v45  ;;  %v1620_v36 = vsel %vm1238_vm5, %v1568_v45, 0.0  ;;  %v1644_v49 = vmul.f32 %v1568_v45, %v1568_v45 }
 0x268   : > { %v1621_v4 = vadd.f32 %v1620_v36, %v1619_v40  ;;  %v1675_v17 = vsel %vm1238_vm5, %v1645_v8, 0.0 }
 0x269   : > { %v1673_v50 = vsel %vm1238_vm5, %v1644_v49, 0.0 }
 0x26a   : > { %v1623_v57 = vadd.f32 %v1622_v15, %v1621_v4  ;;  %v1674_v55 = vadd.f32 %v1673_v50, %v1672_v38 }
 0x26c   : > { %v1624_v56 = vrot.slane %v1623_v57, 4  ;;  %v1676_v12 = vadd.f32 %v1675_v17, %v1674_v55 }
 0x26e   : > { %v1625_v29 = vadd.f32 %v1624_v56, %v1623_v57  ;;  %v1677_v51 = vrot.slane %v1676_v12, 4 }
 0x270   : > { %v1626_v52 = vrot.slane %v1625_v29, 2  ;;  %v1678_v37 = vadd.f32 %v1677_v51, %v1676_v12 }
 0x272   : > { %v1627_v42 = vadd.f32 %v1626_v52, %v1625_v29  ;;  %v1679_v53 = vrot.slane %v1678_v37, 2 }
 0x274   : > { %v1628_v54 = vrot.slane %v1627_v42, 1  ;;  %v1680_v58 = vadd.f32 %v1679_v53, %v1678_v37  ;;  %1687 = sbr.rel (%p1952_p12) target bundleno = 636 (0x27c), region = 48 }
 0x276   : > { %v1681_v30 = vrot.slane %v1680_v58, 1  ;;  %v1629_v62 = vadd.f32 %v1628_v54, %v1627_v42 }
 0x278   : > { %v1682_v16 = vadd.f32 %v1681_v30, %v1680_v58 }
 0x27a   : > { %v1683_v43 = vsel %vm653_vm0, %v1629_v62, %v1682_v16 }
 0x27b   : > { %1689 = vst.msk [vmem:[#allocation2] sm:$0x3] %vm1688_vm15, %v1683_v43 }
 0x27c PF: > { %p1953_p13 = scmp.le.s32.totalorder %s2104_s24, 0 }
 0x27d   : > { %vm1696_vm1 = vcmask (!%p1953_p13), 25600  }
 0x27e   : > { %1693 = sbr.rel (%p1953_p13) target bundleno = 646 (0x286), region = 52 }
 0x282   : > { %v1694_v59 = vld [vmem:[#allocation2] sm:$0x3] (!%p1953_p13) }
 0x283   : > { %v1695_v60 = vadd.f32 (!%p1953_p13), %v1694_v59, %v1683_v43 }
 0x285   : > { %1697 = vst.msk [vmem:[#allocation2] sm:$0x3] %vm1696_vm1, %v1695_v60 }
 0x286 PF: > { %p1954_p0 = scmp.ne.s32.totalorder %s2104_s24, 1 }
 0x287   : > { %vm1703_vm0 = vcmask (!%p1954_p0), 25600  }
 0x288   : > { %1701 = sbr.rel (%p1954_p0) target bundleno = 655 (0x28f), region = 56 }
 0x28c   : > { %v1702_v32 = vld [vmem:[#allocation2] sm:$0x3] (!%p1954_p0) }
 0x28d   : > { %1704 = vst.msk [vmem:[%s2212_s15] sm:$0x3] (!%p1954_p0), %vm1703_vm0, %v1702_v32 }
 0x28f PF: > { %s18_s28 = sadd.s32 1, %s2120_s28   ;;  %s2989_s24 = smov %s2112_s26 }
 0x290   : > { %p15_p1 = scmp.ge.s32.totalorder %s18_s28, 6   ;;  %s2990_s25 = smov %s2116_s27 }
 0x291   : > { %s2991_s26 = smov %s2994_s29  ;;  %s2992_s27 = smov %s2998_s30 }
 0x292   :  { %17 = sbr.rel (!%p15_p1) target bundleno = 3 (0x3), region = 104 }

</bundles_post_ra>
